<compile_context>
chip_gen: v7x
topology: tpu7x:2x2x1
jax: 0.10.0
libtpu: 0.0.40
codegen_flags: <defaults>
</compile_context>

<pallas_src>
import jax
import jax.numpy as jnp
from jax.experimental import pallas as pl
from jax.experimental.pallas import tpu as pltpu

NUM_HEADS = 4
LN_EPS = 1e-5


# ---------------------------------------------------------------------------
# helpers
# ---------------------------------------------------------------------------
def _layernorm(x, w, b):
  mu = jnp.mean(x, axis=-1, keepdims=True)
  var = jnp.mean(jnp.square(x - mu), axis=-1, keepdims=True)
  return (x - mu) * jax.lax.rsqrt(var + LN_EPS) * w + b


def _full_specs(arrays):
  """Full-array (single block) BlockSpecs — block shape == array shape."""
  specs = []
  for a in arrays:
    nd = a.ndim
    specs.append(pl.BlockSpec(a.shape, lambda *_, n=nd: (0,) * n))
  return specs


def _call(kernel, inputs, out_shape):
  return pl.pallas_call(
      kernel,
      out_shape=out_shape,
      in_specs=_full_specs(inputs),
      out_specs=pl.BlockSpec(out_shape.shape,
                             lambda *_, n=len(out_shape.shape): (0,) * n),
  )(*inputs)


# ---------------------------------------------------------------------------
# fused transformer kernel: grid = (batch_blocks, n_layers)
# ---------------------------------------------------------------------------
def _transformer_kernel(prompts_ref, pos_ref,
                        ln1w_ref, ln1b_ref,
                        wq_ref, bq_ref, wk_ref, bk_ref, wv_ref, bv_ref,
                        wo_ref, bo_ref, ln2w_ref, ln2b_ref,
                        w1_ref, b1_ref, w2_ref, b2_ref,
                        x_ref):
  B, L, D = x_ref.shape
  H = NUM_HEADS
  hd = D // H
  scale = 1.0 / float(hd) ** 0.5
  M = B * L

  # Layer 0: initialize the resident activation block (prompts + pos-embed).
  @pl.when(pl.program_id(1) == 0)
  def _():
    x_ref[...] = prompts_ref[...] + pos_ref[...]

  x2 = x_ref[...].reshape(M, D)                       # (M, D) f32, VMEM-resident

  # ---- attention branch ----------------------------------------------------
  h = _layernorm(x2, ln1w_ref[0], ln1b_ref[0])
  hb = h.astype(jnp.bfloat16)
  # PyTorch Linear: y = x @ W.T + b  (W is (out, in)) -> contract on 'd'.
  q = (jnp.einsum('md,ed->me', hb, wq_ref[0],
                  preferred_element_type=jnp.float32) + bq_ref[0]) * scale
  k = jnp.einsum('md,ed->me', hb, wk_ref[0],
                 preferred_element_type=jnp.float32) + bk_ref[0]
  v = jnp.einsum('md,ed->me', hb, wv_ref[0],
                 preferred_element_type=jnp.float32) + bv_ref[0]

  # Causal additive mask, built in-kernel (no HBM DMA per layer).
  rows = jax.lax.broadcasted_iota(jnp.int32, (L, L), 0)
  cols = jax.lax.broadcasted_iota(jnp.int32, (L, L), 1)
  neg_mask = jnp.where(cols > rows, jnp.float32(-1e9), jnp.float32(0.0))

  wo_full = wo_ref[0]                                  # (D, D) bf16
  attn = jnp.zeros((M, D), jnp.float32)
  for hh in range(H):                                  # static unroll over heads
    sl = slice(hh * hd, (hh + 1) * hd)
    qh = q[:, sl].reshape(B, L, hd).astype(jnp.bfloat16)
    kh = k[:, sl].reshape(B, L, hd).astype(jnp.bfloat16)
    vh = v[:, sl].reshape(B, L, hd).astype(jnp.bfloat16)
    s = jnp.einsum('bqd,bkd->bqk', qh, kh,
                   preferred_element_type=jnp.float32) + neg_mask   # f32
    s = s - jnp.max(s, axis=-1, keepdims=True)
    p = jnp.exp(s)
    p = p * pl.reciprocal(jnp.sum(p, axis=-1, keepdims=True), approx=True)
    oh = jnp.einsum('bqk,bkd->bqd', p.astype(jnp.bfloat16), vh,
                    preferred_element_type=jnp.float32)             # (B, L, hd)
    # Per-head out-projection accumulation (equivalent to concat + full
    # out-proj, but avoids the lane-dim concatenate).
    attn = attn + jnp.einsum('mk,dk->md',
                             oh.reshape(M, hd).astype(jnp.bfloat16),
                             wo_full[:, sl],
                             preferred_element_type=jnp.float32)
  attn = attn + bo_ref[0]
  x2 = x2 + attn

  # ---- MLP branch ------------------------------------------------------------
  h2 = _layernorm(x2, ln2w_ref[0], ln2b_ref[0]).astype(jnp.bfloat16)
  m = jnp.einsum('md,fd->mf', h2, w1_ref[0],
                 preferred_element_type=jnp.float32) + b1_ref[0]
  m = m * jax.nn.sigmoid(1.702 * m)                    # QuickGELU (f32)
  m = jnp.einsum('mf,df->md', m.astype(jnp.bfloat16), w2_ref[0],
                 preferred_element_type=jnp.float32) + b2_ref[0]
  x2 = x2 + m

  x_ref[...] = x2.reshape(B, L, D)


def _head_kernel(x_ref, lnw_ref, lnb_ref, proj_ref, o_ref):
  # ln_final + @ text_projection on gathered EOT tokens (B, D).
  # (LayerNorm is per-token, so gather-then-LN == LN-then-gather.)
  x = _layernorm(x_ref[...], lnw_ref[...], lnb_ref[...])
  o_ref[...] = jnp.dot(x, proj_ref[...], preferred_element_type=jnp.float32)


# ---------------------------------------------------------------------------
# forward pass (NegaTextEncoder.forward)
# ---------------------------------------------------------------------------
def nega_text_encoder(prompts, tokenized_prompts, params):
  if prompts.ndim == 4:
    prompts = prompts.reshape(-1, prompts.shape[2], prompts.shape[3])
  prompts = prompts.astype(jnp.float32)
  B, L, D = prompts.shape
  n_layers = params['wq'].shape[0]
  MLP = params['w1'].shape[1]
  assert D % NUM_HEADS == 0

  # One batch block for these sizes; shrink tb to shard over v7x megacores /
  # to fit VMEM for large B.  (For very large weights, also consider
  # pltpu.CompilerParams(vmem_limit_bytes=...) / K-tiling of w1/w2.)
  tb = B
  nb = B // tb

  def lspec(shape):
    nd = len(shape)
    return pl.BlockSpec((1,) + tuple(shape),
                        lambda b, l, n=nd: (l,) + (0,) * n)

  act_spec = pl.BlockSpec((tb, L, D), lambda b, l: (b, 0, 0))
  in_specs = [
      act_spec,                                        # prompts
      pl.BlockSpec((L, D), lambda b, l: (0, 0)),       # positional embedding
      lspec((1, D)), lspec((1, D)),                    # ln1 w/b
      lspec((D, D)), lspec((1, D)),                    # wq, bq
      lspec((D, D)), lspec((1, D)),                    # wk, bk
      lspec((D, D)), lspec((1, D)),                    # wv, bv
      lspec((D, D)), lspec((1, D)),                    # wo, bo
      lspec((1, D)), lspec((1, D)),                    # ln2 w/b
      lspec((MLP, D)), lspec((1, MLP)),                # w1, b1
      lspec((D, MLP)), lspec((1, D)),                  # w2, b2
  ]
  inputs = [
      prompts, params['positional_embedding'],
      params['ln1_w'], params['ln1_b'],
      params['wq'], params['bq'], params['wk'], params['bk'],
      params['wv'], params['bv'], params['wo'], params['bo'],
      params['ln2_w'], params['ln2_b'],
      params['w1'], params['b1'], params['w2'], params['b2'],
  ]

  x = pl.pallas_call(
      _transformer_kernel,
      out_shape=jax.ShapeDtypeStruct((B, L, D), jnp.float32),
      grid=(nb, n_layers),
      in_specs=in_specs,
      out_specs=act_spec,
      compiler_params=pltpu.CompilerParams(
          dimension_semantics=("parallel", "arbitrary")),
  )(*inputs)

  # x[arange(B), tokenized_prompts.argmax(-1)] @ text_projection
  # TODO(synk): the data-dependent EOT gather stays in JAX glue; a
  # scalar-prefetch (pl.Element / data-dependent index_map) gather would save
  # one pass over (B, L, D) but is not worth the lowering risk at these sizes.
  eot = jnp.argmax(tokenized_prompts, axis=-1)
  x_eot = x[jnp.arange(B), eot]                        # (B, D)

  out = _call(_head_kernel,
              [x_eot, params['ln_final_w'], params['ln_final_b'],
               params['text_projection']],
              jax.ShapeDtypeStruct((B, params['text_projection'].shape[1]),
                                   jnp.float32))
  return out


# ---------------------------------------------------------------------------
# deterministic synthetic parameters (CLIP text-encoder shapes, stacked/layer)
# ---------------------------------------------------------------------------
def init_params(key, n_layers, L, D, mlp, E):
  ks = jax.random.split(key, 10)

  def w(k, shape):
    return 0.02 * jax.random.normal(k, shape, jnp.float32)

  return {
      'positional_embedding': w(ks[0], (L, D)),
      'ln_final_w': jnp.ones((D,), jnp.float32),
      'ln_final_b': jnp.zeros((D,), jnp.float32),
      'text_projection': w(ks[1], (D, E)),
      # per-layer params stacked along a leading n_layers axis
      'ln1_w': jnp.ones((n_layers, 1, D), jnp.float32),
      'ln1_b': jnp.zeros((n_layers, 1, D), jnp.float32),
      'ln2_w': jnp.ones((n_layers, 1, D), jnp.float32),
      'ln2_b': jnp.zeros((n_layers, 1, D), jnp.float32),
      'wq': w(ks[2], (n_layers, D, D)).astype(jnp.bfloat16),
      'wk': w(ks[3], (n_layers, D, D)).astype(jnp.bfloat16),
      'wv': w(ks[4], (n_layers, D, D)).astype(jnp.bfloat16),
      'wo': w(ks[5], (n_layers, D, D)).astype(jnp.bfloat16),
      'bq': jnp.zeros((n_layers, 1, D), jnp.float32),
      'bk': jnp.zeros((n_layers, 1, D), jnp.float32),
      'bv': jnp.zeros((n_layers, 1, D), jnp.float32),
      'bo': jnp.zeros((n_layers, 1, D), jnp.float32),
      'w1': w(ks[6], (n_layers, mlp, D)).astype(jnp.bfloat16),
      'b1': jnp.zeros((n_layers, 1, mlp), jnp.float32),
      'w2': w(ks[7], (n_layers, D, mlp)).astype(jnp.bfloat16),
      'b2': jnp.zeros((n_layers, 1, D), jnp.float32),
  }


if __name__ == "__main__":
  # Small shapes: 2 classes x 3 negative prompts, seq=8, width=32, heads=4,
  # 2 transformer layers, mlp=4*width, text-embed dim=16.
  N_CLS, N_NEG, L, D, N_LAYERS, MLP, E = 2, 3, 8, 32, 2, 128, 16
  B = N_CLS * N_NEG

  key = jax.random.PRNGKey(0)
  k_prompt, k_tok, k_param = jax.random.split(key, 3)

  prompts = 0.02 * jax.random.normal(k_prompt, (N_CLS, N_NEG, L, D), jnp.float32)
  tokenized_prompts = jax.random.randint(k_tok, (B, L), 0, 100, dtype=jnp.int32)

  params = init_params(k_param, N_LAYERS, L, D, MLP, E)

  out = nega_text_encoder(prompts, tokenized_prompts, params)
  out = jax.block_until_ready(out)

  assert out.shape == (B, E), out.shape
  assert jnp.all(jnp.isfinite(out))
  print("KERNEL_OK")
</pallas_src>

<mosaic_0001>
module attributes {stable_mosaic.version = 11 : i64} {
  func.func @_transformer_kernel(%arg0: i32, %arg1: i32, %arg2: memref<6x8x32xf32, #tpu.memory_space<vmem>>, %arg3: memref<8x32xf32, #tpu.memory_space<vmem>>, %arg4: memref<1x1x32xf32, #tpu.memory_space<vmem>>, %arg5: memref<1x1x32xf32, #tpu.memory_space<vmem>>, %arg6: memref<1x32x32xbf16, #tpu.memory_space<vmem>>, %arg7: memref<1x1x32xf32, #tpu.memory_space<vmem>>, %arg8: memref<1x32x32xbf16, #tpu.memory_space<vmem>>, %arg9: memref<1x1x32xf32, #tpu.memory_space<vmem>>, %arg10: memref<1x32x32xbf16, #tpu.memory_space<vmem>>, %arg11: memref<1x1x32xf32, #tpu.memory_space<vmem>>, %arg12: memref<1x32x32xbf16, #tpu.memory_space<vmem>>, %arg13: memref<1x1x32xf32, #tpu.memory_space<vmem>>, %arg14: memref<1x1x32xf32, #tpu.memory_space<vmem>>, %arg15: memref<1x1x32xf32, #tpu.memory_space<vmem>>, %arg16: memref<1x128x32xbf16, #tpu.memory_space<vmem>>, %arg17: memref<1x1x128xf32, #tpu.memory_space<vmem>>, %arg18: memref<1x32x128xbf16, #tpu.memory_space<vmem>>, %arg19: memref<1x1x32xf32, #tpu.memory_space<vmem>>, %arg20: memref<6x8x32xf32, #tpu.memory_space<vmem>>) attributes {dimension_semantics = [#tpu.dimension_semantics<parallel>, #tpu.dimension_semantics<arbitrary>], iteration_bounds = array<i64: 1, 2>, scalar_prefetch = 0 : i64, scratch_operands = 0 : i64, tpu.core_type = #tpu.core_type<tc>, window_params = [{transform_indices = @transform_0, window_bounds = array<i64: 6, 8, 32>}, {pipeline_mode = #tpu.pipeline_mode<synchronous>, transform_indices = @transform_1, window_bounds = array<i64: 8, 32>}, {transform_indices = @transform_2, window_bounds = array<i64: 1, 1, 32>}, {transform_indices = @transform_3, window_bounds = array<i64: 1, 1, 32>}, {transform_indices = @transform_4, window_bounds = array<i64: 1, 32, 32>}, {transform_indices = @transform_5, window_bounds = array<i64: 1, 1, 32>}, {transform_indices = @transform_6, window_bounds = array<i64: 1, 32, 32>}, {transform_indices = @transform_7, window_bounds = array<i64: 1, 1, 32>}, {transform_indices = @transform_8, window_bounds = array<i64: 1, 32, 32>}, {transform_indices = @transform_9, window_bounds = array<i64: 1, 1, 32>}, {transform_indices = @transform_10, window_bounds = array<i64: 1, 32, 32>}, {transform_indices = @transform_11, window_bounds = array<i64: 1, 1, 32>}, {transform_indices = @transform_12, window_bounds = array<i64: 1, 1, 32>}, {transform_indices = @transform_13, window_bounds = array<i64: 1, 1, 32>}, {transform_indices = @transform_14, window_bounds = array<i64: 1, 128, 32>}, {transform_indices = @transform_15, window_bounds = array<i64: 1, 1, 128>}, {transform_indices = @transform_16, window_bounds = array<i64: 1, 32, 128>}, {transform_indices = @transform_17, window_bounds = array<i64: 1, 1, 32>}, {transform_indices = @transform_18, window_bounds = array<i64: 6, 8, 32>}]} {
    %c0_i32 = arith.constant 0 : i32
    %0 = arith.cmpi eq, %arg1, %c0_i32 : i32
    %1 = arith.extui %0 : i1 to i32
    %c0_i32_0 = arith.constant 0 : i32
    %2 = arith.cmpi ne, %1, %c0_i32_0 : i32
    scf.if %2 {
      %c0_94 = arith.constant 0 : index
      %c0_95 = arith.constant 0 : index
      %c0_96 = arith.constant 0 : index
      %242 = vector.load %arg2[%c0_94, %c0_95, %c0_96] : memref<6x8x32xf32, #tpu.memory_space<vmem>>, vector<6x8x32xf32>
      %c0_97 = arith.constant 0 : index
      %c0_98 = arith.constant 0 : index
      %243 = vector.load %arg3[%c0_97, %c0_98] : memref<8x32xf32, #tpu.memory_space<vmem>>, vector<8x32xf32>
      %244 = vector.shape_cast %243 : vector<8x32xf32> to vector<1x8x32xf32>
      %245 = vector.broadcast %244 : vector<1x8x32xf32> to vector<6x8x32xf32>
      %246 = arith.addf %242, %245 : vector<6x8x32xf32>
      %c0_99 = arith.constant 0 : index
      %c0_100 = arith.constant 0 : index
      %c0_101 = arith.constant 0 : index
      %247 = vector.load %arg20[%c0_99, %c0_100, %c0_101] : memref<6x8x32xf32, #tpu.memory_space<vmem>>, vector<6x8x32xf32>
      tpu.vector_store %arg20[%c0_99, %c0_100, %c0_101], %246 {strides = array<i32>} : memref<6x8x32xf32, #tpu.memory_space<vmem>>, vector<6x8x32xf32>,
    } else {
    }
    %c0 = arith.constant 0 : index
    %c0_1 = arith.constant 0 : index
    %c0_2 = arith.constant 0 : index
    %3 = vector.load %arg20[%c0, %c0_1, %c0_2] : memref<6x8x32xf32, #tpu.memory_space<vmem>>, vector<6x8x32xf32>
    %4 = vector.shape_cast %3 : vector<6x8x32xf32> to vector<48x32xf32>
    %c0_3 = arith.constant 0 : index
    %c0_4 = arith.constant 0 : index
    %c0_5 = arith.constant 0 : index
    %5 = vector.load %arg4[%c0_3, %c0_4, %c0_5] : memref<1x1x32xf32, #tpu.memory_space<vmem>>, vector<1x1x32xf32>
    %6 = vector.shape_cast %5 : vector<1x1x32xf32> to vector<1x32xf32>
    %c0_6 = arith.constant 0 : index
    %c0_7 = arith.constant 0 : index
    %c0_8 = arith.constant 0 : index
    %7 = vector.load %arg5[%c0_6, %c0_7, %c0_8] : memref<1x1x32xf32, #tpu.memory_space<vmem>>, vector<1x1x32xf32>
    %8 = vector.shape_cast %7 : vector<1x1x32xf32> to vector<1x32xf32>
    %cst = arith.constant dense<0.000000e+00> : vector<48xf32>
    %9 = vector.multi_reduction <add>, %4, %cst [1] : vector<48x32xf32> to vector<48xf32>
    %10 = vector.shape_cast %9 : vector<48xf32> to vector<48x1xf32>
    %cst_9 = arith.constant 3.200000e+01 : f32
    %11 = vector.broadcast %cst_9 : f32 to vector<48x1xf32>
    %12 = arith.divf %10, %11 : vector<48x1xf32>
    %13 = vector.broadcast %12 : vector<48x1xf32> to vector<48x32xf32>
    %14 = arith.subf %4, %13 : vector<48x32xf32>
    %15 = arith.mulf %14, %14 : vector<48x32xf32>
    %cst_10 = arith.constant dense<0.000000e+00> : vector<48xf32>
    %16 = vector.multi_reduction <add>, %15, %cst_10 [1] : vector<48x32xf32> to vector<48xf32>
    %17 = vector.shape_cast %16 : vector<48xf32> to vector<48x1xf32>
    %cst_11 = arith.constant 3.200000e+01 : f32
    %18 = vector.broadcast %cst_11 : f32 to vector<48x1xf32>
    %19 = arith.divf %17, %18 : vector<48x1xf32>
    %20 = vector.broadcast %12 : vector<48x1xf32> to vector<48x32xf32>
    %21 = arith.subf %4, %20 : vector<48x32xf32>
    %cst_12 = arith.constant 9.99999974E-6 : f32
    %22 = vector.broadcast %cst_12 : f32 to vector<48x1xf32>
    %23 = arith.addf %19, %22 : vector<48x1xf32>
    %24 = math.rsqrt %23 : vector<48x1xf32>
    %25 = vector.broadcast %24 : vector<48x1xf32> to vector<48x32xf32>
    %26 = arith.mulf %21, %25 : vector<48x32xf32>
    %27 = vector.broadcast %6 : vector<1x32xf32> to vector<48x32xf32>
    %28 = arith.mulf %26, %27 : vector<48x32xf32>
    %29 = vector.broadcast %8 : vector<1x32xf32> to vector<48x32xf32>
    %30 = arith.addf %28, %29 : vector<48x32xf32>
    %31 = arith.truncf %30 : vector<48x32xf32> to vector<48x32xbf16>
    %c0_13 = arith.constant 0 : index
    %c0_14 = arith.constant 0 : index
    %c0_15 = arith.constant 0 : index
    %32 = vector.load %arg6[%c0_13, %c0_14, %c0_15] : memref<1x32x32xbf16, #tpu.memory_space<vmem>>, vector<1x32x32xbf16>
    %33 = vector.shape_cast %32 : vector<1x32x32xbf16> to vector<32x32xbf16>
    "tpu.trace_start"() <{level = 10 : i32, message = "md,ed->me"}> : () -> ()
    %cst_16 = arith.constant dense<0.000000e+00> : vector<48x32xf32>
    %34 = tpu.matmul %31, %33, %cst_16 {dimension_numbers = #tpu.dot_dimension_numbers<[1], [1], [0], [0], [0, 0, 1, 0], [], []>} : vector<48x32xbf16>, vector<32x32xbf16>, vector<48x32xf32> -> vector<48x32xf32>
    "tpu.trace_stop"() : () -> ()
    %c0_17 = arith.constant 0 : index
    %c0_18 = arith.constant 0 : index
    %c0_19 = arith.constant 0 : index
    %35 = vector.load %arg7[%c0_17, %c0_18, %c0_19] : memref<1x1x32xf32, #tpu.memory_space<vmem>>, vector<1x1x32xf32>
    %36 = vector.shape_cast %35 : vector<1x1x32xf32> to vector<1x32xf32>
    %37 = vector.broadcast %36 : vector<1x32xf32> to vector<48x32xf32>
    %38 = arith.addf %34, %37 : vector<48x32xf32>
    %cst_20 = arith.constant 0.353553385 : f32
    %39 = vector.broadcast %cst_20 : f32 to vector<48x32xf32>
    %40 = arith.mulf %38, %39 : vector<48x32xf32>
    %c0_21 = arith.constant 0 : index
    %c0_22 = arith.constant 0 : index
    %c0_23 = arith.constant 0 : index
    %41 = vector.load %arg8[%c0_21, %c0_22, %c0_23] : memref<1x32x32xbf16, #tpu.memory_space<vmem>>, vector<1x32x32xbf16>
    %42 = vector.shape_cast %41 : vector<1x32x32xbf16> to vector<32x32xbf16>
    "tpu.trace_start"() <{level = 10 : i32, message = "md,ed->me"}> : () -> ()
    %cst_24 = arith.constant dense<0.000000e+00> : vector<48x32xf32>
    %43 = tpu.matmul %31, %42, %cst_24 {dimension_numbers = #tpu.dot_dimension_numbers<[1], [1], [0], [0], [0, 0, 1, 0], [], []>} : vector<48x32xbf16>, vector<32x32xbf16>, vector<48x32xf32> -> vector<48x32xf32>
    "tpu.trace_stop"() : () -> ()
    %c0_25 = arith.constant 0 : index
    %c0_26 = arith.constant 0 : index
    %c0_27 = arith.constant 0 : index
    %44 = vector.load %arg9[%c0_25, %c0_26, %c0_27] : memref<1x1x32xf32, #tpu.memory_space<vmem>>, vector<1x1x32xf32>
    %45 = vector.shape_cast %44 : vector<1x1x32xf32> to vector<1x32xf32>
    %46 = vector.broadcast %45 : vector<1x32xf32> to vector<48x32xf32>
    %47 = arith.addf %43, %46 : vector<48x32xf32>
    %c0_28 = arith.constant 0 : index
    %c0_29 = arith.constant 0 : index
    %c0_30 = arith.constant 0 : index
    %48 = vector.load %arg10[%c0_28, %c0_29, %c0_30] : memref<1x32x32xbf16, #tpu.memory_space<vmem>>, vector<1x32x32xbf16>
    %49 = vector.shape_cast %48 : vector<1x32x32xbf16> to vector<32x32xbf16>
    "tpu.trace_start"() <{level = 10 : i32, message = "md,ed->me"}> : () -> ()
    %cst_31 = arith.constant dense<0.000000e+00> : vector<48x32xf32>
    %50 = tpu.matmul %31, %49, %cst_31 {dimension_numbers = #tpu.dot_dimension_numbers<[1], [1], [0], [0], [0, 0, 1, 0], [], []>} : vector<48x32xbf16>, vector<32x32xbf16>, vector<48x32xf32> -> vector<48x32xf32>
    "tpu.trace_stop"() : () -> ()
    %c0_32 = arith.constant 0 : index
    %c0_33 = arith.constant 0 : index
    %c0_34 = arith.constant 0 : index
    %51 = vector.load %arg11[%c0_32, %c0_33, %c0_34] : memref<1x1x32xf32, #tpu.memory_space<vmem>>, vector<1x1x32xf32>
    %52 = vector.shape_cast %51 : vector<1x1x32xf32> to vector<1x32xf32>
    %53 = vector.broadcast %52 : vector<1x32xf32> to vector<48x32xf32>
    %54 = arith.addf %50, %53 : vector<48x32xf32>
    %55 = tpu.iota {dimensions = array<i32: 0>} : vector<8x8xi32>
    %56 = tpu.iota {dimensions = array<i32: 1>} : vector<8x8xi32>
    %57 = arith.cmpi sgt, %56, %55 : vector<8x8xi32>
    %cst_35 = arith.constant -1.000000e+09 : f32
    %cst_36 = arith.constant 0.000000e+00 : f32
    %58 = vector.broadcast %cst_35 : f32 to vector<8x8xf32>
    %59 = vector.broadcast %cst_36 : f32 to vector<8x8xf32>
    %60 = arith.select %57, %58, %59 : vector<8x8xi1>, vector<8x8xf32>
    %c0_37 = arith.constant 0 : index
    %c0_38 = arith.constant 0 : index
    %c0_39 = arith.constant 0 : index
    %61 = vector.load %arg12[%c0_37, %c0_38, %c0_39] : memref<1x32x32xbf16, #tpu.memory_space<vmem>>, vector<1x32x32xbf16>
    %62 = vector.shape_cast %61 : vector<1x32x32xbf16> to vector<32x32xbf16>
    %cst_40 = arith.constant 0.000000e+00 : f32
    %63 = vector.broadcast %cst_40 : f32 to vector<48x32xf32>
    %64 = vector.extract_strided_slice %40 {offsets = [0, 0], sizes = [48, 8], strides = [1, 1]} : vector<48x32xf32> to vector<48x8xf32>
    %65 = vector.shape_cast %64 : vector<48x8xf32> to vector<6x8x8xf32>
    %66 = arith.truncf %65 : vector<6x8x8xf32> to vector<6x8x8xbf16>
    %67 = vector.extract_strided_slice %47 {offsets = [0, 0], sizes = [48, 8], strides = [1, 1]} : vector<48x32xf32> to vector<48x8xf32>
    %68 = vector.shape_cast %67 : vector<48x8xf32> to vector<6x8x8xf32>
    %69 = arith.truncf %68 : vector<6x8x8xf32> to vector<6x8x8xbf16>
    %70 = vector.extract_strided_slice %54 {offsets = [0, 0], sizes = [48, 8], strides = [1, 1]} : vector<48x32xf32> to vector<48x8xf32>
    %71 = vector.shape_cast %70 : vector<48x8xf32> to vector<6x8x8xf32>
    %72 = arith.truncf %71 : vector<6x8x8xf32> to vector<6x8x8xbf16>
    "tpu.trace_start"() <{level = 10 : i32, message = "bqd,bkd->bqk"}> : () -> ()
    %cst_41 = arith.constant dense<0.000000e+00> : vector<6x8x8xf32>
    %73 = tpu.matmul %66, %69, %cst_41 {dimension_numbers = #tpu.dot_dimension_numbers<[2], [2], [1], [1], [0, 0, 0, 1, 1, 1], [0], [0]>} : vector<6x8x8xbf16>, vector<6x8x8xbf16>, vector<6x8x8xf32> -> vector<6x8x8xf32>
    "tpu.trace_stop"() : () -> ()
    %74 = vector.shape_cast %60 : vector<8x8xf32> to vector<1x8x8xf32>
    %75 = vector.broadcast %74 : vector<1x8x8xf32> to vector<6x8x8xf32>
    %76 = arith.addf %73, %75 : vector<6x8x8xf32>
    %cst_42 = arith.constant dense<0xFF800000> : vector<6x8xf32>
    %77 = vector.multi_reduction <maximumf>, %76, %cst_42 [2] : vector<6x8x8xf32> to vector<6x8xf32>
    %78 = vector.shape_cast %77 : vector<6x8xf32> to vector<6x8x1xf32>
    %79 = vector.broadcast %78 : vector<6x8x1xf32> to vector<6x8x8xf32>
    %80 = arith.subf %76, %79 : vector<6x8x8xf32>
    %81 = math.exp %80 : vector<6x8x8xf32>
    %cst_43 = arith.constant dense<0.000000e+00> : vector<6x8xf32>
    %82 = vector.multi_reduction <add>, %81, %cst_43 [2] : vector<6x8x8xf32> to vector<6x8xf32>
    %83 = vector.shape_cast %82 : vector<6x8xf32> to vector<6x8x1xf32>
    %84 = tpu.reciprocal %83 {approx = true} : vector<6x8x1xf32> -> vector<6x8x1xf32>
    %85 = vector.broadcast %84 : vector<6x8x1xf32> to vector<6x8x8xf32>
    %86 = arith.mulf %81, %85 : vector<6x8x8xf32>
    %87 = arith.truncf %86 : vector<6x8x8xf32> to vector<6x8x8xbf16>
    "tpu.trace_start"() <{level = 10 : i32, message = "bqk,bkd->bqd"}> : () -> ()
    %cst_44 = arith.constant dense<0.000000e+00> : vector<6x8x8xf32>
    %88 = tpu.matmul %87, %72, %cst_44 {dimension_numbers = #tpu.dot_dimension_numbers<[2], [1], [1], [2], [0, 0, 0, 1, 1, 2], [0], [0]>} : vector<6x8x8xbf16>, vector<6x8x8xbf16>, vector<6x8x8xf32> -> vector<6x8x8xf32>
    "tpu.trace_stop"() : () -> ()
    %89 = vector.shape_cast %88 : vector<6x8x8xf32> to vector<48x8xf32>
    %90 = arith.truncf %89 : vector<48x8xf32> to vector<48x8xbf16>
    %91 = vector.extract_strided_slice %62 {offsets = [0, 0], sizes = [32, 8], strides = [1, 1]} : vector<32x32xbf16> to vector<32x8xbf16>
    "tpu.trace_start"() <{level = 10 : i32, message = "mk,dk->md"}> : () -> ()
    %cst_45 = arith.constant dense<0.000000e+00> : vector<48x32xf32>
    %92 = tpu.matmul %90, %91, %cst_45 {dimension_numbers = #tpu.dot_dimension_numbers<[1], [1], [0], [0], [0, 0, 1, 0], [], []>} : vector<48x8xbf16>, vector<32x8xbf16>, vector<48x32xf32> -> vector<48x32xf32>
    "tpu.trace_stop"() : () -> ()
    %93 = arith.addf %63, %92 : vector<48x32xf32>
    %94 = vector.extract_strided_slice %40 {offsets = [0, 8], sizes = [48, 8], strides = [1, 1]} : vector<48x32xf32> to vector<48x8xf32>
    %95 = vector.shape_cast %94 : vector<48x8xf32> to vector<6x8x8xf32>
    %96 = arith.truncf %95 : vector<6x8x8xf32> to vector<6x8x8xbf16>
    %97 = vector.extract_strided_slice %47 {offsets = [0, 8], sizes = [48, 8], strides = [1, 1]} : vector<48x32xf32> to vector<48x8xf32>
    %98 = vector.shape_cast %97 : vector<48x8xf32> to vector<6x8x8xf32>
    %99 = arith.truncf %98 : vector<6x8x8xf32> to vector<6x8x8xbf16>
    %100 = vector.extract_strided_slice %54 {offsets = [0, 8], sizes = [48, 8], strides = [1, 1]} : vector<48x32xf32> to vector<48x8xf32>
    %101 = vector.shape_cast %100 : vector<48x8xf32> to vector<6x8x8xf32>
    %102 = arith.truncf %101 : vector<6x8x8xf32> to vector<6x8x8xbf16>
    "tpu.trace_start"() <{level = 10 : i32, message = "bqd,bkd->bqk"}> : () -> ()
    %cst_46 = arith.constant dense<0.000000e+00> : vector<6x8x8xf32>
    %103 = tpu.matmul %96, %99, %cst_46 {dimension_numbers = #tpu.dot_dimension_numbers<[2], [2], [1], [1], [0, 0, 0, 1, 1, 1], [0], [0]>} : vector<6x8x8xbf16>, vector<6x8x8xbf16>, vector<6x8x8xf32> -> vector<6x8x8xf32>
    "tpu.trace_stop"() : () -> ()
    %104 = vector.shape_cast %60 : vector<8x8xf32> to vector<1x8x8xf32>
    %105 = vector.broadcast %104 : vector<1x8x8xf32> to vector<6x8x8xf32>
    %106 = arith.addf %103, %105 : vector<6x8x8xf32>
    %cst_47 = arith.constant dense<0xFF800000> : vector<6x8xf32>
    %107 = vector.multi_reduction <maximumf>, %106, %cst_47 [2] : vector<6x8x8xf32> to vector<6x8xf32>
    %108 = vector.shape_cast %107 : vector<6x8xf32> to vector<6x8x1xf32>
    %109 = vector.broadcast %108 : vector<6x8x1xf32> to vector<6x8x8xf32>
    %110 = arith.subf %106, %109 : vector<6x8x8xf32>
    %111 = math.exp %110 : vector<6x8x8xf32>
    %cst_48 = arith.constant dense<0.000000e+00> : vector<6x8xf32>
    %112 = vector.multi_reduction <add>, %111, %cst_48 [2] : vector<6x8x8xf32> to vector<6x8xf32>
    %113 = vector.shape_cast %112 : vector<6x8xf32> to vector<6x8x1xf32>
    %114 = tpu.reciprocal %113 {approx = true} : vector<6x8x1xf32> -> vector<6x8x1xf32>
    %115 = vector.broadcast %114 : vector<6x8x1xf32> to vector<6x8x8xf32>
    %116 = arith.mulf %111, %115 : vector<6x8x8xf32>
    %117 = arith.truncf %116 : vector<6x8x8xf32> to vector<6x8x8xbf16>
    "tpu.trace_start"() <{level = 10 : i32, message = "bqk,bkd->bqd"}> : () -> ()
    %cst_49 = arith.constant dense<0.000000e+00> : vector<6x8x8xf32>
    %118 = tpu.matmul %117, %102, %cst_49 {dimension_numbers = #tpu.dot_dimension_numbers<[2], [1], [1], [2], [0, 0, 0, 1, 1, 2], [0], [0]>} : vector<6x8x8xbf16>, vector<6x8x8xbf16>, vector<6x8x8xf32> -> vector<6x8x8xf32>
    "tpu.trace_stop"() : () -> ()
    %119 = vector.shape_cast %118 : vector<6x8x8xf32> to vector<48x8xf32>
    %120 = arith.truncf %119 : vector<48x8xf32> to vector<48x8xbf16>
    %121 = vector.extract_strided_slice %62 {offsets = [0, 8], sizes = [32, 8], strides = [1, 1]} : vector<32x32xbf16> to vector<32x8xbf16>
    "tpu.trace_start"() <{level = 10 : i32, message = "mk,dk->md"}> : () -> ()
    %cst_50 = arith.constant dense<0.000000e+00> : vector<48x32xf32>
    %122 = tpu.matmul %120, %121, %cst_50 {dimension_numbers = #tpu.dot_dimension_numbers<[1], [1], [0], [0], [0, 0, 1, 0], [], []>} : vector<48x8xbf16>, vector<32x8xbf16>, vector<48x32xf32> -> vector<48x32xf32>
    "tpu.trace_stop"() : () -> ()
    %123 = arith.addf %93, %122 : vector<48x32xf32>
    %124 = vector.extract_strided_slice %40 {offsets = [0, 16], sizes = [48, 8], strides = [1, 1]} : vector<48x32xf32> to vector<48x8xf32>
    %125 = vector.shape_cast %124 : vector<48x8xf32> to vector<6x8x8xf32>
    %126 = arith.truncf %125 : vector<6x8x8xf32> to vector<6x8x8xbf16>
    %127 = vector.extract_strided_slice %47 {offsets = [0, 16], sizes = [48, 8], strides = [1, 1]} : vector<48x32xf32> to vector<48x8xf32>
    %128 = vector.shape_cast %127 : vector<48x8xf32> to vector<6x8x8xf32>
    %129 = arith.truncf %128 : vector<6x8x8xf32> to vector<6x8x8xbf16>
    %130 = vector.extract_strided_slice %54 {offsets = [0, 16], sizes = [48, 8], strides = [1, 1]} : vector<48x32xf32> to vector<48x8xf32>
    %131 = vector.shape_cast %130 : vector<48x8xf32> to vector<6x8x8xf32>
    %132 = arith.truncf %131 : vector<6x8x8xf32> to vector<6x8x8xbf16>
    "tpu.trace_start"() <{level = 10 : i32, message = "bqd,bkd->bqk"}> : () -> ()
    %cst_51 = arith.constant dense<0.000000e+00> : vector<6x8x8xf32>
    %133 = tpu.matmul %126, %129, %cst_51 {dimension_numbers = #tpu.dot_dimension_numbers<[2], [2], [1], [1], [0, 0, 0, 1, 1, 1], [0], [0]>} : vector<6x8x8xbf16>, vector<6x8x8xbf16>, vector<6x8x8xf32> -> vector<6x8x8xf32>
    "tpu.trace_stop"() : () -> ()
    %134 = vector.shape_cast %60 : vector<8x8xf32> to vector<1x8x8xf32>
    %135 = vector.broadcast %134 : vector<1x8x8xf32> to vector<6x8x8xf32>
    %136 = arith.addf %133, %135 : vector<6x8x8xf32>
    %cst_52 = arith.constant dense<0xFF800000> : vector<6x8xf32>
    %137 = vector.multi_reduction <maximumf>, %136, %cst_52 [2] : vector<6x8x8xf32> to vector<6x8xf32>
    %138 = vector.shape_cast %137 : vector<6x8xf32> to vector<6x8x1xf32>
    %139 = vector.broadcast %138 : vector<6x8x1xf32> to vector<6x8x8xf32>
    %140 = arith.subf %136, %139 : vector<6x8x8xf32>
    %141 = math.exp %140 : vector<6x8x8xf32>
    %cst_53 = arith.constant dense<0.000000e+00> : vector<6x8xf32>
    %142 = vector.multi_reduction <add>, %141, %cst_53 [2] : vector<6x8x8xf32> to vector<6x8xf32>
    %143 = vector.shape_cast %142 : vector<6x8xf32> to vector<6x8x1xf32>
    %144 = tpu.reciprocal %143 {approx = true} : vector<6x8x1xf32> -> vector<6x8x1xf32>
    %145 = vector.broadcast %144 : vector<6x8x1xf32> to vector<6x8x8xf32>
    %146 = arith.mulf %141, %145 : vector<6x8x8xf32>
    %147 = arith.truncf %146 : vector<6x8x8xf32> to vector<6x8x8xbf16>
    "tpu.trace_start"() <{level = 10 : i32, message = "bqk,bkd->bqd"}> : () -> ()
    %cst_54 = arith.constant dense<0.000000e+00> : vector<6x8x8xf32>
    %148 = tpu.matmul %147, %132, %cst_54 {dimension_numbers = #tpu.dot_dimension_numbers<[2], [1], [1], [2], [0, 0, 0, 1, 1, 2], [0], [0]>} : vector<6x8x8xbf16>, vector<6x8x8xbf16>, vector<6x8x8xf32> -> vector<6x8x8xf32>
    "tpu.trace_stop"() : () -> ()
    %149 = vector.shape_cast %148 : vector<6x8x8xf32> to vector<48x8xf32>
    %150 = arith.truncf %149 : vector<48x8xf32> to vector<48x8xbf16>
    %151 = vector.extract_strided_slice %62 {offsets = [0, 16], sizes = [32, 8], strides = [1, 1]} : vector<32x32xbf16> to vector<32x8xbf16>
    "tpu.trace_start"() <{level = 10 : i32, message = "mk,dk->md"}> : () -> ()
    %cst_55 = arith.constant dense<0.000000e+00> : vector<48x32xf32>
    %152 = tpu.matmul %150, %151, %cst_55 {dimension_numbers = #tpu.dot_dimension_numbers<[1], [1], [0], [0], [0, 0, 1, 0], [], []>} : vector<48x8xbf16>, vector<32x8xbf16>, vector<48x32xf32> -> vector<48x32xf32>
    "tpu.trace_stop"() : () -> ()
    %153 = arith.addf %123, %152 : vector<48x32xf32>
    %154 = vector.extract_strided_slice %40 {offsets = [0, 24], sizes = [48, 8], strides = [1, 1]} : vector<48x32xf32> to vector<48x8xf32>
    %155 = vector.shape_cast %154 : vector<48x8xf32> to vector<6x8x8xf32>
    %156 = arith.truncf %155 : vector<6x8x8xf32> to vector<6x8x8xbf16>
    %157 = vector.extract_strided_slice %47 {offsets = [0, 24], sizes = [48, 8], strides = [1, 1]} : vector<48x32xf32> to vector<48x8xf32>
    %158 = vector.shape_cast %157 : vector<48x8xf32> to vector<6x8x8xf32>
    %159 = arith.truncf %158 : vector<6x8x8xf32> to vector<6x8x8xbf16>
    %160 = vector.extract_strided_slice %54 {offsets = [0, 24], sizes = [48, 8], strides = [1, 1]} : vector<48x32xf32> to vector<48x8xf32>
    %161 = vector.shape_cast %160 : vector<48x8xf32> to vector<6x8x8xf32>
    %162 = arith.truncf %161 : vector<6x8x8xf32> to vector<6x8x8xbf16>
    "tpu.trace_start"() <{level = 10 : i32, message = "bqd,bkd->bqk"}> : () -> ()
    %cst_56 = arith.constant dense<0.000000e+00> : vector<6x8x8xf32>
    %163 = tpu.matmul %156, %159, %cst_56 {dimension_numbers = #tpu.dot_dimension_numbers<[2], [2], [1], [1], [0, 0, 0, 1, 1, 1], [0], [0]>} : vector<6x8x8xbf16>, vector<6x8x8xbf16>, vector<6x8x8xf32> -> vector<6x8x8xf32>
    "tpu.trace_stop"() : () -> ()
    %164 = vector.shape_cast %60 : vector<8x8xf32> to vector<1x8x8xf32>
    %165 = vector.broadcast %164 : vector<1x8x8xf32> to vector<6x8x8xf32>
    %166 = arith.addf %163, %165 : vector<6x8x8xf32>
    %cst_57 = arith.constant dense<0xFF800000> : vector<6x8xf32>
    %167 = vector.multi_reduction <maximumf>, %166, %cst_57 [2] : vector<6x8x8xf32> to vector<6x8xf32>
    %168 = vector.shape_cast %167 : vector<6x8xf32> to vector<6x8x1xf32>
    %169 = vector.broadcast %168 : vector<6x8x1xf32> to vector<6x8x8xf32>
    %170 = arith.subf %166, %169 : vector<6x8x8xf32>
    %171 = math.exp %170 : vector<6x8x8xf32>
    %cst_58 = arith.constant dense<0.000000e+00> : vector<6x8xf32>
    %172 = vector.multi_reduction <add>, %171, %cst_58 [2] : vector<6x8x8xf32> to vector<6x8xf32>
    %173 = vector.shape_cast %172 : vector<6x8xf32> to vector<6x8x1xf32>
    %174 = tpu.reciprocal %173 {approx = true} : vector<6x8x1xf32> -> vector<6x8x1xf32>
    %175 = vector.broadcast %174 : vector<6x8x1xf32> to vector<6x8x8xf32>
    %176 = arith.mulf %171, %175 : vector<6x8x8xf32>
    %177 = arith.truncf %176 : vector<6x8x8xf32> to vector<6x8x8xbf16>
    "tpu.trace_start"() <{level = 10 : i32, message = "bqk,bkd->bqd"}> : () -> ()
    %cst_59 = arith.constant dense<0.000000e+00> : vector<6x8x8xf32>
    %178 = tpu.matmul %177, %162, %cst_59 {dimension_numbers = #tpu.dot_dimension_numbers<[2], [1], [1], [2], [0, 0, 0, 1, 1, 2], [0], [0]>} : vector<6x8x8xbf16>, vector<6x8x8xbf16>, vector<6x8x8xf32> -> vector<6x8x8xf32>
    "tpu.trace_stop"() : () -> ()
    %179 = vector.shape_cast %178 : vector<6x8x8xf32> to vector<48x8xf32>
    %180 = arith.truncf %179 : vector<48x8xf32> to vector<48x8xbf16>
    %181 = vector.extract_strided_slice %62 {offsets = [0, 24], sizes = [32, 8], strides = [1, 1]} : vector<32x32xbf16> to vector<32x8xbf16>
    "tpu.trace_start"() <{level = 10 : i32, message = "mk,dk->md"}> : () -> ()
    %cst_60 = arith.constant dense<0.000000e+00> : vector<48x32xf32>
    %182 = tpu.matmul %180, %181, %cst_60 {dimension_numbers = #tpu.dot_dimension_numbers<[1], [1], [0], [0], [0, 0, 1, 0], [], []>} : vector<48x8xbf16>, vector<32x8xbf16>, vector<48x32xf32> -> vector<48x32xf32>
    "tpu.trace_stop"() : () -> ()
    %183 = arith.addf %153, %182 : vector<48x32xf32>
    %c0_61 = arith.constant 0 : index
    %c0_62 = arith.constant 0 : index
    %c0_63 = arith.constant 0 : index
    %184 = vector.load %arg13[%c0_61, %c0_62, %c0_63] : memref<1x1x32xf32, #tpu.memory_space<vmem>>, vector<1x1x32xf32>
    %185 = vector.shape_cast %184 : vector<1x1x32xf32> to vector<1x32xf32>
    %186 = vector.broadcast %185 : vector<1x32xf32> to vector<48x32xf32>
    %187 = arith.addf %183, %186 : vector<48x32xf32>
    %188 = arith.addf %4, %187 : vector<48x32xf32>
    %c0_64 = arith.constant 0 : index
    %c0_65 = arith.constant 0 : index
    %c0_66 = arith.constant 0 : index
    %189 = vector.load %arg14[%c0_64, %c0_65, %c0_66] : memref<1x1x32xf32, #tpu.memory_space<vmem>>, vector<1x1x32xf32>
    %190 = vector.shape_cast %189 : vector<1x1x32xf32> to vector<1x32xf32>
    %c0_67 = arith.constant 0 : index
    %c0_68 = arith.constant 0 : index
    %c0_69 = arith.constant 0 : index
    %191 = vector.load %arg15[%c0_67, %c0_68, %c0_69] : memref<1x1x32xf32, #tpu.memory_space<vmem>>, vector<1x1x32xf32>
    %192 = vector.shape_cast %191 : vector<1x1x32xf32> to vector<1x32xf32>
    %cst_70 = arith.constant dense<0.000000e+00> : vector<48xf32>
    %193 = vector.multi_reduction <add>, %188, %cst_70 [1] : vector<48x32xf32> to vector<48xf32>
    %194 = vector.shape_cast %193 : vector<48xf32> to vector<48x1xf32>
    %cst_71 = arith.constant 3.200000e+01 : f32
    %195 = vector.broadcast %cst_71 : f32 to vector<48x1xf32>
    %196 = arith.divf %194, %195 : vector<48x1xf32>
    %197 = vector.broadcast %196 : vector<48x1xf32> to vector<48x32xf32>
    %198 = arith.subf %188, %197 : vector<48x32xf32>
    %199 = arith.mulf %198, %198 : vector<48x32xf32>
    %cst_72 = arith.constant dense<0.000000e+00> : vector<48xf32>
    %200 = vector.multi_reduction <add>, %199, %cst_72 [1] : vector<48x32xf32> to vector<48xf32>
    %201 = vector.shape_cast %200 : vector<48xf32> to vector<48x1xf32>
    %cst_73 = arith.constant 3.200000e+01 : f32
    %202 = vector.broadcast %cst_73 : f32 to vector<48x1xf32>
    %203 = arith.divf %201, %202 : vector<48x1xf32>
    %204 = vector.broadcast %196 : vector<48x1xf32> to vector<48x32xf32>
    %205 = arith.subf %188, %204 : vector<48x32xf32>
    %cst_74 = arith.constant 9.99999974E-6 : f32
    %206 = vector.broadcast %cst_74 : f32 to vector<48x1xf32>
    %207 = arith.addf %203, %206 : vector<48x1xf32>
    %208 = math.rsqrt %207 : vector<48x1xf32>
    %209 = vector.broadcast %208 : vector<48x1xf32> to vector<48x32xf32>
    %210 = arith.mulf %205, %209 : vector<48x32xf32>
    %211 = vector.broadcast %190 : vector<1x32xf32> to vector<48x32xf32>
    %212 = arith.mulf %210, %211 : vector<48x32xf32>
    %213 = vector.broadcast %192 : vector<1x32xf32> to vector<48x32xf32>
    %214 = arith.addf %212, %213 : vector<48x32xf32>
    %215 = arith.truncf %214 : vector<48x32xf32> to vector<48x32xbf16>
    %c0_75 = arith.constant 0 : index
    %c0_76 = arith.constant 0 : index
    %c0_77 = arith.constant 0 : index
    %216 = vector.load %arg16[%c0_75, %c0_76, %c0_77] : memref<1x128x32xbf16, #tpu.memory_space<vmem>>, vector<1x128x32xbf16>
    %217 = vector.shape_cast %216 : vector<1x128x32xbf16> to vector<128x32xbf16>
    "tpu.trace_start"() <{level = 10 : i32, message = "md,fd->mf"}> : () -> ()
    %cst_78 = arith.constant dense<0.000000e+00> : vector<48x128xf32>
    %218 = tpu.matmul %215, %217, %cst_78 {dimension_numbers = #tpu.dot_dimension_numbers<[1], [1], [0], [0], [0, 0, 1, 0], [], []>} : vector<48x32xbf16>, vector<128x32xbf16>, vector<48x128xf32> -> vector<48x128xf32>
    "tpu.trace_stop"() : () -> ()
    %c0_79 = arith.constant 0 : index
    %c0_80 = arith.constant 0 : index
    %c0_81 = arith.constant 0 : index
    %219 = vector.load %arg17[%c0_79, %c0_80, %c0_81] : memref<1x1x128xf32, #tpu.memory_space<vmem>>, vector<1x1x128xf32>
    %220 = vector.shape_cast %219 : vector<1x1x128xf32> to vector<1x128xf32>
    %221 = vector.broadcast %220 : vector<1x128xf32> to vector<48x128xf32>
    %222 = arith.addf %218, %221 : vector<48x128xf32>
    %cst_82 = arith.constant 1.702000e+00 : f32
    %223 = vector.broadcast %cst_82 : f32 to vector<48x128xf32>
    %224 = arith.mulf %223, %222 : vector<48x128xf32>
    %225 = arith.negf %224 : vector<48x128xf32>
    %226 = math.exp %225 : vector<48x128xf32>
    %cst_83 = arith.constant 1.000000e+00 : f32
    %227 = vector.broadcast %cst_83 : f32 to vector<48x128xf32>
    %228 = arith.addf %227, %226 : vector<48x128xf32>
    %229 = arith.divf %227, %228 : vector<48x128xf32>
    %230 = arith.mulf %222, %229 : vector<48x128xf32>
    %231 = arith.truncf %230 : vector<48x128xf32> to vector<48x128xbf16>
    %c0_84 = arith.constant 0 : index
    %c0_85 = arith.constant 0 : index
    %c0_86 = arith.constant 0 : index
    %232 = vector.load %arg18[%c0_84, %c0_85, %c0_86] : memref<1x32x128xbf16, #tpu.memory_space<vmem>>, vector<1x32x128xbf16>
    %233 = vector.shape_cast %232 : vector<1x32x128xbf16> to vector<32x128xbf16>
    "tpu.trace_start"() <{level = 10 : i32, message = "mf,df->md"}> : () -> ()
    %cst_87 = arith.constant dense<0.000000e+00> : vector<48x32xf32>
    %234 = tpu.matmul %231, %233, %cst_87 {dimension_numbers = #tpu.dot_dimension_numbers<[1], [1], [0], [0], [0, 0, 1, 0], [], []>} : vector<48x128xbf16>, vector<32x128xbf16>, vector<48x32xf32> -> vector<48x32xf32>
    "tpu.trace_stop"() : () -> ()
    %c0_88 = arith.constant 0 : index
    %c0_89 = arith.constant 0 : index
    %c0_90 = arith.constant 0 : index
    %235 = vector.load %arg19[%c0_88, %c0_89, %c0_90] : memref<1x1x32xf32, #tpu.memory_space<vmem>>, vector<1x1x32xf32>
    %236 = vector.shape_cast %235 : vector<1x1x32xf32> to vector<1x32xf32>
    %237 = vector.broadcast %236 : vector<1x32xf32> to vector<48x32xf32>
    %238 = arith.addf %234, %237 : vector<48x32xf32>
    %239 = arith.addf %188, %238 : vector<48x32xf32>
    %240 = vector.shape_cast %239 : vector<48x32xf32> to vector<6x8x32xf32>
    %c0_91 = arith.constant 0 : index
    %c0_92 = arith.constant 0 : index
    %c0_93 = arith.constant 0 : index
    %241 = vector.load %arg20[%c0_91, %c0_92, %c0_93] : memref<6x8x32xf32, #tpu.memory_space<vmem>>, vector<6x8x32xf32>
    tpu.vector_store %arg20[%c0_91, %c0_92, %c0_93], %240 {strides = array<i32>} : memref<6x8x32xf32, #tpu.memory_space<vmem>>, vector<6x8x32xf32>,
    return
  }
  func.func @transform_0(%arg0: i32, %arg1: i32) -> (i32, i32, i32) {
    %c0_i32 = arith.constant 0 : i32
    %c0_i32_0 = arith.constant 0 : i32
    %c0_i32_1 = arith.constant 0 : i32
    return %arg0, %c0_i32, %c0_i32_0 : i32, i32, i32
  }
  func.func @transform_1(%arg0: i32, %arg1: i32) -> (i32, i32) {
    %c0_i32 = arith.constant 0 : i32
    %c0_i32_0 = arith.constant 0 : i32
    %c0_i32_1 = arith.constant 0 : i32
    return %c0_i32, %c0_i32_0 : i32, i32
  }
  func.func @transform_2(%arg0: i32, %arg1: i32) -> (i32, i32, i32) {
    %c0_i32 = arith.constant 0 : i32
    %c0_i32_0 = arith.constant 0 : i32
    %c0_i32_1 = arith.constant 0 : i32
    return %arg1, %c0_i32, %c0_i32_0 : i32, i32, i32
  }
  func.func @transform_3(%arg0: i32, %arg1: i32) -> (i32, i32, i32) {
    %c0_i32 = arith.constant 0 : i32
    %c0_i32_0 = arith.constant 0 : i32
    %c0_i32_1 = arith.constant 0 : i32
    return %arg1, %c0_i32, %c0_i32_0 : i32, i32, i32
  }
  func.func @transform_4(%arg0: i32, %arg1: i32) -> (i32, i32, i32) {
    %c0_i32 = arith.constant 0 : i32
    %c0_i32_0 = arith.constant 0 : i32
    %c0_i32_1 = arith.constant 0 : i32
    return %arg1, %c0_i32, %c0_i32_0 : i32, i32, i32
  }
  func.func @transform_5(%arg0: i32, %arg1: i32) -> (i32, i32, i32) {
    %c0_i32 = arith.constant 0 : i32
    %c0_i32_0 = arith.constant 0 : i32
    %c0_i32_1 = arith.constant 0 : i32
    return %arg1, %c0_i32, %c0_i32_0 : i32, i32, i32
  }
  func.func @transform_6(%arg0: i32, %arg1: i32) -> (i32, i32, i32) {
    %c0_i32 = arith.constant 0 : i32
    %c0_i32_0 = arith.constant 0 : i32
    %c0_i32_1 = arith.constant 0 : i32
    return %arg1, %c0_i32, %c0_i32_0 : i32, i32, i32
  }
  func.func @transform_7(%arg0: i32, %arg1: i32) -> (i32, i32, i32) {
    %c0_i32 = arith.constant 0 : i32
    %c0_i32_0 = arith.constant 0 : i32
    %c0_i32_1 = arith.constant 0 : i32
    return %arg1, %c0_i32, %c0_i32_0 : i32, i32, i32
  }
  func.func @transform_8(%arg0: i32, %arg1: i32) -> (i32, i32, i32) {
    %c0_i32 = arith.constant 0 : i32
    %c0_i32_0 = arith.constant 0 : i32
    %c0_i32_1 = arith.constant 0 : i32
    return %arg1, %c0_i32, %c0_i32_0 : i32, i32, i32
  }
  func.func @transform_9(%arg0: i32, %arg1: i32) -> (i32, i32, i32) {
    %c0_i32 = arith.constant 0 : i32
    %c0_i32_0 = arith.constant 0 : i32
    %c0_i32_1 = arith.constant 0 : i32
    return %arg1, %c0_i32, %c0_i32_0 : i32, i32, i32
  }
  func.func @transform_10(%arg0: i32, %arg1: i32) -> (i32, i32, i32) {
    %c0_i32 = arith.constant 0 : i32
    %c0_i32_0 = arith.constant 0 : i32
    %c0_i32_1 = arith.constant 0 : i32
    return %arg1, %c0_i32, %c0_i32_0 : i32, i32, i32
  }
  func.func @transform_11(%arg0: i32, %arg1: i32) -> (i32, i32, i32) {
    %c0_i32 = arith.constant 0 : i32
    %c0_i32_0 = arith.constant 0 : i32
    %c0_i32_1 = arith.constant 0 : i32
    return %arg1, %c0_i32, %c0_i32_0 : i32, i32, i32
  }
  func.func @transform_12(%arg0: i32, %arg1: i32) -> (i32, i32, i32) {
    %c0_i32 = arith.constant 0 : i32
    %c0_i32_0 = arith.constant 0 : i32
    %c0_i32_1 = arith.constant 0 : i32
    return %arg1, %c0_i32, %c0_i32_0 : i32, i32, i32
  }
  func.func @transform_13(%arg0: i32, %arg1: i32) -> (i32, i32, i32) {
    %c0_i32 = arith.constant 0 : i32
    %c0_i32_0 = arith.constant 0 : i32
    %c0_i32_1 = arith.constant 0 : i32
    return %arg1, %c0_i32, %c0_i32_0 : i32, i32, i32
  }
  func.func @transform_14(%arg0: i32, %arg1: i32) -> (i32, i32, i32) {
    %c0_i32 = arith.constant 0 : i32
    %c0_i32_0 = arith.constant 0 : i32
    %c0_i32_1 = arith.constant 0 : i32
    return %arg1, %c0_i32, %c0_i32_0 : i32, i32, i32
  }
  func.func @transform_15(%arg0: i32, %arg1: i32) -> (i32, i32, i32) {
    %c0_i32 = arith.constant 0 : i32
    %c0_i32_0 = arith.constant 0 : i32
    %c0_i32_1 = arith.constant 0 : i32
    return %arg1, %c0_i32, %c0_i32_0 : i32, i32, i32
  }
  func.func @transform_16(%arg0: i32, %arg1: i32) -> (i32, i32, i32) {
    %c0_i32 = arith.constant 0 : i32
    %c0_i32_0 = arith.constant 0 : i32
    %c0_i32_1 = arith.constant 0 : i32
    return %arg1, %c0_i32, %c0_i32_0 : i32, i32, i32
  }
  func.func @transform_17(%arg0: i32, %arg1: i32) -> (i32, i32, i32) {
    %c0_i32 = arith.constant 0 : i32
    %c0_i32_0 = arith.constant 0 : i32
    %c0_i32_1 = arith.constant 0 : i32
    return %arg1, %c0_i32, %c0_i32_0 : i32, i32, i32
  }
  func.func @transform_18(%arg0: i32, %arg1: i32) -> (i32, i32, i32) {
    %c0_i32 = arith.constant 0 : i32
    %c0_i32_0 = arith.constant 0 : i32
    %c0_i32_1 = arith.constant 0 : i32
    return %arg0, %c0_i32, %c0_i32_0 : i32, i32, i32
  }
}

</mosaic_0001>

<bundles_post_ra>
// kernel: tpu_custom_call.1
= control target key start
LH: loop header
LB: loop body
LE: loop exit
PB: predicated region body
PF: predicated region fallthrough
CT: control target
= control target key end

     0   :  { %s8008_s0 = inlined_call_operand.vmem [shape: f32[6,8,32], index: 0, kind: input, shape index: {}]   ;;  %s8009_s1 = inlined_call_operand.hbm [shape: f32[8,32], index: 1, kind: input, shape index: {}]   ;;  %s8010_s2 = inlined_call_operand.vmem [shape: f32[2,1,32], index: 2, kind: input, shape index: {}]   ;;  %s8011_s3 = inlined_call_operand.hbm [shape: f32[2,1,32], index: 3, kind: input, shape index: {}]   ;;  %s8012_s4 = inlined_call_operand.vmem [shape: bf16[2,32,32], index: 4, kind: input, shape index: {}]   ;;  %s8013_s5 = inlined_call_operand.hbm [shape: f32[2,1,32], index: 5, kind: input, shape index: {}]   ;;  %s8014_s6 = inlined_call_operand.vmem [shape: bf16[2,32,32], index: 6, kind: input, shape index: {}]   ;;  %s8015_s7 = inlined_call_operand.vmem [shape: f32[2,1,32], index: 7, kind: input, shape index: {}]   ;;  %s8016_s8 = inlined_call_operand.vmem [shape: bf16[2,32,32], index: 8, kind: input, shape index: {}]   ;;  %s8017_s9 = inlined_call_operand.hbm [shape: f32[2,1,32], index: 9, kind: input, shape index: {}]   ;;  %s8018_s10 = inlined_call_operand.vmem [shape: bf16[2,32,32], index: 10, kind: input, shape index: {}]   ;;  %s8019_s11 = inlined_call_operand.hbm [shape: f32[2,1,32], index: 11, kind: input, shape index: {}]   ;;  %s8020_s12 = inlined_call_operand.hbm [shape: f32[2,1,32], index: 12, kind: input, shape index: {}]   ;;  %s8021_s13 = inlined_call_operand.hbm [shape: f32[2,1,32], index: 13, kind: input, shape index: {}]   ;;  %s8022_s14 = inlined_call_operand.vmem [shape: bf16[2,128,32], index: 14, kind: input, shape index: {}]   ;;  %s8023_s15 = inlined_call_operand.vmem [shape: f32[2,1,128], index: 15, kind: input, shape index: {}]   ;;  %s8024_s16 = inlined_call_operand.hbm [shape: bf16[2,32,128], index: 16, kind: input, shape index: {}]   ;;  %s8025_s17 = inlined_call_operand.vmem [shape: f32[2,1,32], index: 17, kind: input, shape index: {}]   ;;  %s8026_s18 = inlined_call_operand.hbm [shape: f32[6,8,32], index: 18, kind: output, shape index: {}]  }
   0x1   :  { %8042 = sst [smem:[#allocation27_spill]] %s8008_s0 }
   0x2   :  { %8043 = sst [smem:[#allocation28_spill]] %s8009_s1 }
   0x3   :  { %8044 = sst [smem:[#allocation29_spill]] %s8010_s2 }
   0x4   :  { %8045 = sst [smem:[#allocation30_spill]] %s8011_s3 }
   0x5   :  { %8046 = sst [smem:[#allocation31_spill]] %s8012_s4 }
   0x6   :  { %8047 = sst [smem:[#allocation32_spill]] %s8013_s5 }
   0x7   :  { %8048 = sst [smem:[#allocation33_spill]] %s8014_s6 }
   0x8   :  { %8049 = sst [smem:[#allocation34_spill]] %s8015_s7 }
   0x9   :  { %8050 = sst [smem:[#allocation35_spill]] %s8016_s8 }
   0xa   :  { %8051 = sst [smem:[#allocation36_spill]] %s8017_s9 }
   0xb   :  { %8052 = sst [smem:[#allocation37_spill]] %s8018_s10 }
   0xc   :  { %8053 = sst [smem:[#allocation38_spill]] %s8019_s11 }
   0xd   :  { %8054 = sst [smem:[#allocation39_spill]] %s8020_s12 }
   0xe   :  { %8055 = sst [smem:[#allocation40_spill]] %s8022_s14 }
   0xf   :  { %8056 = sst [smem:[#allocation41_spill]] %s8023_s15 }
  0x10   :  { %8057 = sst [smem:[#allocation42_spill]] %s8025_s17 }
  0x11   :  { %8058 = sst [smem:[#allocation43_spill]] %s8026_s18 }
  0x12   :  { %23 = vsyncpa [#allocation3], 0 }
  0x13   :  { %24 = vsyncpa [#allocation6], 0 }
  0x14   :  { %26 = vsyncpa [#allocation6 + $0x1], 0 }
  0x15   :  { %27 = vsyncpa [#allocation9], 0 }
  0x16   :  { %29 = vsyncpa [#allocation9 + $0x1], 0 }
  0x17   :  { %30 = vsyncpa [#allocation12], 0 }
  0x18   :  { %32 = vsyncpa [#allocation12 + $0x1], 0 }
  0x19   :  { %33 = vsyncpa [#allocation15], 0 }
  0x1a   :  { %35 = vsyncpa [#allocation15 + $0x1], 0 }
  0x1b   :  { %36 = vsyncpa [#allocation4], 0  ;;  %s6578_s27 = smov 0   ;;  %s6580_s28 = smov 0  }
  0x1c   :  { %s6582_s29 = smov 0   ;;  %s6584_s30 = smov 0  }
  0x1d   :  { %s6586_s0 = smov 0   ;;  %s6588_s19 = smov 0  }
  0x1e LB: > { %8059 = sst [smem:[#allocation23_spill]] %s6451_s29  ;;  %s51_s1 = sadd.s32 1, %s6459_s0  ;;  %s6463_s19 = sphi %s6588_s19, %s42_s19   ;;  %s6459_s0 = sphi %s6586_s0, %s8121_s0   ;;  %s6455_s30 = sphi %s6584_s30, %s8120_s30   ;;  %s6451_s29 = sphi %s6582_s29, %s8116_s29   ;;  %s6447_s28 = sphi %s6580_s28, %s8119_s28   ;;  %s6443_s27 = sphi %s6578_s27, %s8118_s27  }
  0x1f   : > { %8060 = sst [smem:[#allocation24_spill]] %s6463_s19  ;;  %s134_s20 = sadd.s32 1, %s6451_s29 }
  0x20   : > { %p52_p0 = scmp.ge.s32.totalorder %s51_s1, 2  ;;  %p141_p1 = scmp.ne.s32.totalorder %s6451_s29, %s6447_s28 }
  0x21   : > { %p142_p2 = scmp.eq.s32.totalorder %s6463_s19, 0  ;;  %p5896_p4 = scmp.lt.s32.totalorder %s6463_s19, 2 }
  0x22   : > { %s8123_s1 = smov (%p52_p0, %s51_s1), 0  ;;  %s6619_s22 = sand.u32 1, %s6463_s19  }
  0x23   : > { %8061 = sst [smem:[#allocation25_spill]] %s8123_s1  ;;  %p143_p3 = por %p142_p2, %p141_p1 }
  0x24   : > { %s131_s21 = ssub.s32 %s6459_s0, %s8123_s1  ;;  %s6622_s2 = sand.u32 1, %s6451_s29  }
  0x25   : > { %p132_p5 = scmp.eq.s32.totalorder %s131_s21, 0  ;;  %s6625_s23 = sshll.u32 %s6459_s0, 4 }
  0x26   : > { %s8063_s3 = sld [smem:[#allocation30_spill]]  ;;  %s590_s1 = scalar_lea.vmem [#allocation5], %s6622_s2 }
  0x27   : > { %s6628_s24 = scalar_select %p132_p5, %s6451_s29, %s134_s20  }
  0x28   : > { %s597_s17 = sshll.u32 %s590_s1, 4  ;;  %p6637_p6 = pnand %p5896_p4, %p143_p3  ;;  %s6641_s17 = int_to_ptr.vmem [resolvable:$true] %s597_s17 }
  0x29   : > { %8062 = sst [smem:[#allocation26_spill]] %s6628_s24 }
  0x2a   : > { %s8064_s21 = scalar_select %p6637_p6, 1, 0 }
  0x2b   : > { %p6648_p8 = pneg %p6637_p6 }
  0x2c   : > { %s6634_s18 = scalar_lea.hbm %s8063_s3, %s6625_s23  ;;  %s6134_s29 = scalar_lea.hbm %s8063_s3, 32 }
  0x2d   : > { %s6129_s24 = scalar_lea.hbm %s6634_s18, 16  ;;  %p6135_p11 = scmp.lt.u32.totalorder %s6634_s18, %s8063_s3 }
  0x2e   : > { %p6130_p7 = scmp.ne.s32.totalorder %s6634_s18, %s6129_s24  ;;  %p6136_p12 = scmp.lt.u32.totalorder %s6134_s29, %s6129_s24 }
  0x2f   : > { %s8065_s25 = scalar_select %p6648_p8, 1, 0 }
  0x30   : > { %p6132_p9 = pnand %p6648_p8, %p6130_p7  ;;  %p6137_p13 = por %p6136_p12, %p6135_p11 }
  0x31   : > { %p6138_p0 = scmp.lt.u32.totalorder %s6129_s24, %s6634_s18 }
  0x32   : > { %p6133_p10 = pneg %p6132_p9 }
  0x33   : > { %p6139_p1 = por %p6138_p0, %p6137_p13 }
  0x35   : > { %p6140_p2 = pnand %p6139_p1, %p6133_p10 }
  0x37   : > { %6143 = shalt.err (!%p6140_p2)
}
  0x38   : > { %s6144_s20 = scalar_lea.vmem %s6641_s17, 16  ;;  %s6465_s1 = smov [#allocation5]  }
  0x39   : > { %p6145_p3 = scmp.ne.s32.totalorder %s6641_s17, %s6144_s20  ;;  %s6149_s26 = sshll.u32 %s6465_s1, 4  ;;  %s6150_s26 = int_to_ptr.vmem [resolvable:$false] %s6149_s26 }
  0x3a   : > { %s6151_s14 = scalar_lea.vmem %s6150_s26, 32  ;;  %p6152_p7 = scmp.lt.s32.totalorder %s6641_s17, %s6150_s26 }
  0x3b   : > { %p6147_p4 = pnand %p6145_p3, %p6648_p8  ;;  %p6153_p9 = scmp.lt.s32.totalorder %s6151_s14, %s6144_s20 }
  0x3d   : > { %p6148_p5 = pneg %p6147_p4  ;;  %p6154_p11 = por %p6153_p9, %p6152_p7 }
  0x3f   : > { %p6155_p12 = pnand %p6154_p11, %p6148_p5 }
  0x41   : > { %6158 = shalt.err (!%p6155_p12)
}
  0x42   : > { %s8066_s15 = scalar_lea.sflag [#allocation6], %s6619_s22  ;;  %s8067_s9 = sld [smem:[#allocation36_spill]] }
  0x43   : > { %5876 = dma.hbm_to_vmem [thread:$0]  (!%p6637_p6), %s6634_s18, 16, %s6641_s17, %s8066_s15  }
  0x44   : > { %s654_s20 = scalar_lea.vmem [#allocation8], %s6622_s2 }
  0x45   : > { %s661_s26 = sshll.u32 %s654_s20, 4  ;;  %s662_s26 = int_to_ptr.vmem [resolvable:$true] %s661_s26 }
  0x48   : > { %s6677_s1 = scalar_lea.hbm %s8067_s9, %s6625_s23  ;;  %s6164_s18 = scalar_lea.hbm %s8067_s9, 32 }
  0x49   : > { %s6159_s3 = scalar_lea.hbm %s6677_s1, 16  ;;  %p6165_p1 = scmp.lt.u32.totalorder %s6677_s1, %s8067_s9 }
  0x4a   : > { %p6160_p10 = scmp.ne.s32.totalorder %s6677_s1, %s6159_s3  ;;  %p6166_p2 = scmp.lt.u32.totalorder %s6164_s18, %s6159_s3 }
  0x4b   : > { %p6168_p4 = scmp.lt.u32.totalorder %s6159_s3, %s6677_s1 }
  0x4c   : > { %p6162_p13 = pnand %p6160_p10, %p6648_p8  ;;  %p6167_p3 = por %p6166_p2, %p6165_p1 }
  0x4e   : > { %p6163_p0 = pneg %p6162_p13  ;;  %p6169_p5 = por %p6168_p4, %p6167_p3 }
  0x50   : > { %p6170_p7 = pnand %p6169_p5, %p6163_p0 }
  0x52   : > { %6173 = shalt.err (!%p6170_p7)
}
  0x53   : > { %s6174_s24 = scalar_lea.vmem %s662_s26, 16  ;;  %s6466_s20 = smov [#allocation8]  }
  0x54   : > { %p6175_p9 = scmp.ne.s32.totalorder %s662_s26, %s6174_s24  ;;  %s6179_s14 = sshll.u32 %s6466_s20, 4  ;;  %s6180_s14 = int_to_ptr.vmem [resolvable:$false] %s6179_s14 }
  0x55   : > { %s6181_s10 = scalar_lea.vmem %s6180_s14, 32  ;;  %p6182_p10 = scmp.lt.s32.totalorder %s662_s26, %s6180_s14 }
  0x56   : > { %p6177_p11 = pnand %p6175_p9, %p6648_p8  ;;  %p6183_p13 = scmp.lt.s32.totalorder %s6181_s10, %s6174_s24 }
  0x58   : > { %p6178_p12 = pneg %p6177_p11  ;;  %p6184_p6 = por %p6183_p13, %p6182_p10 }
  0x5a   : > { %p6185_p1 = pnand %p6184_p6, %p6178_p12 }
  0x5c   : > { %6188 = shalt.err (!%p6185_p1)
}
  0x5d   : > { %p8068_p2 = scmp.ne.s32.totalorder %s8064_s21, 0  ;;  %s8069_s3 = scalar_lea.sflag [#allocation9], %s6619_s22 }
  0x5e   : > { %s8070_s12 = sld [smem:[#allocation39_spill]]  ;;  %s696_s14 = scalar_lea.vmem [#allocation11], %s6622_s2 }
  0x5f   : > { %5882 = dma.hbm_to_vmem [thread:$0]  (!%p8068_p2), %s6677_s1, 16, %s662_s26, %s8069_s3  }
  0x60   : > { %s703_s29 = sshll.u32 %s696_s14, 4  ;;  %s704_s29 = int_to_ptr.vmem [resolvable:$true] %s703_s29 }
  0x64   : > { %s6704_s15 = scalar_lea.hbm %s8070_s12, %s6625_s23  ;;  %s6194_s26 = scalar_lea.hbm %s8070_s12, 32 }
  0x65   : > { %s6189_s20 = scalar_lea.hbm %s6704_s15, 16  ;;  %p6195_p4 = scmp.lt.u32.totalorder %s6704_s15, %s8070_s12 }
  0x66   : > { %p6190_p6 = scmp.ne.s32.totalorder %s6704_s15, %s6189_s20  ;;  %p6196_p5 = scmp.lt.u32.totalorder %s6194_s26, %s6189_s20 }
  0x67   : > { %p6198_p9 = scmp.lt.u32.totalorder %s6189_s20, %s6704_s15 }
  0x68   : > { %p6192_p0 = pnand %p6190_p6, %p6648_p8  ;;  %p6197_p7 = por %p6196_p5, %p6195_p4 }
  0x6a   : > { %p6193_p3 = pneg %p6192_p0  ;;  %p6199_p11 = por %p6198_p9, %p6197_p7 }
  0x6c   : > { %p6200_p12 = pnand %p6199_p11, %p6193_p3 }
  0x6e   : > { %6203 = shalt.err (!%p6200_p12)
}
  0x6f   : > { %s6204_s18 = scalar_lea.vmem %s704_s29, 16  ;;  %s6467_s14 = smov [#allocation11]  }
  0x70   : > { %p6205_p10 = scmp.ne.s32.totalorder %s704_s29, %s6204_s18  ;;  %s6209_s24 = sshll.u32 %s6467_s14, 4  ;;  %s6210_s24 = int_to_ptr.vmem [resolvable:$false] %s6209_s24 }
  0x71   : > { %s6211_s10 = scalar_lea.vmem %s6210_s24, 32  ;;  %p6212_p6 = scmp.lt.s32.totalorder %s704_s29, %s6210_s24 }
  0x72   : > { %p6207_p13 = pnand %p6205_p10, %p6648_p8  ;;  %p6213_p0 = scmp.lt.s32.totalorder %s6211_s10, %s6204_s18 }
  0x74   : > { %p6208_p1 = pneg %p6207_p13  ;;  %p6214_p2 = por %p6213_p0, %p6212_p6 }
  0x76   : > { %p6215_p4 = pnand %p6214_p2, %p6208_p1 }
  0x78   : > { %6218 = shalt.err (!%p6215_p4)
}
  0x79   : > { %p8071_p5 = scmp.ne.s32.totalorder %s8064_s21, 0  ;;  %s8072_s20 = scalar_lea.sflag [#allocation12], %s6619_s22 }
  0x7a   : > { %s6728_s1 = sadd.s32 4294967295, %s6463_s19   ;;  %p147_p2 = scmp.ne.s32.totalorder %s6447_s28, %s6443_s27 }
  0x7b   : > { %5888 = dma.hbm_to_vmem [thread:$0]  (!%p8071_p5), %s6704_s15, 16, %s704_s29, %s8072_s20  }
  0x7c   : > { %p8034_p3 = scmp.eq.s32.totalorder %s6728_s1, 0  ;;  %p5109_p7 = scmp.ge.s32.totalorder %s6463_s19, 1 }
  0x7d   : > { %p548_p9 = scmp.lt.s32.totalorder %s6463_s19, 3  ;;  %s6468_s15 = smov [#allocation2]  }
  0x7e   : > { %p6737_p11 = por %p8034_p3, %p147_p2  ;;  %s570_s29 = sshll.u32 %s6468_s15, 4  ;;  %s6745_s29 = int_to_ptr.vmem [resolvable:$true] %s570_s29 }
  0x7f   : > { %p6741_p12 = pnand %p5109_p7, %p548_p9  ;;  %s8075_s5 = sld [smem:[#allocation32_spill]] }
  0x80   : > { %s8073_s24 = scalar_select %p6737_p11, 1, 0 }
  0x81   : > { %s8074_s26 = scalar_select %p6741_p12, 1, 0 }
  0x82   : > { %p5869_p10 = pneg %p6741_p12  ;;  %s615_s18 = scalar_lea.vmem [#allocation7], %s6622_s2 }
  0x83   : > { %s622_s14 = sshll.u32 %s615_s18, 4  ;;  %s623_s14 = int_to_ptr.vmem [resolvable:$true] %s622_s14 }
  0x84   : > { %p6758_p13 = pnand %p5869_p10, %p8034_p3 }
  0x85   : > { %s6753_s17 = scalar_lea.hbm %s8075_s5, %s6625_s23  ;;  %s6224_s3 = scalar_lea.hbm %s8075_s5, 32 }
  0x86   : > { %s8076_s10 = scalar_select %p6758_p13, 1, 0 }
  0x87   : > { %s6219_s20 = scalar_lea.hbm %s6753_s17, 16  ;;  %p6225_p4 = scmp.lt.u32.totalorder %s6753_s17, %s8075_s5 }
  0x88   : > { %p6220_p1 = scmp.ne.s32.totalorder %s6753_s17, %s6219_s20  ;;  %p6226_p2 = scmp.lt.u32.totalorder %s6224_s3, %s6219_s20 }
  0x89   : > { %p6228_p9 = scmp.lt.u32.totalorder %s6219_s20, %s6753_s17 }
  0x8a   : > { %p6222_p6 = pnand %p6220_p1, %p6648_p8  ;;  %p6227_p7 = por %p6226_p2, %p6225_p4 }
  0x8c   : > { %p6223_p0 = pneg %p6222_p6  ;;  %p6229_p10 = por %p6228_p9, %p6227_p7 }
  0x8e   : > { %p6230_p3 = pnand %p6229_p10, %p6223_p0 }
  0x90   : > { %6233 = shalt.err (!%p6230_p3)
}
  0x91   : > { %s6234_s18 = scalar_lea.vmem %s623_s14, 16  ;;  %s6469_s19 = smov [#allocation7]  }
  0x92   : > { %p6235_p11 = scmp.ne.s32.totalorder %s623_s14, %s6234_s18  ;;  %s6239_s8 = sshll.u32 %s6469_s19, 4  ;;  %s6240_s8 = int_to_ptr.vmem [resolvable:$false] %s6239_s8 }
  0x93   : > { %s6241_s15 = scalar_lea.vmem %s6240_s8, 32  ;;  %p6242_p12 = scmp.lt.s32.totalorder %s623_s14, %s6240_s8 }
  0x94   : > { %p6237_p1 = pnand %p6235_p11, %p6648_p8  ;;  %p6243_p13 = scmp.lt.s32.totalorder %s6241_s15, %s6234_s18 }
  0x96   : > { %p6238_p6 = pneg %p6237_p1  ;;  %p6244_p5 = por %p6243_p13, %p6242_p12 }
  0x98   : > { %p6245_p2 = pnand %p6244_p5, %p6238_p6 }
  0x9a   : > { %6248 = shalt.err (!%p6245_p2)
}
  0x9b   : > { %p8077_p4 = scmp.ne.s32.totalorder %s8064_s21, 0  ;;  %s8078_s9 = scalar_lea.sflag [#allocation6], %s6619_s22 }
  0x9c   : > { %s8079_s11 = sld [smem:[#allocation38_spill]]  ;;  %s8080_s8 = sld [smem:[#allocation28_spill]] }
  0x9d   : > { %5879 = dma.hbm_to_vmem [thread:$0]  (!%p8077_p4), %s6753_s17, 16, %s623_s14, %s8078_s9  }
  0x9e   : > { %p8081_p3 = scmp.ne.s32.totalorder %s8076_s10, 0 }
  0xa0   : > { %p6251_p11 = pneg %p8081_p3 }
  0xa2   : > { %s6785_s27 = scalar_lea.hbm %s8079_s11, %s6625_s23  ;;  %s6249_s18 = scalar_lea.hbm %s8080_s8, 128 }
  0xa3   : > { %p6250_p5 = scmp.ne.s32.totalorder %s8080_s8, %s6249_s18  ;;  %p6256_p0 = scmp.lt.u32.totalorder %s6249_s18, %s8080_s8 }
  0xa5   : > { %p6252_p12 = pnand %p6251_p11, %p6250_p5 }
  0xa7   : > { %p6253_p13 = pneg %p6252_p12 }
  0xa9   : > { %p6258_p7 = pnand %p6256_p0, %p6253_p13 }
  0xab   : > { %6261 = shalt.err (!%p6258_p7)
}
  0xac   : > { %s6262_s17 = scalar_lea.vmem %s6745_s29, 128  ;;  %p6270_p6 = scmp.lt.s32.totalorder %s6745_s29, %s6745_s29 }
  0xad   : > { %p6263_p9 = scmp.ne.s32.totalorder %s6745_s29, %s6262_s17  ;;  %p6271_p2 = scmp.lt.s32.totalorder %s6262_s17, %s6262_s17 }
  0xaf   : > { %p6265_p10 = pnand %p6263_p9, %p6251_p11  ;;  %p6272_p4 = por %p6271_p2, %p6270_p6 }
  0xb1   : > { %p6266_p1 = pneg %p6265_p10 }
  0xb3   : > { %p6273_p8 = pnand %p6272_p4, %p6266_p1 }
  0xb5   : > { %6276 = shalt.err (!%p6273_p8)
}
  0xb6   : > { %5872 = dma.hbm_to_vmem [thread:$0]  (!%p8081_p3), %s8080_s8, 128, %s6745_s29, [#allocation3]  }
  0xb7   : > { %s679_s7 = scalar_lea.vmem [#allocation10], %s6622_s2  ;;  %s6813_s20 = scalar_lea.hbm %s8021_s13, %s6625_s23 }
  0xb8   : > { %s686_s14 = sshll.u32 %s679_s7, 4  ;;  %s6277_s10 = scalar_lea.hbm %s6785_s27, 16  ;;  %s687_s14 = int_to_ptr.vmem [resolvable:$true] %s686_s14 }
  0xb9   : > { %p6278_p8 = scmp.ne.s32.totalorder %s6785_s27, %s6277_s10  ;;  %p8082_p4 = scmp.ne.s32.totalorder %s8065_s25, 0 }
  0xba   : > { %s6282_s18 = scalar_lea.hbm %s8079_s11, 32  ;;  %p6283_p3 = scmp.lt.u32.totalorder %s6785_s27, %s8079_s11 }
  0xbb   : > { %p6280_p5 = pnand %p6278_p8, %p8082_p4  ;;  %p6284_p12 = scmp.lt.u32.totalorder %s6282_s18, %s6277_s10 }
  0xbc   : > { %p6286_p0 = scmp.lt.u32.totalorder %s6277_s10, %s6785_s27 }
  0xbd   : > { %p6281_p11 = pneg %p6280_p5  ;;  %p6285_p13 = por %p6284_p12, %p6283_p3 }
  0xbf   : > { %p6287_p7 = por %p6286_p0, %p6285_p13 }
  0xc1   : > { %p6288_p9 = pnand %p6287_p7, %p6281_p11 }
  0xc3   : > { %6291 = shalt.err (!%p6288_p9)
}
  0xc4   : > { %s6292_s23 = scalar_lea.vmem %s687_s14, 16  ;;  %s6470_s29 = smov [#allocation10]  }
  0xc5   : > { %p6293_p10 = scmp.ne.s32.totalorder %s687_s14, %s6292_s23  ;;  %s6297_s5 = sshll.u32 %s6470_s29, 4  ;;  %s6298_s5 = int_to_ptr.vmem [resolvable:$false] %s6297_s5 }
  0xc6   : > { %s6299_s6 = scalar_lea.vmem %s6298_s5, 32  ;;  %p6300_p2 = scmp.lt.s32.totalorder %s687_s14, %s6298_s5 }
  0xc7   : > { %p6295_p1 = pnand %p6293_p10, %p8082_p4  ;;  %p6301_p8 = scmp.lt.s32.totalorder %s6299_s6, %s6292_s23 }
  0xc9   : > { %p6296_p6 = pneg %p6295_p1  ;;  %p6302_p5 = por %p6301_p8, %p6300_p2 }
  0xcb   : > { %p6303_p3 = pnand %p6302_p5, %p6296_p6 }
  0xcd   : > { %6306 = shalt.err (!%p6303_p3)
}
  0xce   : > { %p8083_p12 = scmp.ne.s32.totalorder %s8064_s21, 0  ;;  %s8084_s7 = scalar_lea.sflag [#allocation9], %s6619_s22 }
  0xcf   : > { %s713_s9 = scalar_lea.vmem [#allocation13], %s6622_s2  ;;  %s5119_s10 = sshll.u32 %s6622_s2, 4 }
  0xd0   : > { %5885 = dma.hbm_to_vmem [thread:$0]  (!%p8083_p12), %s6785_s27, 16, %s687_s14, %s8084_s7  }
  0xd1   : > { %s720_s12 = sshll.u32 %s713_s9, 4  ;;  %s6307_s19 = scalar_lea.hbm %s6813_s20, 16  ;;  %s721_s12 = int_to_ptr.vmem [resolvable:$true] %s720_s12 }
  0xd2   : > { %p6308_p11 = scmp.ne.s32.totalorder %s6813_s20, %s6307_s19  ;;  %s6312_s15 = scalar_lea.hbm %s8021_s13, 32 }
  0xd3   : > { %p6313_p7 = scmp.lt.u32.totalorder %s6813_s20, %s8021_s13  ;;  %p6314_p9 = scmp.lt.u32.totalorder %s6312_s15, %s6307_s19 }
  0xd4   : > { %p6310_p13 = pnand %p6308_p11, %p8082_p4  ;;  %p6316_p1 = scmp.lt.u32.totalorder %s6307_s19, %s6813_s20 }
  0xd5   : > { %p6315_p10 = por %p6314_p9, %p6313_p7 }
  0xd6   : > { %p6311_p0 = pneg %p6310_p13 }
  0xd7   : > { %p6317_p6 = por %p6316_p1, %p6315_p10 }
  0xd9   : > { %p6318_p2 = pnand %p6317_p6, %p6311_p0 }
  0xdb   : > { %6321 = shalt.err (!%p6318_p2)
}
  0xdc   : > { %s6322_s27 = scalar_lea.vmem %s721_s12, 16  ;;  %s6471_s14 = smov [#allocation13]  }
  0xdd   : > { %p6323_p8 = scmp.ne.s32.totalorder %s721_s12, %s6322_s27  ;;  %s6327_s29 = sshll.u32 %s6471_s14, 4  ;;  %s6328_s29 = int_to_ptr.vmem [resolvable:$false] %s6327_s29 }
  0xde   : > { %s6329_s5 = scalar_lea.vmem %s6328_s29, 32  ;;  %p6330_p11 = scmp.lt.s32.totalorder %s721_s12, %s6328_s29 }
  0xdf   : > { %p6325_p5 = pnand %p6323_p8, %p8082_p4  ;;  %p6331_p13 = scmp.lt.s32.totalorder %s6329_s5, %s6322_s27 }
  0xe1   : > { %p6326_p3 = pneg %p6325_p5  ;;  %p6332_p12 = por %p6331_p13, %p6330_p11 }
  0xe3   : > { %p6333_p7 = pnand %p6332_p12, %p6326_p3 }
  0xe5   : > { %6336 = shalt.err (!%p6333_p7)
}
  0xe6   : > { %p8085_p9 = scmp.ne.s32.totalorder %s8064_s21, 0  ;;  %s8086_s6 = scalar_lea.sflag [#allocation12], %s6619_s22 }
  0xe7   : > { %s5246_s7 = sshll.u32 %s6459_s0, 8  ;;  %s745_s18 = scalar_lea.vmem [#allocation14], %s5119_s10 }
  0xe8   : > { %5891 = dma.hbm_to_vmem [thread:$0]  (!%p8085_p9), %s6813_s20, 16, %s721_s12, %s8086_s6  }
  0xe9   : > { %s6859_s3 = scalar_lea.hbm %s8024_s16, %s5246_s7  ;;  %s752_s15 = sshll.u32 %s745_s18, 4  ;;  %s6863_s15 = int_to_ptr.vmem [resolvable:$true] %s752_s15 }
  0xea   : > { %s742_s22 = scalar_lea.sflag [#allocation15], %s6622_s2  ;;  %s6337_s17 = scalar_lea.hbm %s6859_s3, 256 }
  0xeb   : > { %p6338_p12 = scmp.ne.s32.totalorder %s6859_s3, %s6337_s17  ;;  %s6342_s23 = scalar_lea.hbm %s8024_s16, 512 }
  0xec   : > { %p6343_p1 = scmp.lt.u32.totalorder %s6859_s3, %s8024_s16  ;;  %p6344_p6 = scmp.lt.u32.totalorder %s6342_s23, %s6337_s17 }
  0xed   : > { %p6340_p0 = pnand %p6338_p12, %p8082_p4  ;;  %p6346_p8 = scmp.lt.u32.totalorder %s6337_s17, %s6859_s3 }
  0xee   : > { %p6345_p2 = por %p6344_p6, %p6343_p1 }
  0xef   : > { %p6341_p10 = pneg %p6340_p0 }
  0xf0   : > { %p6347_p5 = por %p6346_p8, %p6345_p2 }
  0xf2   : > { %p6348_p3 = pnand %p6347_p5, %p6341_p10 }
  0xf4   : > { %6351 = shalt.err (!%p6348_p3)
}
  0xf5   : > { %s6352_s10 = scalar_lea.vmem %s6863_s15, 256  ;;  %s6472_s29 = smov [#allocation14]  }
  0xf6   : > { %p6353_p11 = scmp.ne.s32.totalorder %s6863_s15, %s6352_s10  ;;  %s6357_s5 = sshll.u32 %s6472_s29, 4  ;;  %s6358_s5 = int_to_ptr.vmem [resolvable:$false] %s6357_s5 }
  0xf7   : > { %s6359_s6 = scalar_lea.vmem %s6358_s5, 512  ;;  %p6360_p12 = scmp.lt.s32.totalorder %s6863_s15, %s6358_s5 }
  0xf8   : > { %p6355_p13 = pnand %p6353_p11, %p8082_p4  ;;  %p6361_p0 = scmp.lt.s32.totalorder %s6359_s6, %s6352_s10 }
  0xfa   : > { %p6356_p7 = pneg %p6355_p13  ;;  %p6362_p1 = por %p6361_p0, %p6360_p12 }
  0xfc   : > { %p6363_p6 = pnand %p6362_p1, %p6356_p7 }
  0xfe   : > { %6366 = shalt.err (!%p6363_p6)
}
  0xff   : > { %s6473_s7 = smov 64   ;;  %s6474_s9 = smov 4  }
 0x100   : > { %5894 = dma.hbm_to_vmem [thread:$0]  (!%p8085_p9), %s6859_s3, 256, %s6863_s15, %s742_s22, %s6473_s7, %s6473_s7, %s6474_s9  }
 0x101   : > { %p8087_p4 = scmp.ne.s32.totalorder %s8074_s26, 0 }
 0x102   : > { %p8088_p10 = scmp.eq.s32.totalorder (!%p8087_p4), %s6728_s1, 0 }
 0x103   : > { %770 = sbr.rel (%p8087_p4) target bundleno = 4804 (0x12c4), region = 92 }
 0x10a   : > { %6418 = dma.done.wait (%p8088_p10), [#allocation3], 128   ;;  %p8089_p2 = pmov %p8088_p10 }
 0x10b   : > { %s776_s25 = sand.u32 1, %s6728_s1   ;;  %s6897_s19 = sand.u32 1, %s6447_s28  }
 0x10c   : > { %6420 = vsyncadd (%p8089_p2), [#allocation3], 4294967168  ;;  %s777_s18 = scalar_lea.sflag [#allocation6], %s776_s25  ;;  %p8090_p8 = scmp.ne.s32.totalorder %s8073_s24, 0 }
 0x10e   : > { %6422 = dma.done.wait (%p8090_p8), %s777_s18, 32  }
 0x10f   : > { %6424 = vsyncadd (%p8090_p8), %s777_s18, 4294967264  ;;  %s793_s26 = scalar_lea.sflag [#allocation9], %s776_s25 }
 0x110   : > { %6426 = dma.done.wait (%p8090_p8), %s793_s26, 32  }
 0x111   : > { %6428 = vsyncadd (%p8090_p8), %s793_s26, 4294967264  ;;  %s809_s22 = scalar_lea.sflag [#allocation12], %s776_s25 }
 0x112   : > { %6430 = dma.done.wait (%p8090_p8), %s809_s22, 32  }
 0x113   : > { %6432 = vsyncadd (%p8090_p8), %s809_s22, 4294967264  ;;  %s5124_s20 = sshll.u32 %s6897_s19, 4  ;;  %s825_s23 = scalar_lea.sflag [#allocation15], %s6897_s19 }
 0x114   : > { %s6919_s27 = scalar_lea.vmem [#allocation14], %s5124_s20 }
 0x115   : > { %6434 = dma.done.wait (%p8090_p8), %s825_s23, 256  }
 0x116   : > { %6436 = vsyncadd (%p8090_p8), %s825_s23, 4294967040  ;;  %p948_p9 = scmp.lt.s32.totalorder %s6455_s30, 1  ;;  %s8092_s4 = sld [smem:[#allocation31_spill]] }
 0x117   : > { %s8093_s22 = sld [smem:[#allocation33_spill]]  ;;  %s8095_s3 = sld [smem:[#allocation35_spill]] }
 0x118   : > { %s6927_s14 = scalar_select %p948_p9, %s6455_s30, 1 }
 0x119   : > { %s8096_s6 = sld [smem:[#allocation37_spill]]  ;;  %s8097_s18 = sld [smem:[#allocation40_spill]] }
 0x11a   : > { %s5247_s7 = sshll.u32 %s6927_s14, 4  ;;  %s5251_s25 = sshll.u32 %s6927_s14, 6 }
 0x11b   : > { %s8098_s12 = sld [smem:[#allocation41_spill]]  ;;  %s8099_s15 = sld [smem:[#allocation42_spill]] }
 0x11c   : > { %s6937_s24 = scalar_lea.vmem %s8092_s4, %s5247_s7  ;;  %p5135_p5 = scmp.ne.s32.totalorder %s6455_s30, 0 }
 0x11d   : > { %s6942_s20 = scalar_lea.vmem %s8093_s22, %s5247_s7  ;;  %s6951_s2 = scalar_lea.vmem %s8095_s3, %s5247_s7  ;;  %v997_v1 = vld [vmem:[#allocation2] sm:$0xff] (!%p5135_p5)  ;;  %vm1004_vm0 = vcmask (!%p5135_p5), 261120  }
 0x11e   : > { %990 = sbr.rel (%p5135_p5) target bundleno = 300 (0x12c), region = 128 }
 0x11f   : > { %s6956_s9 = scalar_lea.vmem %s8096_s6, %s5247_s7  ;;  %s6962_s26 = scalar_lea.vmem %s8097_s18, %s5251_s25 }
 0x120   : > { %s8100_s6 = sld [smem:[#allocation27_spill]] (!%p5135_p5) }
 0x121   : > { %s981_s23 = scalar_lea.vmem %s8098_s12, %s6927_s14  ;;  %s984_s3 = scalar_lea.vmem %s8099_s15, %s6927_s14 }
 0x126   : > { %v991_v0 = vld [vmem:[%s8100_s6] sm:$0xff]  ;;  %v992_v2 = vld [vmem:[%s8100_s6 + $0x8] sm:$0xff]  ;;  %v993_v5 = vld [vmem:[%s8100_s6 + $0x10] sm:$0xff] }
 0x127   : > { %v998_v3 = vadd.f32 %v997_v1, %v991_v0  ;;  %v999_v4 = vadd.f32 %v997_v1, %v992_v2  ;;  %v994_v6 = vld [vmem:[%s8100_s6 + $0x18] sm:$0xff]  ;;  %v995_v7 = vld [vmem:[%s8100_s6 + $0x20] sm:$0xff]  ;;  %v1000_v8 = vadd.f32 %v997_v1, %v993_v5  ;;  %v996_v11 = vld [vmem:[%s8100_s6 + $0x28] sm:$0xff] }
 0x128   : > { %v1001_v9 = vadd.f32 %v997_v1, %v994_v6  ;;  %v1002_v10 = vadd.f32 %v997_v1, %v995_v7  ;;  %v1003_v12 = vadd.f32 %v997_v1, %v996_v11 }
 0x129   : > { %1005 = vst.msk [vmem:[#allocation16] sm:$0xff] %vm1004_vm0, %v998_v3  ;;  %1006 = vst.msk [vmem:[#allocation16 + $0x8] sm:$0xff] %vm1004_vm0, %v999_v4 }
 0x12a   : > { %1007 = vst.msk [vmem:[#allocation16 + $0x10] sm:$0xff] %vm1004_vm0, %v1000_v8  ;;  %1008 = vst.msk [vmem:[#allocation16 + $0x18] sm:$0xff] %vm1004_vm0, %v1001_v9 }
 0x12b   : > { %1009 = vst.msk [vmem:[#allocation16 + $0x20] sm:$0xff] %vm1004_vm0, %v1002_v10  ;;  %1010 = vst.msk [vmem:[#allocation16 + $0x28] sm:$0xff] %vm1004_vm0, %v1003_v12 }
 0x12c PF: > { %vm1019_vm1 = vcmask 261120   ;;  %v5959_v55 = vld [vmem:[%s6937_s24] sm:$0xff]   ;;  %v6475_v57 = vmov 0.0   ;;  %v5961_v60 = vld [vmem:[%s6937_s24 + $0x8] sm:$0xff]   ;;  %vm6476_vm2 = vmmov 0   ;;  %s8101_s12 = sld [smem:[#allocation29_spill]] }
 0x12d   : > { %v5960_v56 = vld [vmem:[%s6942_s20] sm:$0xff]   ;;  %5399 = vmatprep.subr.bf16.mxu0 %v6475_v57  ;;  %5415 = vmatprep.subr.bf16.mxu1 %v6475_v57  ;;  %v1157_v58 = vsel %vm1019_vm1, %v5959_v55, 0  ;;  %v5962_v61 = vld [vmem:[%s6942_s20 + $0x8] sm:$0xff]   ;;  %v1160_v62 = vsel %vm1019_vm1, %v5961_v60, 0  ;;  %s8103_s15 = scalar_lea.vmem [#allocation5], %s6897_s19  ;;  %s8104_s17 = sld [smem:[#allocation34_spill]] }
 0x12e   : > { %v1247_v59 = vsel %vm1019_vm1, %v5960_v56, 0  ;;  %5400 = vmatpush3.bf16.xpose.msra.mxu0 %v1157_v58  ;;  %5403 = vmatprep.mubr.msk.bf16.mxu0 %vm6476_vm2, %v6475_v57  ;;  %v1250_v63 = vsel %vm1019_vm1, %v5962_v61, 0  ;;  %s8106_s8 = scalar_lea.vmem [#allocation7], %s6897_s19  ;;  %vm1421_vm3 = vcmask 64512   ;;  %s8107_s11 = scalar_lea.vmem [#allocation8], %s6897_s19  ;;  %vm1773_vm4 = vcmask 1043456  }
 0x12f   : > { %5416 = vmatpush3.bf16.xpose.msra.mxu1 %v1247_v59  ;;  %5401 = vmatprep.subr.bf16.mxu0 %v6475_v57  ;;  %s6477_s7 = smov 120   ;;  %s6478_s29 = smov 112  }
 0x130   : > { %v1011_v13 = vld [vmem:[#allocation16] sm:$0xff]  ;;  %v1012_v15 = vld [vmem:[#allocation16 + $0x8] sm:$0xff]  ;;  %5417 = vmatprep.subr.bf16.mxu1 %v6475_v57  ;;  %5419 = vmatprep.mubr.msk.bf16.mxu1 %vm6476_vm2, %v6475_v57  ;;  %s6479_s5 = smov 104   ;;  %s8110_s30 = scalar_lea.vmem [#allocation13], %s6897_s19 }
 0x131   : > { %v1013_v14 = vld [vmem:[#allocation16 + $0x10] sm:$0xff]  ;;  %v1020_v16 = vsel %vm1019_vm1, %v1011_v13, 0.0  ;;  %v1014_v18 = vld [vmem:[#allocation16 + $0x18] sm:$0xff]  ;;  %v1023_v21 = vsel %vm1019_vm1, %v1012_v15, 0.0  ;;  %p5898_p3 = scmp.eq.s32.totalorder %s6728_s1, 1 }
 0x132   : > { %v1026_v17 = vsel %vm1019_vm1, %v1013_v14, 0.0  ;;  %v1015_v19 = vld [vmem:[#allocation16 + $0x20] sm:$0xff]  ;;  %v1016_v20 = vld [vmem:[#allocation16 + $0x28] sm:$0xff]  ;;  %1021 = vadd.xlane.f32.xlu0 %v1020_v16  ;;  %v1029_v22 = vsel %vm1019_vm1, %v1014_v18, 0.0  ;;  %s8102_s10 = scalar_lea.vmem %s8101_s12, %s6927_s14 }
 0x133   : > { %1027 = vadd.xlane.f32.xlu1 %v1026_v17  ;;  %v1032_v23 = vsel %vm1019_vm1, %v1015_v19, 0.0  ;;  %v1035_v24 = vsel %vm1019_vm1, %v1016_v20, 0.0  ;;  %s8105_s4 = scalar_lea.vmem %s8104_s17, %s6927_s14  ;;  %s6480_s14 = smov [#allocation16]  }
 0x136   : > { %1024 = vadd.xlane.f32.xlu0 %v1023_v21  ;;  %5402 = vmatpush3.bf16.xpose.msra.mxu0 %v1160_v62 }
 0x137   : > { %1030 = vadd.xlane.f32.xlu1 %v1029_v22  ;;  %5418 = vmatpush3.bf16.xpose.msra.mxu1 %v1250_v63 }
 0x138   : > { %5431 = vmatprep.subr.bf16.mxu0 %v6475_v57  ;;  %5843 = vmatprep.subr.bf16.mxu1 %v6475_v57 }
 0x13a   : > { %1033 = vadd.xlane.f32.xlu0 %v1032_v23 }
 0x13b   : > { %1036 = vadd.xlane.f32.xlu1 %v1035_v24 }
 0x1bf   : > { %v1022_v25 = vpop.xlane.xlu0 %1021 }
 0x1c0   : > { %v1028_v26 = vpop.xlane.xlu1 %1027  ;;  %v1039_v27 = vmul.f32 0.03125, %v1022_v25  ;;  %v5137_v25 = vld [vmem:[%s8103_s15] ss:$0 sm:$0xff] }
 0x1c1   : > { %v1041_v28 = vmul.f32 0.03125, %v1028_v26 }
 0x1c2   : > { %v7003_v29 = vsub.f32 %v1011_v13, %v1039_v27 }
 0x1c3   : > { %v7005_v30 = vsub.f32 %v1013_v14, %v1041_v28  ;;  %v1025_v31 = vpop.xlane.xlu0 %1024  ;;  %v5963_v28 = vld [vmem:[%s6951_s2] sm:$0xff]  }
 0x1c4   : > { %v1031_v32 = vpop.xlane.xlu1 %1030  ;;  %v1040_v33 = vmul.f32 0.03125, %v1025_v31  ;;  %v1051_v35 = vmul.f32 %v7003_v29, %v7003_v29 }
 0x1c5   : > { %v1042_v34 = vmul.f32 0.03125, %v1031_v32  ;;  %v1053_v36 = vmul.f32 %v7005_v30, %v7005_v30 }
 0x1c6   : > { %v7011_v37 = vsub.f32 %v1012_v15, %v1040_v33  ;;  %v1057_v39 = vsel %vm1019_vm1, %v1051_v35, 0.0 }
 0x1c7   : > { %v7013_v38 = vsub.f32 %v1014_v18, %v1042_v34  ;;  %1058 = vadd.xlane.f32.xlu0 %v1057_v39  ;;  %v1034_v40 = vpop.xlane.xlu0 %1033  ;;  %v1063_v42 = vsel %vm1019_vm1, %v1053_v36, 0.0  ;;  %v1331_v39 = vsel %vm1019_vm1, %v5963_v28, 0 }
 0x1c8   : > { %v1037_v41 = vpop.xlane.xlu1 %1036  ;;  %v1043_v43 = vmul.f32 0.03125, %v1034_v40  ;;  %v1052_v45 = vmul.f32 %v7011_v37, %v7011_v37 }
 0x1c9   : > { %v1044_v44 = vmul.f32 0.03125, %v1037_v41  ;;  %v1054_v46 = vmul.f32 %v7013_v38, %v7013_v38  ;;  %v5964_v41 = vld [vmem:[%s6951_s2 + $0x8] sm:$0xff]  }
 0x1ca   : > { %v7021_v47 = vsub.f32 %v1015_v19, %v1043_v43  ;;  %v1060_v49 = vsel %vm1019_vm1, %v1052_v45, 0.0 }
 0x1cb   : > { %v7023_v48 = vsub.f32 %v1016_v20, %v1044_v44  ;;  %1064 = vadd.xlane.f32.xlu0 %v1063_v42  ;;  %1061 = vadd.xlane.f32.xlu1 %v1060_v49  ;;  %v1066_v50 = vsel %vm1019_vm1, %v1054_v46, 0.0  ;;  %v5136_v20 = vld [vmem:[%s8102_s10] ss:$0 sm:$0xff]  ;;  %v1334_v46 = vsel %vm1019_vm1, %v5964_v41, 0 }
 0x1cc   : > { %v1055_v51 = vmul.f32 %v7021_v47, %v7021_v47 }
 0x1cd   : > { %v1056_v52 = vmul.f32 %v7023_v48, %v7023_v48 }
 0x1ce   : > { %v1069_v53 = vsel %vm1019_vm1, %v1055_v51, 0.0  ;;  %v5144_v51 = vld [vmem:[%s8105_s4] ss:$0 sm:$0xff] }
 0x1cf   : > { %1067 = vadd.xlane.f32.xlu1 %v1066_v50  ;;  %1070 = vadd.xlane.f32.xlu0 %v1069_v53  ;;  %v1072_v54 = vsel %vm1019_vm1, %v1056_v52, 0.0  ;;  %v7106_v52 = vld [vmem:[%s8106_s8] ss:$0 sm:$0xff] }
 0x1d3   : > { %1073 = vadd.xlane.f32.xlu1 %v1072_v54 }
 0x254   : > { %v1059_v0 = vpop.xlane.xlu0 %1058 }
 0x255   : > { %v1075_v1 = vmul.f32 0.03125, %v1059_v0 }
 0x257   : > { %v1081_v2 = vadd.f32 1e-05, %v1075_v1 }
 0x258   : > { %v1062_v3 = vpop.xlane.xlu1 %1061  ;;  %v1065_v4 = vpop.xlane.xlu0 %1064 }
 0x259   : > { %5977 = vrsqrt.f32 %v1081_v2  ;;  %v1076_v5 = vmul.f32 0.03125, %v1062_v3  ;;  %v1077_v6 = vmul.f32 0.03125, %v1065_v4 }
 0x25b   : > { %v1082_v7 = vadd.f32 1e-05, %v1076_v5  ;;  %v1083_v8 = vadd.f32 1e-05, %v1077_v6 }
 0x25c   : > { %v1068_v9 = vpop.xlane.xlu1 %1067  ;;  %v1071_v10 = vpop.xlane.xlu0 %1070 }
 0x25d   : > { %5979 = vrsqrt.f32 %v1082_v7  ;;  %v1078_v11 = vmul.f32 0.03125, %v1068_v9  ;;  %v1079_v13 = vmul.f32 0.03125, %v1071_v10 }
 0x25e   : > { %5981 = vrsqrt.f32 %v1083_v8 }
 0x25f   : > { %v1084_v12 = vadd.f32 1e-05, %v1078_v11  ;;  %v1085_v17 = vadd.f32 1e-05, %v1079_v13 }
 0x260   : > { %v1074_v14 = vpop.xlane.xlu1 %1073 }
 0x261   : > { %5983 = vrsqrt.f32 %v1084_v12  ;;  %v1080_v15 = vmul.f32 0.03125, %v1074_v14 }
 0x263   : > { %v5978_v16 = vpop.eup %5977  ;;  %v1086_v18 = vadd.f32 1e-05, %v1080_v15 }
 0x264   : > { %v1093_v19 = vmul.f32 %v5978_v16, %v7003_v29 }
 0x265   : > { %5985 = vrsqrt.f32 %v1086_v18 }
 0x266   : > { %5987 = vrsqrt.f32 %v1085_v17  ;;  %v1105_v23 = vmul.f32 %v5136_v20, %v1093_v19 }
 0x267   : > { %v5980_v21 = vpop.eup %5979 }
 0x268   : > { %v1094_v22 = vmul.f32 %v5980_v21, %v7011_v37  ;;  %v5982_v24 = vpop.eup %5981  ;;  %v1117_v31 = vadd.f32 %v5137_v25, %v1105_v23 }
 0x269   : > { %v1095_v29 = vmul.f32 %v5982_v24, %v7005_v30 }
 0x26a   : > { %v1106_v26 = vmul.f32 %v5136_v20, %v1094_v22 }
 0x26b   : > { %v5984_v27 = vpop.eup %5983  ;;  %v1107_v37 = vmul.f32 %v5136_v20, %v1095_v29 }
 0x26c   : > { %v1118_v32 = vadd.f32 %v5137_v25, %v1106_v26  ;;  %v1096_v33 = vmul.f32 %v5984_v27, %v7013_v38 }
 0x26d   : > { %v1119_v42 = vadd.f32 %v5137_v25, %v1107_v37 }
 0x26e   : > { %v1123_v34 = vpack.c.bf16 %v1118_v32, %v1117_v31  ;;  %v1108_v35 = vmul.f32 %v5136_v20, %v1096_v33 }
 0x26f   : > { %v5986_v36 = vpop.eup %5985 }
 0x270   : > { %5404 = vmatmul.mubr.msk.bf16.vlgmr.msra.gmra.mrb[0].mxu0 %vm1019_vm1, %v1123_v34  ;;  %5420 = vmatmul.mubr.msk.bf16.vlgmr.msra.gmra.mrb[0].mxu1 %vm1019_vm1, %v1123_v34  ;;  %v5988_v40 = vpop.eup %5987  ;;  %v1120_v30 = vadd.f32 %v5137_v25, %v1108_v35  ;;  %v1098_v38 = vmul.f32 %v5986_v36, %v7023_v48 }
 0x271   : > { %5407 = vmatprep.mubr.msk.bf16.mxu0 %vm6476_vm2, %v6475_v57  ;;  %5423 = vmatprep.mubr.msk.bf16.mxu1 %vm6476_vm2, %v6475_v57  ;;  %v1097_v43 = vmul.f32 %v5988_v40, %v7021_v47 }
 0x272   : > { %5432 = vmatpush3.bf16.xpose.msra.mxu0 %v1331_v39  ;;  %5845 = vmatpush3.bf16.xpose.msra.mxu1 %v1331_v39  ;;  %v1124_v44 = vpack.c.bf16 %v1120_v30, %v1119_v42  ;;  %v1110_v45 = vmul.f32 %v5136_v20, %v1098_v38  ;;  %v5150_v38 = vld [vmem:[%s8107_s11] ss:$0 sm:$0xff] }
 0x273   : > { %5433 = vmatprep.subr.bf16.mxu0 %v6475_v57  ;;  %5844 = vmatprep.subr.bf16.mxu1 %v6475_v57  ;;  %v1109_v49 = vmul.f32 %v5136_v20, %v1097_v43 }
 0x274   : > { %v1122_v48 = vadd.f32 %v5137_v25, %v1110_v45 }
 0x275   : > { %v1121_v47 = vadd.f32 %v5137_v25, %v1109_v49 }
 0x277   : > { %v1125_v50 = vpack.c.bf16 %v1122_v48, %v1121_v47 }
 0x278   : > { %5408 = vmatmul.mubr.msk.bf16.gmra.mrb[4].mxu0 %vm1019_vm1, %v1124_v44  ;;  %5424 = vmatmul.mubr.msk.bf16.gmra.mrb[4].mxu1 %vm1019_vm1, %v1124_v44 }
 0x279   : > { %5411 = vmatprep.mubr.msk.bf16.mxu0 %vm6476_vm2, %v6475_v57  ;;  %5427 = vmatprep.mubr.msk.bf16.mxu1 %vm6476_vm2, %v6475_v57 }
 0x27a   : > { %5434 = vmatpush3.bf16.xpose.msra.mxu0 %v1334_v46  ;;  %5846 = vmatpush3.bf16.xpose.msra.mxu1 %v1334_v46 }
 0x27b   : > { %5447 = vmatprep.subr.bf16.mxu1 %v6475_v57  ;;  %5465 = vmatprep.subr.bf16.mxu0 %v6475_v57 }
 0x280   : > { %5412 = vmatmul.mubr.msk.bf16.gmra.mrb[8].mxu0 %vm1019_vm1, %v1125_v50  ;;  %5428 = vmatmul.mubr.msk.bf16.gmra.mrb[8].mxu1 %vm1019_vm1, %v1125_v50 }
 0x281   : > { %5435 = vmatprep.mubr.msk.bf16.mxu0 %vm6476_vm2, %v6475_v57  ;;  %5439 = vmatprep.mubr.msk.bf16.mxu1 %vm6476_vm2, %v6475_v57 }
 0x288   : > { %5436 = vmatmul.mubr.msk.bf16.vlgmr.msra.gmra.mrb[12].mxu0 %vm1019_vm1, %v1123_v34  ;;  %5440 = vmatmul.mubr.msk.bf16.vlgmr.msra.gmra.mrb[12].mxu1 %vm1019_vm1, %v1124_v44 }
 0x289   : > { %5443 = vmatprep.mubr.msk.bf16.mxu1 %vm6476_vm2, %v6475_v57  ;;  %5467 = vmatprep.mubr.msk.bf16.mxu0 %vm6476_vm2, %v6475_v57 }
 0x290   : > { %5444 = vmatmul.mubr.msk.bf16.gmra.mrb[16].mxu1 %vm1019_vm1, %v1125_v50 }
 0x291   : > { %5449 = vmatprep.mubr.msk.bf16.mxu1 %vm6476_vm2, %v6475_v57 }
 0x343   : > { %v1196_v53 = vpop.f32.mrb[0].mxu0  ;;  %v1286_v54 = vpop.f32.mrb[0].mxu1 }
 0x344   : > { %v1287_v55 = vadd.f32 %v5144_v51, %v1286_v54  ;;  %v5405_v56 = vpop.f32.mrb[1].mxu0  ;;  %v5421_v58 = vpop.f32.mrb[1].mxu1  ;;  %v1197_v61 = vadd.f32 %v7106_v52, %v1196_v53 }
 0x345   : > { %v1199_v59 = vpop.f32.mrb[2].mxu0  ;;  %v1289_v60 = vpop.f32.mrb[2].mxu1 }
 0x346   : > { %v7109_v62 = vpack.c.bf16 %v1287_v55, %v1287_v55  ;;  %v5406_v63 = vpop.f32.mrb[3].mxu0  ;;  %v5422_v0 = vpop.f32.mrb[3].mxu1  ;;  %v1290_v1 = vadd.f32 %v5144_v51, %v1289_v60  ;;  %v1219_v3 = vmul.f32 0.35355338, %v1197_v61  ;;  %v1200_v12 = vadd.f32 %v7106_v52, %v1199_v59 }
 0x348   : > { %v1426_v2 = vsel %vm1421_vm3, %v7109_v62, 0  ;;  %v7114_v6 = vpack.c.bf16 %v1290_v1, %v1290_v1  ;;  %v7116_v11 = vpack.c.bf16 %v1219_v3, %v1219_v3  ;;  %v1220_v20 = vmul.f32 0.35355338, %v1200_v12 }
 0x349   : > { %5448 = vmatpush3.bf16.xpose.msra.mxu1 %v1426_v2 }
 0x34a   : > { %5453 = vmatprep.subr.bf16.mxu1 %v6475_v57  ;;  %v1472_v19 = vsel %vm1421_vm3, %v7114_v6, 0  ;;  %v7134_v32 = vpack.c.bf16 %v1220_v20, %v1220_v20 }
 0x34b   : > { %v1204_v4 = vpop.f32.mrb[4].mxu0  ;;  %v1294_v5 = vpop.f32.mrb[4].mxu1 }
 0x34c   : > { %v5409_v7 = vpop.f32.mrb[5].mxu0  ;;  %v5425_v8 = vpop.f32.mrb[5].mxu1  ;;  %v1295_v16 = vadd.f32 %v5144_v51, %v1294_v5  ;;  %v1205_v29 = vadd.f32 %v7106_v52, %v1204_v4 }
 0x34d   : > { %v1207_v9 = vpop.f32.mrb[6].mxu0  ;;  %v1297_v10 = vpop.f32.mrb[6].mxu1 }
 0x34e   : > { %v1298_v13 = vadd.f32 %v5144_v51, %v1297_v10  ;;  %v5410_v14 = vpop.f32.mrb[7].mxu0  ;;  %v5426_v15 = vpop.f32.mrb[7].mxu1  ;;  %v1208_v17 = vadd.f32 %v7106_v52, %v1207_v9  ;;  %v7131_v22 = vpack.c.bf16 %v1295_v16, %v1295_v16  ;;  %v1221_v41 = vmul.f32 0.35355338, %v1205_v29 }
 0x350   : > { %v7120_v18 = vpack.c.bf16 %v1298_v13, %v1298_v13  ;;  %5450 = vmatmul.mubr.msk.bf16.vlgmr.msra.gmra.mrb[20].mxu1 %vm1421_vm3, %v7116_v11  ;;  %v1222_v25 = vmul.f32 0.35355338, %v1208_v17  ;;  %v1518_v36 = vsel %vm1421_vm3, %v7131_v22, 0  ;;  %v7162_v53 = vpack.c.bf16 %v1221_v41, %v1221_v41 }
 0x351   : > { %5454 = vmatpush3.bf16.xpose.msra.mxu1 %v1472_v19  ;;  %5455 = vmatprep.mubr.msk.bf16.mxu1 %vm6476_vm2, %v6475_v57  ;;  %v1393_v13 = vlaneseq }
 0x352   : > { %v1564_v21 = vsel %vm1421_vm3, %v7120_v18, 0  ;;  %5459 = vmatprep.subr.bf16.mxu1 %v6475_v57  ;;  %v7139_v39 = vpack.c.bf16 %v1222_v25, %v1222_v25 }
 0x353   : > { %v1212_v23 = vpop.f32.mrb[8].mxu0  ;;  %v1302_v24 = vpop.f32.mrb[8].mxu1  ;;  %5466 = vmatpush3.bf16.xpose.msra.mxu0 %v1564_v21  ;;  %v1394_v14 = vshrl.u32 %v1393_v13, 7  ;;  %v1396_v15 = vand.u32 127, %v1393_v13 }
 0x354   : > { %v5413_v26 = vpop.f32.mrb[9].mxu0  ;;  %v5429_v27 = vpop.f32.mrb[9].mxu1  ;;  %5477 = vmatprep.subr.bf16.mxu0 %v6475_v57  ;;  %v1303_v37 = vadd.f32 %v5144_v51, %v1302_v24  ;;  %v1213_v54 = vadd.f32 %v7106_v52, %v1212_v23 }
 0x355   : > { %v1215_v28 = vpop.f32.mrb[10].mxu0  ;;  %v1305_v31 = vpop.f32.mrb[10].mxu1  ;;  %vm1397_vm5 = vcmp.gt.s32.totalorder %v1396_v15, %v1394_v14 }
 0x356   : > { %v1306_v33 = vadd.f32 %v5144_v51, %v1305_v31  ;;  %v5414_v34 = vpop.f32.mrb[11].mxu0  ;;  %v5430_v35 = vpop.f32.mrb[11].mxu1  ;;  %v1216_v40 = vadd.f32 %v7106_v52, %v1215_v28  ;;  %v7157_v45 = vpack.c.bf16 %v1303_v37, %v1303_v37  ;;  %v1223_v52 = vmul.f32 0.35355338, %v1213_v54 }
 0x357   : > { %v7201_v16 = vsel %vm1397_vm5, -1e+09, %v6475_v57 }
 0x358   : > { %v7142_v30 = vpack.c.bf16 %v1306_v33, %v1306_v33  ;;  %5456 = vmatmul.mubr.msk.bf16.vlgmr.msra.gmra.mrb[24].mxu1 %vm1421_vm3, %v7134_v32  ;;  %v1224_v46 = vmul.f32 0.35355338, %v1216_v40  ;;  %v1610_v0 = vsel %vm1421_vm3, %v7157_v45, 0  ;;  %v7189_v8 = vpack.c.bf16 %v1223_v52, %v1223_v52 }
 0x359   : > { %5460 = vmatpush3.bf16.xpose.msra.mxu1 %v1518_v36  ;;  %5461 = vmatprep.mubr.msk.bf16.mxu1 %vm6476_vm2, %v6475_v57 }
 0x35a   : > { %5468 = vmatmul.mubr.msk.bf16.vlgmr.msra.gmra.mrb[16].mxu0 %vm1421_vm3, %v7139_v39  ;;  %v1656_v42 = vsel %vm1421_vm3, %v7142_v30, 0  ;;  %5471 = vmatprep.subr.bf16.mxu1 %v6475_v57  ;;  %v7167_v60 = vpack.c.bf16 %v1224_v46, %v1224_v46 }
 0x35b   : > { %v1370_v43 = vpop.f32.mrb[12].mxu0  ;;  %v1378_v44 = vpop.f32.mrb[12].mxu1  ;;  %5478 = vmatpush3.bf16.xpose.msra.mxu0 %v1656_v42  ;;  %5479 = vmatprep.mubr.msk.bf16.mxu0 %vm6476_vm2, %v6475_v57 }
 0x35c   : > { %v7159_v49 = vadd.f32 %v5150_v38, %v1378_v44  ;;  %v5437_v48 = vpop.f32.mrb[13].mxu0  ;;  %v5441_v47 = vpop.f32.mrb[13].mxu1  ;;  %5489 = vmatprep.subr.bf16.mxu0 %v6475_v57  ;;  %v1371_v61 = vadd.f32 %v5150_v38, %v1370_v43 }
 0x35d   : > { %v1373_v50 = vpop.f32.mrb[14].mxu0  ;;  %v1381_v51 = vpop.f32.mrb[14].mxu1 }
 0x35e   : > { %v1374_v55 = vadd.f32 %v5150_v38, %v1373_v50  ;;  %v7165_v56 = vadd.f32 %v5150_v38, %v1381_v51  ;;  %v5438_v58 = vpop.f32.mrb[15].mxu0  ;;  %v5442_v59 = vpop.f32.mrb[15].mxu1  ;;  %v7184_v3 = vpack.c.bf16 %v1371_v61, %v1371_v61 }
 0x360   : > { %v7169_v63 = vpack.c.bf16 %v1374_v55, %v1374_v55  ;;  %5462 = vmatmul.mubr.msk.bf16.vlgmr.msra.gmra.mrb[28].mxu1 %vm1421_vm3, %v7162_v53  ;;  %v1775_v12 = vsel %vm1773_vm4, %v7184_v3, 0 }
 0x361   : > { %5472 = vmatpush3.bf16.xpose.msra.mxu1 %v1610_v0  ;;  %5473 = vmatprep.mubr.msk.bf16.mxu1 %vm6476_vm2, %v6475_v57 }
 0x362   : > { %5480 = vmatmul.mubr.msk.bf16.vlgmr.msra.gmra.mrb[20].mxu0 %vm1421_vm3, %v7167_v60  ;;  %v1821_v1 = vsel %vm1773_vm4, %v7169_v63, 0  ;;  %5483 = vmatprep.subr.bf16.mxu1 %v6475_v57 }
 0x363   : > { %v1386_v2 = vpop.f32.mrb[16].mxu1  ;;  %5490 = vmatpush3.bf16.msra.mxu0 %v1821_v1  ;;  %5491 = vmatprep.mubr.msk.bf16.mxu0 %vm6476_vm2, %v6475_v57 }
 0x364   : > { %v7186_v4 = vadd.f32 %v5150_v38, %v1386_v2  ;;  %v5445_v5 = vpop.f32.mrb[17].mxu1  ;;  %5501 = vmatprep.subr.bf16.mxu0 %v6475_v57 }
 0x365   : > { %v1389_v7 = vpop.f32.mrb[18].mxu1 }
 0x366   : > { %v7191_v9 = vadd.f32 %v5150_v38, %v1389_v7  ;;  %v5446_v10 = vpop.f32.mrb[19].mxu1 }
 0x368   : > { %5474 = vmatmul.mubr.msk.bf16.vlgmr.msra.gmra.mrb[32].mxu1 %vm1421_vm3, %v7189_v8 }
 0x369   : > { %5484 = vmatpush3.bf16.msra.mxu1 %v1775_v12  ;;  %5485 = vmatprep.mubr.msk.bf16.mxu1 %vm6476_vm2, %v6475_v57 }
 0x36a   : > { %5495 = vmatprep.subr.bf16.mxu1 %v6475_v57 }
 0x423   : > { %v1462_v17 = vpop.f32.mrb[20].mxu1 }
 0x424   : > { %v1463_v19 = vadd.f32 %v1462_v17, %v7201_v16  ;;  %v5451_v20 = vpop.f32.mrb[21].mxu1 }
 0x425   : > { %v1465_v21 = vpop.f32.mrb[22].mxu1 }
 0x426   : > { %v5452_v23 = vpop.f32.mrb[23].mxu1  ;;  %v1698_v24 = vsel %vm1421_vm3, %v1463_v19, -inf }
 0x427   : > { %1699 = vmax.xlane.f32.xlu0 %v1698_v24 }
 0x42b   : > { %v1508_v25 = vpop.f32.mrb[24].mxu1 }
 0x42c   : > { %v1509_v26 = vadd.f32 %v1508_v25, %v7201_v16  ;;  %v5457_v27 = vpop.f32.mrb[25].mxu1 }
 0x42d   : > { %v1511_v28 = vpop.f32.mrb[26].mxu1  ;;  %v1600_v31 = vpop.f32.mrb[16].mxu0 }
 0x42e   : > { %v1601_v29 = vadd.f32 %v1600_v31, %v7201_v16  ;;  %v5458_v33 = vpop.f32.mrb[27].mxu1  ;;  %v5469_v34 = vpop.f32.mrb[17].mxu0  ;;  %v1701_v35 = vsel %vm1421_vm3, %v1509_v26, -inf }
 0x42f   : > { %1702 = vmax.xlane.f32.xlu1 %v1701_v35  ;;  %v1603_v36 = vpop.f32.mrb[18].mxu0 }
 0x430   : > { %v5470_v37 = vpop.f32.mrb[19].mxu0  ;;  %v1707_v40 = vsel %vm1421_vm3, %v1601_v29, -inf }
 0x433   : > { %v1554_v38 = vpop.f32.mrb[28].mxu1  ;;  %1708 = vmax.xlane.f32.xlu1 %v1707_v40 }
 0x434   : > { %v1555_v41 = vadd.f32 %v1554_v38, %v7201_v16  ;;  %v5463_v42 = vpop.f32.mrb[29].mxu1 }
 0x435   : > { %v1557_v43 = vpop.f32.mrb[30].mxu1  ;;  %v1692_v44 = vpop.f32.mrb[20].mxu0 }
 0x436   : > { %v1693_v46 = vadd.f32 %v1692_v44, %v7201_v16  ;;  %v5464_v48 = vpop.f32.mrb[31].mxu1  ;;  %v5481_v47 = vpop.f32.mrb[21].mxu0  ;;  %v1704_v50 = vsel %vm1421_vm3, %v1555_v41, -inf }
 0x437   : > { %1705 = vmax.xlane.f32.xlu0 %v1704_v50  ;;  %v1695_v51 = vpop.f32.mrb[22].mxu0  ;;  %v7253_v47 = vpack.c.bf16 %v7159_v49, %v7159_v49 }
 0x438   : > { %v5482_v54 = vpop.f32.mrb[23].mxu0  ;;  %v1713_v55 = vsel %vm1421_vm3, %v1693_v46, -inf }
 0x439   : > { %1714 = vmax.xlane.f32.xlu1 %v1713_v55 }
 0x43b   : > { %v1646_v58 = vpop.f32.mrb[32].mxu1 }
 0x43c   : > { %v1647_v59 = vadd.f32 %v1646_v58, %v7201_v16  ;;  %v5475_v61 = vpop.f32.mrb[33].mxu1  ;;  %v1867_v58 = vsel %vm1773_vm4, %v7253_v47, 0 }
 0x43d   : > { %v1649_v0 = vpop.f32.mrb[34].mxu1  ;;  %v7263_v61 = vpack.c.bf16 %v7165_v56, %v7165_v56 }
 0x43e   : > { %v5476_v52 = vpop.f32.mrb[35].mxu1  ;;  %v1710_v1 = vsel %vm1421_vm3, %v1647_v59, -inf }
 0x43f   : > { %1711 = vmax.xlane.f32.xlu0 %v1710_v1 }
 0x4b4   : > { %v1700_v2 = vpop.xlane.xlu0 %1699 }
 0x4b5   : > { %v1716_v5 = vsub.f32 %v1463_v19, %v1700_v2 }
 0x4b7   : > { %v1722_v7 = vmul.f32 1.442695, %v1716_v5 }
 0x4b9   : > { %5989 = vpow2.f32 %v1722_v7  ;;  %v1913_v7 = vsel %vm1773_vm4, %v7263_v61, 0 }
 0x4bc   : > { %v1703_v10 = vpop.xlane.xlu1 %1702 }
 0x4bd   : > { %v1717_v12 = vsub.f32 %v1509_v26, %v1703_v10 }
 0x4bf   : > { %v1724_v13 = vmul.f32 1.442695, %v1717_v12  ;;  %v7273_v12 = vpack.c.bf16 %v7186_v4, %v7186_v4 }
 0x4c0   : > { %v1709_v14 = vpop.xlane.xlu1 %1708 }
 0x4c1   : > { %5991 = vpow2.f32 %v1724_v13  ;;  %v1719_v15 = vsub.f32 %v1601_v29, %v1709_v14  ;;  %v7277_v13 = vpack.c.bf16 %v7191_v9, %v7191_v9 }
 0x4c3   : > { %v5990_v17 = vpop.eup %5989  ;;  %v1728_v20 = vmul.f32 1.442695, %v1719_v15  ;;  %v2005_v4 = vsel %vm1773_vm4, %v7277_v13, 0 }
 0x4c4   : > { %v1706_v21 = vpop.xlane.xlu0 %1705  ;;  %v1734_v23 = vsel %vm1421_vm3, %v5990_v17, 0.0 }
 0x4c5   : > { %5993 = vpow2.f32 %v1728_v20  ;;  %v1718_v24 = vsub.f32 %v1555_v41, %v1706_v21  ;;  %1735 = vadd.xlane.f32.xlu0 %v1734_v23  ;;  %v1959_v23 = vsel %vm1773_vm4, %v7273_v12, 0 }
 0x4c6   : > { %v1715_v25 = vpop.xlane.xlu1 %1714 }
 0x4c7   : > { %v1726_v27 = vmul.f32 1.442695, %v1718_v24  ;;  %v1721_v28 = vsub.f32 %v1693_v46, %v1715_v25 }
 0x4c9   : > { %5995 = vpow2.f32 %v1726_v27  ;;  %v1732_v19 = vmul.f32 1.442695, %v1721_v28 }
 0x4cb   : > { %v5992_v31 = vpop.eup %5991  ;;  %5997 = vpow2.f32 %v1732_v19 }
 0x4cc   : > { %v1712_v26 = vpop.xlane.xlu0 %1711  ;;  %v1737_v33 = vsel %vm1421_vm3, %v5992_v31, 0.0 }
 0x4cd   : > { %v1720_v34 = vsub.f32 %v1647_v59, %v1712_v26  ;;  %1738 = vadd.xlane.f32.xlu1 %v1737_v33 }
 0x4cf   : > { %v5994_v29 = vpop.eup %5993  ;;  %v1730_v35 = vmul.f32 1.442695, %v1720_v34 }
 0x4d0   : > { %v1743_v36 = vsel %vm1421_vm3, %v5994_v29, 0.0 }
 0x4d1   : > { %5999 = vpow2.f32 %v1730_v35  ;;  %1744 = vadd.xlane.f32.xlu1 %v1743_v36 }
 0x4d3   : > { %v5996_v37 = vpop.eup %5995 }
 0x4d4   : > { %v1740_v40 = vsel %vm1421_vm3, %v5996_v37, 0.0 }
 0x4d5   : > { %v7219_v38 = vpop.eup %5997  ;;  %1741 = vadd.xlane.f32.xlu0 %v1740_v40 }
 0x4d6   : > { %v1749_v41 = vsel %vm1421_vm3, %v7219_v38, 0.0 }
 0x4d7   : > { %1750 = vadd.xlane.f32.xlu1 %v1749_v41 }
 0x4db   : > { %v7223_v42 = vpop.eup %5999 }
 0x4dc   : > { %v1746_v43 = vsel %vm1421_vm3, %v7223_v42, 0.0 }
 0x4dd   : > { %1747 = vadd.xlane.f32.xlu0 %v1746_v43 }
 0x4e8   : > { %2106 = vrot.lane.b32.xlu1 %v7114_v6, %s6477_s7 }
 0x4ec   : > { %2051 = vrot.lane.b32.xlu1 %v7116_v11, %s6477_s7 }
 0x4f0   : > { %2103 = vrot.lane.b32.xlu1 %v7134_v32, %s6477_s7 }
 0x4f3   : > { %2054 = vrot.lane.b32.xlu0 %v7109_v62, %s6477_s7 }
 0x4f4   : > { %2210 = vrot.lane.b32.xlu1 %v7120_v18, %s6477_s7 }
 0x4f7   : > { %2158 = vrot.lane.b32.xlu0 %v7131_v22, %s6477_s7 }
 0x4f8   : > { %2207 = vrot.lane.b32.xlu1 %v7139_v39, %s6477_s7 }
 0x4fb   : > { %2155 = vrot.lane.b32.xlu0 %v7162_v53, %s6477_s7 }
 0x4fc   : > { %2314 = vrot.lane.b32.xlu1 %v7142_v30, %s6477_s7 }
 0x4ff   : > { %2262 = vrot.lane.b32.xlu0 %v7157_v45, %s6477_s7 }
 0x500   : > { %2311 = vrot.lane.b32.xlu1 %v7167_v60, %s6477_s7 }
 0x503   : > { %2259 = vrot.lane.b32.xlu0 %v7189_v8, %s6477_s7 }
 0x552   : > { %v1736_v44 = vpop.xlane.xlu0 %1735 }
 0x553   : > { %6001 = vrcp.f32 %v1736_v44 }
 0x55a   : > { %v1739_v46 = vpop.xlane.xlu1 %1738 }
 0x55b   : > { %6003 = vrcp.f32 %v1739_v46 }
 0x55d   : > { %v6002_v48 = vpop.eup %6001 }
 0x55e   : > { %v1745_v50 = vpop.xlane.xlu1 %1744  ;;  %v1758_v51 = vmul.f32 %v6002_v48, %v5990_v17 }
 0x55f   : > { %6005 = vrcp.f32 %v1745_v50 }
 0x560   : > { %v1764_v54 = vpack.c.bf16 %v1758_v51, %v1758_v51 }
 0x562   : > { %v1742_v55 = vpop.xlane.xlu0 %1741  ;;  %5486 = vmatmul.mubr.msk.bf16.vlgmr.msra.gmra.mrb[36].mxu1 %vm1421_vm3, %v1764_v54 }
 0x563   : > { %6007 = vrcp.f32 %v1742_v55  ;;  %5496 = vmatpush3.bf16.msra.mxu1 %v1867_v58  ;;  %5497 = vmatprep.mubr.msk.bf16.mxu1 %vm6476_vm2, %v6475_v57 }
 0x564   : > { %v1751_v59 = vpop.xlane.xlu1 %1750  ;;  %5507 = vmatprep.subr.bf16.mxu1 %v6475_v57 }
 0x565   : > { %v6004_v49 = vpop.eup %6003  ;;  %6009 = vrcp.f32 %v1751_v59 }
 0x566   : > { %v1759_v0 = vmul.f32 %v6004_v49, %v5992_v31 }
 0x568   : > { %v1765_v52 = vpack.c.bf16 %v1759_v0, %v1759_v0  ;;  %v2107_v2 = vpop.permute.xlu1 %2106 }
 0x569   : > { %v6006_v1 = vpop.eup %6005  ;;  %v2112_v26 = vsel %vm1421_vm3, %v2107_v2, 0 }
 0x56a   : > { %v1748_v5 = vpop.xlane.xlu0 %1747  ;;  %5492 = vmatmul.mubr.msk.bf16.vlgmr.msra.gmra.mrb[24].mxu0 %vm1421_vm3, %v1765_v52  ;;  %v1761_v56 = vmul.f32 %v6006_v1, %v5994_v29 }
 0x56b   : > { %6011 = vrcp.f32 %v1748_v5  ;;  %5502 = vmatpush3.bf16.msra.mxu0 %v1913_v7  ;;  %5503 = vmatprep.mubr.msk.bf16.mxu0 %vm6476_vm2, %v6475_v57 }
 0x56c   : > { %5513 = vmatprep.subr.bf16.mxu0 %v6475_v57  ;;  %v2052_v15 = vpop.permute.xlu1 %2051  ;;  %v1767_v20 = vpack.c.bf16 %v1761_v56, %v1761_v56 }
 0x56d   : > { %v6008_v10 = vpop.eup %6007 }
 0x56e   : > { %v1760_v14 = vmul.f32 %v6008_v10, %v5996_v37  ;;  %v2055_v25 = vpop.permute.xlu0 %2054 }
 0x56f   : > { %v6010_v21 = vpop.eup %6009  ;;  %v2060_v33 = vsel %vm1421_vm3, %v2055_v25, 0 }
 0x570   : > { %v1766_v17 = vpack.c.bf16 %v1760_v14, %v1760_v14  ;;  %v1763_v9 = vmul.f32 %v6010_v21, %v7219_v38  ;;  %v2104_v27 = vpop.permute.xlu1 %2103 }
 0x572   : > { %5498 = vmatmul.mubr.msk.bf16.vlgmr.msra.gmra.mrb[40].mxu1 %vm1421_vm3, %v1766_v17  ;;  %5504 = vmatmul.mubr.msk.bf16.vlgmr.msra.gmra.mrb[28].mxu0 %vm1421_vm3, %v1767_v20  ;;  %v1769_v31 = vpack.c.bf16 %v1763_v9, %v1763_v9  ;;  %v2159_v34 = vpop.permute.xlu0 %2158 }
 0x573   : > { %5508 = vmatpush3.bf16.msra.mxu1 %v1959_v23  ;;  %5514 = vmatpush3.bf16.msra.mxu0 %v2005_v4  ;;  %v2164_v37 = vsel %vm1421_vm3, %v2159_v34, 0 }
 0x574   : > { %5509 = vmatprep.mubr.msk.bf16.mxu1 %vm6476_vm2, %v6475_v57  ;;  %5515 = vmatprep.mubr.msk.bf16.mxu0 %vm6476_vm2, %v6475_v57  ;;  %v2211_v29 = vpop.permute.xlu1 %2210 }
 0x575   : > { %v6012_v24 = vpop.eup %6011  ;;  %5519 = vmatprep.subr.bf16.mxu1 %v6475_v57  ;;  %5525 = vmatprep.subr.bf16.mxu0 %v6475_v57  ;;  %v2216_v40 = vsel %vm1421_vm3, %v2211_v29, 0 }
 0x576   : > { %v1762_v28 = vmul.f32 %v6012_v24, %v7223_v42  ;;  %v2156_v35 = vpop.permute.xlu0 %2155 }
 0x578   : > { %v1768_v19 = vpack.c.bf16 %v1762_v28, %v1762_v28  ;;  %v2208_v36 = vpop.permute.xlu1 %2207 }
 0x57a   : > { %5510 = vmatmul.mubr.msk.bf16.vlgmr.msra.gmra.mrb[44].mxu1 %vm1421_vm3, %v1768_v19  ;;  %5516 = vmatmul.mubr.msk.bf16.vlgmr.msra.gmra.mrb[32].mxu0 %vm1421_vm3, %v1769_v31  ;;  %v2263_v38 = vpop.permute.xlu0 %2262 }
 0x57b   : > { %5521 = vmatprep.mubr.msk.bf16.mxu1 %vm6476_vm2, %v6475_v57  ;;  %5527 = vmatprep.mubr.msk.bf16.mxu0 %vm6476_vm2, %v6475_v57  ;;  %v2268_v42 = vsel %vm1421_vm3, %v2263_v38, 0 }
 0x57c   : > { %5520 = vmatpush3.bf16.xpose.msra.mxu1 %v2060_v33  ;;  %5526 = vmatpush3.bf16.xpose.msra.mxu0 %v2112_v26  ;;  %v2315_v41 = vpop.permute.xlu1 %2314 }
 0x57d   : > { %5531 = vmatprep.subr.bf16.mxu1 %v6475_v57  ;;  %5537 = vmatprep.subr.bf16.mxu0 %v6475_v57  ;;  %v2320_v43 = vsel %vm1421_vm3, %v2315_v41, 0 }
 0x57e   : > { %v2260_v44 = vpop.permute.xlu0 %2259 }
 0x580   : > { %v2312_v46 = vpop.permute.xlu1 %2311 }
 0x583   : > { %5522 = vmatmul.mubr.msk.bf16.vlgmr.msra.gmra.mrb[48].mxu1 %vm1421_vm3, %v2052_v15  ;;  %5528 = vmatmul.mubr.msk.bf16.vlgmr.msra.gmra.mrb[36].mxu0 %vm1421_vm3, %v2104_v27 }
 0x584   : > { %5532 = vmatpush3.bf16.xpose.msra.mxu1 %v2164_v37  ;;  %5538 = vmatpush3.bf16.xpose.msra.mxu0 %v2216_v40 }
 0x585   : > { %5533 = vmatprep.mubr.msk.bf16.mxu1 %vm6476_vm2, %v6475_v57  ;;  %5539 = vmatprep.mubr.msk.bf16.mxu0 %vm6476_vm2, %v6475_v57 }
 0x586   : > { %5543 = vmatprep.subr.bf16.mxu1 %v6475_v57  ;;  %5549 = vmatprep.subr.bf16.mxu0 %v6475_v57 }
 0x58b   : > { %5534 = vmatmul.mubr.msk.bf16.vlgmr.msra.gmra.mrb[52].mxu1 %vm1421_vm3, %v2156_v35  ;;  %5540 = vmatmul.mubr.msk.bf16.vlgmr.msra.gmra.mrb[40].mxu0 %vm1421_vm3, %v2208_v36 }
 0x58c   : > { %5544 = vmatpush3.bf16.xpose.msra.mxu1 %v2268_v42  ;;  %5550 = vmatpush3.bf16.xpose.msra.mxu0 %v2320_v43 }
 0x58d   : > { %5545 = vmatprep.mubr.msk.bf16.mxu1 %vm6476_vm2, %v6475_v57  ;;  %5551 = vmatprep.mubr.msk.bf16.mxu0 %vm6476_vm2, %v6475_v57 }
 0x58e   : > { %5561 = vmatprep.subr.bf16.mxu0 %v6475_v57  ;;  %5555 = vmatprep.subr.bf16.mxu1 %v6475_v57 }
 0x593   : > { %5546 = vmatmul.mubr.msk.bf16.vlgmr.msra.gmra.mrb[56].mxu1 %vm1421_vm3, %v2260_v44  ;;  %5552 = vmatmul.mubr.msk.bf16.vlgmr.msra.gmra.mrb[44].mxu0 %vm1421_vm3, %v2312_v46 }
 0x594   : > { %5557 = vmatprep.mubr.msk.bf16.mxu1 %vm6476_vm2, %v6475_v57  ;;  %5563 = vmatprep.mubr.msk.bf16.mxu0 %vm6476_vm2, %v6475_v57 }
 0x635   : > { %v7329_v48 = vpop.f32.mrb[36].mxu1 }
 0x636   : > { %v5487_v50 = vpop.f32.mrb[37].mxu1 }
 0x637   : > { %v1814_v51 = vpop.f32.mrb[38].mxu1 }
 0x638   : > { %v5488_v54 = vpop.f32.mrb[39].mxu1 }
 0x63d   : > { %v7331_v55 = vpop.f32.mrb[24].mxu0 }
 0x63e   : > { %v2047_v58 = vpack.c.bf16 %v7331_v55, %v7329_v48  ;;  %v5493_v59 = vpop.f32.mrb[25].mxu0 }
 0x63f   : > { %v1860_v49 = vpop.f32.mrb[26].mxu0 }
 0x640   : > { %v5494_v0 = vpop.f32.mrb[27].mxu0 }
 0x645   : > { %v7335_v52 = vpop.f32.mrb[40].mxu1  ;;  %v7337_v1 = vpop.f32.mrb[28].mxu0 }
 0x646   : > { %v2048_v2 = vpack.c.bf16 %v7337_v1, %v7335_v52  ;;  %v5499_v5 = vpop.f32.mrb[41].mxu1  ;;  %v5505_v7 = vpop.f32.mrb[29].mxu0 }
 0x647   : > { %v1906_v56 = vpop.f32.mrb[42].mxu1  ;;  %v1952_v10 = vpop.f32.mrb[30].mxu0 }
 0x648   : > { %v5500_v14 = vpop.f32.mrb[43].mxu1  ;;  %v5506_v15 = vpop.f32.mrb[31].mxu0 }
 0x64d   : > { %v7341_v17 = vpop.f32.mrb[44].mxu1  ;;  %v7343_v20 = vpop.f32.mrb[32].mxu0 }
 0x64e   : > { %v2049_v21 = vpack.c.bf16 %v7343_v20, %v7341_v17  ;;  %v5511_v23 = vpop.f32.mrb[45].mxu1  ;;  %v5517_v4 = vpop.f32.mrb[33].mxu0 }
 0x64f   : > { %v1998_v9 = vpop.f32.mrb[46].mxu1  ;;  %v2044_v24 = vpop.f32.mrb[34].mxu0 }
 0x650   : > { %v5512_v25 = vpop.f32.mrb[47].mxu1  ;;  %v5518_v27 = vpop.f32.mrb[35].mxu0 }
 0x656   : > { %v2096_v28 = vpop.f32.mrb[48].mxu1  ;;  %v2148_v19 = vpop.f32.mrb[36].mxu0 }
 0x657   : > { %v2097_v31 = vadd.f32 %v2096_v28, %v7201_v16  ;;  %v2149_v26 = vadd.f32 %v2148_v19, %v7201_v16  ;;  %v5523_v33 = vpop.f32.mrb[49].mxu1  ;;  %v5529_v34 = vpop.f32.mrb[37].mxu0 }
 0x658   : > { %v2099_v29 = vpop.f32.mrb[50].mxu1  ;;  %v2151_v35 = vpop.f32.mrb[38].mxu0 }
 0x659   : > { %v5524_v36 = vpop.f32.mrb[51].mxu1  ;;  %v5530_v37 = vpop.f32.mrb[39].mxu0  ;;  %v2362_v40 = vsel %vm1421_vm3, %v2097_v31, -inf  ;;  %v2365_v38 = vsel %vm1421_vm3, %v2149_v26, -inf }
 0x65a   : > { %2363 = vmax.xlane.f32.xlu0 %v2362_v40  ;;  %2366 = vmax.xlane.f32.xlu1 %v2365_v38 }
 0x65e   : > { %v2200_v41 = vpop.f32.mrb[52].mxu1  ;;  %v2252_v42 = vpop.f32.mrb[40].mxu0 }
 0x65f   : > { %v7352_v43 = vadd.f32 %v2200_v41, %v7201_v16  ;;  %v5535_v44 = vpop.f32.mrb[53].mxu1  ;;  %v5541_v46 = vpop.f32.mrb[41].mxu0  ;;  %v2253_v54 = vadd.f32 %v2252_v42, %v7201_v16 }
 0x660   : > { %v2203_v50 = vpop.f32.mrb[54].mxu1  ;;  %v2255_v51 = vpop.f32.mrb[42].mxu0 }
 0x661   : > { %v5536_v59 = vpop.f32.mrb[55].mxu1  ;;  %v5542_v49 = vpop.f32.mrb[43].mxu0  ;;  %v2368_v0 = vsel %vm1421_vm3, %v7352_v43, -inf  ;;  %v2371_v5 = vsel %vm1421_vm3, %v2253_v54, -inf }
 0x662   : > { %2369 = vmax.xlane.f32.xlu0 %v2368_v0 }
 0x666   : > { %v2304_v7 = vpop.f32.mrb[56].mxu1  ;;  %2372 = vmax.xlane.f32.xlu0 %v2371_v5  ;;  %v2356_v56 = vpop.f32.mrb[44].mxu0 }
 0x667   : > { %v2305_v10 = vadd.f32 %v2304_v7, %v7201_v16  ;;  %v2357_v14 = vadd.f32 %v2356_v56, %v7201_v16  ;;  %v5547_v15 = vpop.f32.mrb[57].mxu1  ;;  %v5553_v23 = vpop.f32.mrb[45].mxu0 }
 0x668   : > { %v2307_v4 = vpop.f32.mrb[58].mxu1  ;;  %v2359_v9 = vpop.f32.mrb[46].mxu0  ;;  %v7392_v15 = vld [vmem:[%s6956_s9 + $0x8] sm:$0xff]  }
 0x669   : > { %v5548_v24 = vpop.f32.mrb[59].mxu1  ;;  %v5554_v25 = vpop.f32.mrb[47].mxu0  ;;  %v2374_v27 = vsel %vm1421_vm3, %v2305_v10, -inf  ;;  %v2377_v28 = vsel %vm1421_vm3, %v2357_v14, -inf }
 0x66a   : > { %2375 = vmax.xlane.f32.xlu0 %v2374_v27  ;;  %2378 = vmax.xlane.f32.xlu1 %v2377_v28  ;;  %v7419_v27 = vld [vmem:[%s6956_s9] sm:$0xff]  }
 0x67b   : > { %2484 = vrot.lane.b32.xlu1 %v7169_v63, %s6477_s7 }
 0x67f   : > { %2533 = vrot.lane.b32.xlu1 %v7253_v47, %s6477_s7 }
 0x683   : > { %2582 = vrot.lane.b32.xlu1 %v7263_v61, %s6477_s7 }
 0x6e7   : > { %v2364_v19 = vpop.xlane.xlu0 %2363  ;;  %v2367_v33 = vpop.xlane.xlu1 %2366 }
 0x6e8   : > { %v2380_v34 = vsub.f32 %v2097_v31, %v2364_v19  ;;  %v2381_v29 = vsub.f32 %v2149_v26, %v2367_v33 }
 0x6ea   : > { %v2386_v35 = vmul.f32 1.442695, %v2380_v34  ;;  %v2388_v36 = vmul.f32 1.442695, %v2381_v29 }
 0x6ec   : > { %6013 = vpow2.f32 %v2386_v35 }
 0x6ed   : > { %6015 = vpow2.f32 %v2388_v36 }
 0x6ef   : > { %v2370_v37 = vpop.xlane.xlu0 %2369 }
 0x6f0   : > { %v2382_v56 = vsub.f32 %v7352_v43, %v2370_v37 }
 0x6f2   : > { %v2390_v23 = vmul.f32 1.442695, %v2382_v56 }
 0x6f3   : > { %v2373_v40 = vpop.xlane.xlu0 %2372 }
 0x6f4   : > { %v2383_v38 = vsub.f32 %v2253_v54, %v2373_v40 }
 0x6f6   : > { %v7368_v41 = vpop.eup %6013  ;;  %v2392_v42 = vmul.f32 1.442695, %v2383_v38 }
 0x6f7   : > { %v7370_v44 = vpop.eup %6015  ;;  %v2379_v46 = vpop.xlane.xlu1 %2378  ;;  %v2398_v50 = vsel %vm1421_vm3, %v7368_v41, 0.0 }
 0x6f8   : > { %6017 = vpow2.f32 %v2392_v42  ;;  %v2385_v51 = vsub.f32 %v2357_v14, %v2379_v46  ;;  %2399 = vadd.xlane.f32.xlu0 %v2398_v50  ;;  %v2401_v31 = vsel %vm1421_vm3, %v7370_v44, 0.0  ;;  %v2376_v14 = vpop.xlane.xlu0 %2375 }
 0x6f9   : > { %2402 = vadd.xlane.f32.xlu1 %v2401_v31  ;;  %v2384_v4 = vsub.f32 %v2305_v10, %v2376_v14 }
 0x6fa   : > { %v2396_v26 = vmul.f32 1.442695, %v2385_v51 }
 0x6fb   : > { %v2485_v59 = vpop.permute.xlu1 %2484  ;;  %v2394_v9 = vmul.f32 1.442695, %v2384_v4 }
 0x6fc   : > { %v2490_v54 = vsel %vm1773_vm4, %v2485_v59, 0  ;;  %6019 = vpow2.f32 %v2396_v26 }
 0x6fd   : > { %5562 = vmatpush3.bf16.msra.mxu0 %v2490_v54  ;;  %6021 = vpow2.f32 %v2390_v23  ;;  %v2827_v23 = vsel %vm1421_vm3, %v7419_v27, 0 }
 0x6fe   : > { %5573 = vmatprep.subr.bf16.mxu0 %v6475_v57  ;;  %6023 = vpow2.f32 %v2394_v9 }
 0x6ff   : > { %v2534_v28 = vpop.permute.xlu1 %2533 }
 0x700   : > { %v2539_v51 = vsel %vm1773_vm4, %v2534_v28, 0 }
 0x702   : > { %v7378_v49 = vpop.eup %6017 }
 0x703   : > { %v2407_v0 = vsel %vm1421_vm3, %v7378_v49, 0.0  ;;  %v2583_v19 = vpop.permute.xlu1 %2582 }
 0x704   : > { %2408 = vadd.xlane.f32.xlu1 %v2407_v0  ;;  %v2588_v31 = vsel %vm1773_vm4, %v2583_v19, 0 }
 0x706   : > { %v7382_v5 = vpop.eup %6019 }
 0x707   : > { %v2413_v7 = vsel %vm1421_vm3, %v7382_v5, 0.0  ;;  %v7400_v43 = vpop.eup %6021 }
 0x708   : > { %2414 = vadd.xlane.f32.xlu1 %v2413_v7  ;;  %v2404_v10 = vsel %vm1421_vm3, %v7400_v43, 0.0  ;;  %v7406_v24 = vpop.eup %6023 }
 0x709   : > { %v2410_v25 = vsel %vm1421_vm3, %v7406_v24, 0.0 }
 0x70e   : > { %2435 = vrot.lane.b32.xlu0 %v7184_v3, %s6477_s7 }
 0x719   : > { %2680 = vrot.lane.b32.xlu1 %v7277_v13, %s6477_s7 }
 0x71d   : > { %2743 = vrot.lane.b32.xlu1 %v7392_v15, %s6477_s7 }
 0x721   : > { %2941 = vrot.lane.b32.xlu1 %v7114_v6, %s6478_s29 }
 0x725   : > { %2939 = vrot.lane.b32.xlu1 %v7134_v32, %s6478_s29 }
 0x729   : > { %3041 = vrot.lane.b32.xlu1 %v7120_v18, %s6478_s29 }
 0x72d   : > { %2405 = vadd.xlane.f32.xlu0 %v2404_v10  ;;  %3039 = vrot.lane.b32.xlu1 %v7139_v39, %s6478_s29 }
 0x731   : > { %2411 = vadd.xlane.f32.xlu0 %v2410_v25  ;;  %3141 = vrot.lane.b32.xlu1 %v7142_v30, %s6478_s29 }
 0x735   : > { %3139 = vrot.lane.b32.xlu1 %v7167_v60, %s6478_s29 }
 0x747   : > { %2631 = vrot.lane.b32.xlu0 %v7273_v12, %s6477_s7 }
 0x74b   : > { %2741 = vrot.lane.b32.xlu0 %v7419_v27, %s6477_s7 }
 0x74f   : > { %2891 = vrot.lane.b32.xlu0 %v7109_v62, %s6478_s29 }
 0x753   : > { %2889 = vrot.lane.b32.xlu0 %v7116_v11, %s6478_s29 }
 0x757   : > { %2991 = vrot.lane.b32.xlu0 %v7131_v22, %s6478_s29 }
 0x75b   : > { %2989 = vrot.lane.b32.xlu0 %v7162_v53, %s6478_s29 }
 0x75f   : > { %3091 = vrot.lane.b32.xlu0 %v7157_v45, %s6478_s29 }
 0x763   : > { %3089 = vrot.lane.b32.xlu0 %v7189_v8, %s6478_s29 }
 0x785   : > { %v2400_v33 = vpop.xlane.xlu0 %2399 }
 0x786   : > { %6025 = vrcp.f32 %v2400_v33  ;;  %v2403_v34 = vpop.xlane.xlu1 %2402 }
 0x787   : > { %6027 = vrcp.f32 %v2403_v34 }
 0x789   : > { %v2436_v29 = vpop.permute.xlu0 %2435 }
 0x78a   : > { %v2441_v35 = vsel %vm1773_vm4, %v2436_v29, 0 }
 0x78b   : > { %5556 = vmatpush3.bf16.msra.mxu1 %v2441_v35 }
 0x78c   : > { %5567 = vmatprep.subr.bf16.mxu1 %v6475_v57 }
 0x790   : > { %v6026_v36 = vpop.eup %6025 }
 0x791   : > { %v6028_v37 = vpop.eup %6027  ;;  %v2422_v40 = vmul.f32 %v6026_v36, %v7368_v41  ;;  %v2409_v38 = vpop.xlane.xlu1 %2408 }
 0x792   : > { %v2423_v42 = vmul.f32 %v6028_v37, %v7370_v44  ;;  %6029 = vrcp.f32 %v2409_v38 }
 0x793   : > { %v2428_v46 = vpack.c.bf16 %v2422_v40, %v2422_v40 }
 0x794   : > { %v2429_v50 = vpack.c.bf16 %v2423_v42, %v2423_v42 }
 0x795   : > { %5558 = vmatmul.mubr.msk.bf16.vlgmr.msra.gmra.mrb[60].mxu1 %vm1421_vm3, %v2428_v46  ;;  %v2415_v26 = vpop.xlane.xlu1 %2414 }
 0x796   : > { %5564 = vmatmul.mubr.msk.bf16.vlgmr.msra.gmra.mrb[48].mxu0 %vm1421_vm3, %v2429_v50  ;;  %5568 = vmatpush3.bf16.msra.mxu1 %v2539_v51  ;;  %6031 = vrcp.f32 %v2415_v26 }
 0x797   : > { %5574 = vmatpush3.bf16.msra.mxu0 %v2588_v31  ;;  %5575 = vmatprep.mubr.msk.bf16.mxu0 %vm6476_vm2, %v6475_v57 }
 0x798   : > { %5585 = vmatprep.subr.bf16.mxu0 %v6475_v57  ;;  %5569 = vmatprep.mubr.msk.bf16.mxu1 %vm6476_vm2, %v6475_v57 }
 0x799   : > { %5579 = vmatprep.subr.bf16.mxu1 %v6475_v57  ;;  %v2681_v59 = vpop.permute.xlu1 %2680 }
 0x79a   : > { %v2686_v7 = vsel %vm1773_vm4, %v2681_v59, 0 }
 0x79c   : > { %v6030_v41 = vpop.eup %6029 }
 0x79d   : > { %v2425_v44 = vmul.f32 %v6030_v41, %v7378_v49  ;;  %v2830_v49 = vsel %vm1421_vm3, %v7392_v15, 0  ;;  %v2744_v4 = vpop.permute.xlu1 %2743 }
 0x79f   : > { %v2431_v54 = vpack.c.bf16 %v2425_v44, %v2425_v44 }
 0x7a0   : > { %v6032_v0 = vpop.eup %6031 }
 0x7a1   : > { %5576 = vmatmul.mubr.msk.bf16.vlgmr.msra.gmra.mrb[52].mxu0 %vm1421_vm3, %v2431_v54  ;;  %v2427_v56 = vmul.f32 %v6032_v0, %v7382_v5  ;;  %v2942_v5 = vpop.permute.xlu1 %2941 }
 0x7a2   : > { %5586 = vmatpush3.bf16.msra.mxu0 %v2686_v7  ;;  %5587 = vmatprep.mubr.msk.bf16.mxu0 %vm6476_vm2, %v6475_v57  ;;  %v2947_v9 = vsel %vm1421_vm3, %v2942_v5, 0 }
 0x7a3   : > { %5607 = vmatprep.subr.bf16.mxu0 %v6475_v57  ;;  %v2433_v14 = vpack.c.bf16 %v2427_v56, %v2427_v56 }
 0x7a5   : > { %v2940_v55 = vpop.permute.xlu1 %2939 }
 0x7a9   : > { %5588 = vmatmul.mubr.msk.bf16.vlgmr.msra.gmra.mrb[56].mxu0 %vm1421_vm3, %v2433_v14  ;;  %v3042_v52 = vpop.permute.xlu1 %3041 }
 0x7aa   : > { %5611 = vmatprep.mubr.msk.bf16.mxu0 %vm6476_vm2, %v6475_v57  ;;  %v3047_v20 = vsel %vm1421_vm3, %v3042_v52, 0 }
 0x7ab   : > { %5608 = vmatpush3.bf16.xpose.msra.mxu0 %v2827_v23 }
 0x7ac   : > { %5609 = vmatprep.subr.bf16.mxu0 %v6475_v57 }
 0x7ad   : > { %v3040_v29 = vpop.permute.xlu1 %3039 }
 0x7b3   : > { %5610 = vmatpush3.bf16.xpose.msra.mxu0 %v2830_v49 }
 0x7b4   : > { %5629 = vmatprep.subr.bf16.mxu0 %v6475_v57 }
 0x7ba   : > { %5612 = vmatmul.mubr.msk.bf16.vlgmr.msra.gmra.mrb[60].mxu0 %vm1421_vm3, %v2047_v58  ;;  %v2406_v10 = vpop.xlane.xlu0 %2405 }
 0x7bb   : > { %6033 = vrcp.f32 %v2406_v10  ;;  %5630 = vmatpush3.bf16.xpose.msra.mxu0 %v2947_v9  ;;  %5615 = vmatprep.mubr.msk.bf16.mxu0 %vm6476_vm2, %v6475_v57 }
 0x7bc   : > { %5641 = vmatprep.subr.bf16.mxu0 %v6475_v57 }
 0x7be   : > { %v2412_v25 = vpop.xlane.xlu0 %2411 }
 0x7bf   : > { %6035 = vrcp.f32 %v2412_v25 }
 0x7c2   : > { %5616 = vmatmul.mubr.msk.bf16.gmra.mrb[64].mxu0 %vm1421_vm3, %v2048_v2  ;;  %v2632_v28 = vpop.permute.xlu0 %2631 }
 0x7c3   : > { %5619 = vmatprep.mubr.msk.bf16.mxu0 %vm6476_vm2, %v6475_v57  ;;  %v2637_v34 = vsel %vm1773_vm4, %v2632_v28, 0 }
 0x7c5   : > { %v6034_v48 = vpop.eup %6033 }
 0x7c6   : > { %v2424_v58 = vmul.f32 %v6034_v48, %v7400_v43  ;;  %v2742_v2 = vpop.permute.xlu0 %2741 }
 0x7c7   : > { %v2755_v17 = vsel %vm1421_vm3, %v2742_v2, 0 }
 0x7c8   : > { %v2430_v19 = vpack.c.bf16 %v2424_v58, %v2424_v58 }
 0x7c9   : > { %v6036_v33 = vpop.eup %6035 }
 0x7ca   : > { %5620 = vmatmul.mubr.msk.bf16.gmra.mrb[68].mxu0 %vm1421_vm3, %v2049_v21  ;;  %5570 = vmatmul.mubr.msk.bf16.vlgmr.msra.gmra.mrb[64].mxu1 %vm1421_vm3, %v2430_v19  ;;  %v2426_v1 = vmul.f32 %v6036_v33, %v7406_v24  ;;  %v3142_v21 = vpop.permute.xlu1 %3141  ;;  %v2758_v24 = vsel %vm1421_vm3, %v2744_v4, 0  ;;  %v2892_v37 = vpop.permute.xlu0 %2891 }
 0x7cb   : > { %5580 = vmatpush3.bf16.msra.mxu1 %v2637_v34  ;;  %5631 = vmatprep.mubr.msk.bf16.mxu0 %vm6476_vm2, %v6475_v57  ;;  %v3147_v35 = vsel %vm1421_vm3, %v3142_v21, 0  ;;  %v2897_v41 = vsel %vm1421_vm3, %v2892_v37, 0 }
 0x7cc   : > { %5581 = vmatprep.mubr.msk.bf16.mxu1 %vm6476_vm2, %v6475_v57  ;;  %5591 = vmatprep.subr.bf16.mxu1 %v6475_v57  ;;  %v2432_v43 = vpack.c.bf16 %v2426_v1, %v2426_v1 }
 0x7ce   : > { %v3140_v36 = vpop.permute.xlu1 %3139 }
 0x7d2   : > { %5632 = vmatmul.mubr.msk.bf16.vlgmr.msra.gmra.mrb[72].mxu0 %vm1421_vm3, %v2940_v55  ;;  %5582 = vmatmul.mubr.msk.bf16.vlgmr.msra.gmra.mrb[68].mxu1 %vm1421_vm3, %v2432_v43 }
 0x7d3   : > { %5642 = vmatpush3.bf16.xpose.msra.mxu0 %v3047_v20  ;;  %5643 = vmatprep.mubr.msk.bf16.mxu0 %vm6476_vm2, %v6475_v57 }
 0x7d4   : > { %5653 = vmatprep.subr.bf16.mxu0 %v6475_v57  ;;  %5592 = vmatpush3.bf16.xpose.msra.mxu1 %v2755_v17  ;;  %v2890_v17 = vpop.permute.xlu0 %2889 }
 0x7d5   : > { %5593 = vmatprep.subr.bf16.mxu1 %v6475_v57  ;;  %5595 = vmatprep.mubr.msk.bf16.mxu1 %vm6476_vm2, %v6475_v57 }
 0x7da   : > { %5644 = vmatmul.mubr.msk.bf16.vlgmr.msra.gmra.mrb[76].mxu0 %vm1421_vm3, %v3040_v29 }
 0x7db   : > { %5654 = vmatpush3.bf16.xpose.msra.mxu0 %v3147_v35  ;;  %5655 = vmatprep.mubr.msk.bf16.mxu0 %vm6476_vm2, %v6475_v57 }
 0x7dc   : > { %5594 = vmatpush3.bf16.xpose.msra.mxu1 %v2758_v24  ;;  %5665 = vmatprep.subr.bf16.mxu0 %v6475_v57 }
 0x7dd   : > { %5623 = vmatprep.subr.bf16.mxu1 %v6475_v57 }
 0x7e2   : > { %5656 = vmatmul.mubr.msk.bf16.vlgmr.msra.gmra.mrb[80].mxu0 %vm1421_vm3, %v3140_v36 }
 0x7e3   : > { %5667 = vmatprep.mubr.msk.bf16.mxu0 %vm6476_vm2, %v6475_v57 }
 0x868   : > { %v2477_v40 = vpop.f32.mrb[60].mxu1 }
 0x869   : > { %v2526_v38 = vpop.f32.mrb[48].mxu0  ;;  %v5559_v42 = vpop.f32.mrb[61].mxu1 }
 0x86a   : > { %v2728_v46 = vpack.c.bf16 %v2526_v38, %v2477_v40  ;;  %v5565_v50 = vpop.f32.mrb[49].mxu0  ;;  %v2480_v51 = vpop.f32.mrb[62].mxu1 }
 0x86b   : > { %v2529_v31 = vpop.f32.mrb[50].mxu0  ;;  %v5560_v26 = vpop.f32.mrb[63].mxu1 }
 0x86c   : > { %v5566_v44 = vpop.f32.mrb[51].mxu0  ;;  %5596 = vmatmul.mubr.msk.bf16.vlgmr.msra.gmra.mrb[72].mxu1 %vm1421_vm3, %v2728_v46  ;;  %v2992_v51 = vpop.permute.xlu0 %2991 }
 0x86d   : > { %5624 = vmatpush3.bf16.xpose.msra.mxu1 %v2897_v41  ;;  %5599 = vmatprep.mubr.msk.bf16.mxu1 %vm6476_vm2, %v6475_v57 }
 0x86e   : > { %5635 = vmatprep.subr.bf16.mxu1 %v6475_v57 }
 0x870   : > { %v2990_v41 = vpop.permute.xlu0 %2989 }
 0x874   : > { %v2624_v59 = vpop.f32.mrb[52].mxu0 }
 0x875   : > { %v5577_v54 = vpop.f32.mrb[53].mxu0 }
 0x876   : > { %v2627_v0 = vpop.f32.mrb[54].mxu0 }
 0x877   : > { %v5578_v7 = vpop.f32.mrb[55].mxu0  ;;  %v3092_v0 = vpop.permute.xlu0 %3091 }
 0x87c   : > { %v2722_v56 = vpop.f32.mrb[56].mxu0 }
 0x87d   : > { %v5589_v14 = vpop.f32.mrb[57].mxu0 }
 0x87e   : > { %v2725_v23 = vpop.f32.mrb[58].mxu0 }
 0x87f   : > { %v5590_v49 = vpop.f32.mrb[59].mxu0 }
 0x880   : > { %v3097_v49 = vsel %vm1421_vm3, %v3092_v0, 0 }
 0x88d   : > { %v7517_v4 = vpop.f32.mrb[60].mxu0 }
 0x88e   : > { %v5613_v5 = vpop.f32.mrb[61].mxu0 }
 0x88f   : > { %v7519_v9 = vpop.f32.mrb[62].mxu0 }
 0x890   : > { %v5614_v10 = vpop.f32.mrb[63].mxu0 }
 0x895   : > { %v7521_v25 = vpop.f32.mrb[64].mxu0 }
 0x896   : > { %v5617_v48 = vpop.f32.mrb[65].mxu0 }
 0x897   : > { %v7523_v55 = vpop.f32.mrb[66].mxu0  ;;  %v3090_v48 = vpop.permute.xlu0 %3089 }
 0x898   : > { %v5618_v58 = vpop.f32.mrb[67].mxu0 }
 0x89d   : > { %v7525_v28 = vpop.f32.mrb[68].mxu0  ;;  %v2575_v19 = vpop.f32.mrb[64].mxu1 }
 0x89e   : > { %v2729_v33 = vpack.c.bf16 %v2624_v59, %v2575_v19  ;;  %v5621_v34 = vpop.f32.mrb[69].mxu0  ;;  %v5571_v52 = vpop.f32.mrb[65].mxu1  ;;  %v2997_v59 = vsel %vm1421_vm3, %v2992_v51, 0 }
 0x89f   : > { %v7527_v1 = vpop.f32.mrb[70].mxu0  ;;  %v2578_v2 = vpop.f32.mrb[66].mxu1 }
 0x8a0   : > { %v5622_v43 = vpop.f32.mrb[71].mxu0  ;;  %v5572_v29 = vpop.f32.mrb[67].mxu1  ;;  %5600 = vmatmul.mubr.msk.bf16.gmra.mrb[76].mxu1 %vm1421_vm3, %v2729_v33 }
 0x8a1   : > { %5603 = vmatprep.mubr.msk.bf16.mxu1 %vm6476_vm2, %v6475_v57 }
 0x8a5   : > { %v2983_v20 = vpop.f32.mrb[72].mxu0  ;;  %v2673_v21 = vpop.f32.mrb[68].mxu1 }
 0x8a6   : > { %v2984_v24 = vadd.f32 %v2983_v20, %v7201_v16  ;;  %v2730_v35 = vpack.c.bf16 %v2722_v56, %v2673_v21  ;;  %v5633_v36 = vpop.f32.mrb[73].mxu0  ;;  %v5583_v37 = vpop.f32.mrb[69].mxu1 }
 0x8a7   : > { %v2986_v40 = vpop.f32.mrb[74].mxu0  ;;  %v2676_v38 = vpop.f32.mrb[70].mxu1 }
 0x8a8   : > { %v5634_v42 = vpop.f32.mrb[75].mxu0  ;;  %v5584_v46 = vpop.f32.mrb[71].mxu1  ;;  %5604 = vmatmul.mubr.msk.bf16.gmra.mrb[80].mxu1 %vm1421_vm3, %v2730_v35  ;;  %v3192_v50 = vsel %vm1421_vm3, %v2984_v24, -inf }
 0x8a9   : > { %3193 = vmax.xlane.f32.xlu1 %v3192_v50  ;;  %5625 = vmatprep.mubr.msk.bf16.mxu1 %vm6476_vm2, %v6475_v57 }
 0x8ad   : > { %v3083_v31 = vpop.f32.mrb[76].mxu0 }
 0x8ae   : > { %v5645_v26 = vpop.f32.mrb[77].mxu0 }
 0x8af   : > { %v3086_v44 = vpop.f32.mrb[78].mxu0 }
 0x8b0   : > { %v5646_v54 = vpop.f32.mrb[79].mxu0  ;;  %5626 = vmatmul.mubr.msk.bf16.vlgmr.msra.gmra.mrb[84].mxu1 %vm1421_vm3, %v2890_v17 }
 0x8b1   : > { %5636 = vmatpush3.bf16.xpose.msra.mxu1 %v2997_v59  ;;  %5637 = vmatprep.mubr.msk.bf16.mxu1 %vm6476_vm2, %v6475_v57 }
 0x8b2   : > { %5647 = vmatprep.subr.bf16.mxu1 %v6475_v57 }
 0x8b5   : > { %v3183_v7 = vpop.f32.mrb[80].mxu0 }
 0x8b6   : > { %v7543_v56 = vadd.f32 %v3183_v7, %v7201_v16  ;;  %v5657_v14 = vpop.f32.mrb[81].mxu0 }
 0x8b7   : > { %v3186_v23 = vpop.f32.mrb[82].mxu0  ;;  %v3084_v14 = vadd.f32 %v3083_v31, %v7201_v16 }
 0x8b8   : > { %v5658_v5 = vpop.f32.mrb[83].mxu0  ;;  %5638 = vmatmul.mubr.msk.bf16.vlgmr.msra.gmra.mrb[88].mxu1 %vm1421_vm3, %v2990_v41  ;;  %v3204_v10 = vsel %vm1421_vm3, %v7543_v56, -inf }
 0x8b9   : > { %5648 = vmatpush3.bf16.xpose.msra.mxu1 %v3097_v49  ;;  %3205 = vmax.xlane.f32.xlu1 %v3204_v10  ;;  %v3198_v49 = vsel %vm1421_vm3, %v3084_v14, -inf }
 0x8ba   : > { %5649 = vmatprep.mubr.msk.bf16.mxu1 %vm6476_vm2, %v6475_v57  ;;  %5659 = vmatprep.subr.bf16.mxu1 %v6475_v57 }
 0x8c0   : > { %5650 = vmatmul.mubr.msk.bf16.vlgmr.msra.gmra.mrb[92].mxu1 %vm1421_vm3, %v3090_v48 }
 0x8c1   : > { %5661 = vmatprep.mubr.msk.bf16.mxu1 %vm6476_vm2, %v6475_v57 }
 0x936   : > { %v3194_v58 = vpop.xlane.xlu1 %3193 }
 0x937   : > { %v3208_v19 = vsub.f32 %v2984_v24, %v3194_v58 }
 0x939   : > { %v3215_v33 = vmul.f32 1.442695, %v3208_v19 }
 0x93b   : > { %6037 = vpow2.f32 %v3215_v33 }
 0x93f   : > { %v2794_v34 = vpop.f32.mrb[72].mxu1 }
 0x940   : > { %v7556_v52 = vadd.f32 %v7517_v4, %v2794_v34  ;;  %v5597_v2 = vpop.f32.mrb[73].mxu1 }
 0x941   : > { %v2797_v43 = vpop.f32.mrb[74].mxu1 }
 0x942   : > { %v7559_v29 = vadd.f32 %v7519_v9, %v2797_v43  ;;  %v5598_v17 = vpop.f32.mrb[75].mxu1 }
 0x945   : > { %v7561_v20 = vpop.eup %6037 }
 0x946   : > { %v3228_v21 = vsel %vm1421_vm3, %v7561_v20, 0.0  ;;  %v3206_v31 = vpop.xlane.xlu1 %3205 }
 0x947   : > { %3229 = vadd.xlane.f32.xlu1 %v3228_v21  ;;  %v3212_v21 = vsub.f32 %v7543_v56, %v3206_v31 }
 0x973   : > { %v2802_v35 = vpop.f32.mrb[76].mxu1 }
 0x974   : > { %v7566_v24 = vadd.f32 %v7521_v25, %v2802_v35  ;;  %v5601_v36 = vpop.f32.mrb[77].mxu1 }
 0x975   : > { %v2805_v37 = vpop.f32.mrb[78].mxu1 }
 0x976   : > { %v7569_v4 = vadd.f32 %v7523_v55, %v2805_v37  ;;  %v5602_v40 = vpop.f32.mrb[79].mxu1 }
 0x977   : > { %v3223_v40 = vmul.f32 1.442695, %v3212_v21 }
 0x97b   : > { %v2810_v38 = vpop.f32.mrb[80].mxu1 }
 0x97c   : > { %v7572_v9 = vadd.f32 %v7525_v28, %v2810_v38  ;;  %v5605_v42 = vpop.f32.mrb[81].mxu1 }
 0x97d   : > { %v2813_v46 = vpop.f32.mrb[82].mxu1 }
 0x97e   : > { %v7575_v50 = vadd.f32 %v7527_v1, %v2813_v46  ;;  %v5606_v51 = vpop.f32.mrb[83].mxu1 }
 0x983   : > { %v2933_v26 = vpop.f32.mrb[84].mxu1 }
 0x984   : > { %v2934_v25 = vadd.f32 %v2933_v26, %v7201_v16  ;;  %v5627_v41 = vpop.f32.mrb[85].mxu1 }
 0x985   : > { %v2936_v44 = vpop.f32.mrb[86].mxu1 }
 0x986   : > { %v5628_v59 = vpop.f32.mrb[87].mxu1  ;;  %v3189_v55 = vsel %vm1421_vm3, %v2934_v25, -inf }
 0x987   : > { %3190 = vmax.xlane.f32.xlu0 %v3189_v55 }
 0x98b   : > { %v3033_v54 = vpop.f32.mrb[88].mxu1 }
 0x98c   : > { %v3034_v0 = vadd.f32 %v3033_v54, %v7201_v16  ;;  %v5639_v28 = vpop.f32.mrb[89].mxu1 }
 0x98d   : > { %v3036_v7 = vpop.f32.mrb[90].mxu1 }
 0x98e   : > { %v5640_v23 = vpop.f32.mrb[91].mxu1  ;;  %v3195_v1 = vsel %vm1421_vm3, %v3034_v0, -inf }
 0x98f   : > { %3196 = vmax.xlane.f32.xlu0 %v3195_v1 }
 0x993   : > { %v3133_v5 = vpop.f32.mrb[92].mxu1  ;;  %3199 = vmax.xlane.f32.xlu0 %v3198_v49 }
 0x994   : > { %v3134_v10 = vadd.f32 %v3133_v5, %v7201_v16  ;;  %v5651_v48 = vpop.f32.mrb[93].mxu1 }
 0x995   : > { %v3136_v58 = vpop.f32.mrb[94].mxu1 }
 0x996   : > { %v5652_v19 = vpop.f32.mrb[95].mxu1  ;;  %v3201_v33 = vsel %vm1421_vm3, %v3134_v10, -inf }
 0x997   : > { %3202 = vmax.xlane.f32.xlu0 %v3201_v33 }
 0xa14   : > { %v3191_v34 = vpop.xlane.xlu0 %3190 }
 0xa15   : > { %v3207_v2 = vsub.f32 %v2934_v25, %v3191_v34 }
 0xa17   : > { %v3213_v43 = vmul.f32 1.442695, %v3207_v2 }
 0xa19   : > { %6039 = vpow2.f32 %v3213_v43 }
 0xa1c   : > { %v3197_v17 = vpop.xlane.xlu0 %3196 }
 0xa1d   : > { %v3209_v25 = vsub.f32 %v3034_v0, %v3197_v17 }
 0xa1f   : > { %v3217_v44 = vmul.f32 1.442695, %v3209_v25 }
 0xa20   : > { %v3200_v35 = vpop.xlane.xlu0 %3199 }
 0xa21   : > { %v3210_v36 = vsub.f32 %v3084_v14, %v3200_v35 }
 0xa23   : > { %v6040_v37 = vpop.eup %6039  ;;  %v3219_v38 = vmul.f32 1.442695, %v3210_v36 }
 0xa24   : > { %v3225_v42 = vsel %vm1421_vm3, %v6040_v37, 0.0  ;;  %v3203_v41 = vpop.xlane.xlu0 %3202 }
 0xa25   : > { %6041 = vpow2.f32 %v3219_v38  ;;  %3226 = vadd.xlane.f32.xlu0 %v3225_v42  ;;  %v3211_v59 = vsub.f32 %v3134_v10, %v3203_v41 }
 0xa26   : > { %6043 = vpow2.f32 %v3223_v40 }
 0xa27   : > { %6045 = vpow2.f32 %v3217_v44  ;;  %v3221_v55 = vmul.f32 1.442695, %v3211_v59 }
 0xa29   : > { %6047 = vpow2.f32 %v3221_v55 }
 0xa2f   : > { %v7587_v46 = vpop.eup %6041 }
 0xa30   : > { %v3234_v51 = vsel %vm1421_vm3, %v7587_v46, 0.0  ;;  %v7591_v26 = vpop.eup %6043 }
 0xa31   : > { %3235 = vadd.xlane.f32.xlu1 %v3234_v51  ;;  %v3240_v56 = vsel %vm1421_vm3, %v7591_v26, 0.0  ;;  %v7605_v54 = vpop.eup %6045 }
 0xa32   : > { %v3231_v0 = vsel %vm1421_vm3, %v7605_v54, 0.0 }
 0xa33   : > { %v7611_v28 = vpop.eup %6047 }
 0xa34   : > { %v3237_v7 = vsel %vm1421_vm3, %v7611_v28, 0.0 }
 0xa35   : > { %3241 = vadd.xlane.f32.xlu1 %v3240_v56 }
 0xa3b   : > { %3261 = vrot.lane.b32.xlu0 %v7184_v3, %s6478_s29 }
 0xa46   : > { %3309 = vrot.lane.b32.xlu1 %v7169_v63, %s6478_s29 }
 0xa4a   : > { %3357 = vrot.lane.b32.xlu1 %v7253_v47, %s6478_s29 }
 0xa4e   : > { %3405 = vrot.lane.b32.xlu1 %v7263_v61, %s6478_s29 }
 0xa52   : > { %3501 = vrot.lane.b32.xlu1 %v7277_v13, %s6478_s29 }
 0xa56   : > { %3636 = vrot.lane.b32.xlu1 %v7109_v62, %s6479_s5 }
 0xa5a   : > { %3232 = vadd.xlane.f32.xlu0 %v3231_v0  ;;  %3634 = vrot.lane.b32.xlu1 %v7116_v11, %s6479_s5  ;;  %v3230_v11 = vpop.xlane.xlu1 %3229 }
 0xa5e   : > { %3238 = vadd.xlane.f32.xlu0 %v3237_v7  ;;  %3684 = vrot.lane.b32.xlu1 %v7134_v32, %s6479_s5 }
 0xa62   : > { %3734 = vrot.lane.b32.xlu1 %v7162_v53, %s6479_s5 }
 0xa66   : > { %3784 = vrot.lane.b32.xlu1 %v7139_v39, %s6479_s5 }
 0xa6a   : > { %3886 = vrot.lane.b32.xlu1 %v7142_v30, %s6479_s5 }
 0xa6e   : > { %3884 = vrot.lane.b32.xlu1 %v7167_v60, %s6479_s5 }
 0xa74   : > { %3453 = vrot.lane.b32.xlu0 %v7273_v12, %s6478_s29 }
 0xa78   : > { %3552 = vrot.lane.b32.xlu0 %v7419_v27, %s6478_s29 }
 0xa7c   : > { %3554 = vrot.lane.b32.xlu0 %v7392_v15, %s6478_s29 }
 0xa80   : > { %3686 = vrot.lane.b32.xlu0 %v7114_v6, %s6479_s5 }
 0xa84   : > { %3736 = vrot.lane.b32.xlu0 %v7131_v22, %s6479_s5 }
 0xa88   : > { %3786 = vrot.lane.b32.xlu0 %v7120_v18, %s6479_s5 }
 0xa8c   : > { %3836 = vrot.lane.b32.xlu0 %v7157_v45, %s6479_s5 }
 0xa90   : > { %3834 = vrot.lane.b32.xlu0 %v7189_v8, %s6479_s5 }
 0xab2   : > { %v3227_v62 = vpop.xlane.xlu0 %3226 }
 0xab3   : > { %6049 = vrcp.f32 %v3227_v62 }
 0xab4   : > { %6051 = vrcp.f32 %v3230_v11 }
 0xab6   : > { %v3262_v32 = vpop.permute.xlu0 %3261 }
 0xab7   : > { %v3267_v39 = vsel %vm1773_vm4, %v3262_v32, 0 }
 0xab8   : > { %5660 = vmatpush3.bf16.msra.mxu1 %v3267_v39 }
 0xab9   : > { %5671 = vmatprep.subr.bf16.mxu1 %v6475_v57 }
 0xabd   : > { %v6050_v6 = vpop.eup %6049 }
 0xabe   : > { %v3249_v22 = vmul.f32 %v6050_v6, %v6040_v37  ;;  %v3236_v30 = vpop.xlane.xlu1 %3235  ;;  %v6052_v53 = vpop.eup %6051 }
 0xabf   : > { %6053 = vrcp.f32 %v3236_v30  ;;  %v3250_v60 = vmul.f32 %v6052_v53, %v7561_v20 }
 0xac0   : > { %v3255_v18 = vpack.c.bf16 %v3249_v22, %v3249_v22 }
 0xac1   : > { %v3256_v27 = vpack.c.bf16 %v3250_v60, %v3250_v60 }
 0xac2   : > { %5662 = vmatmul.mubr.msk.bf16.vlgmr.msra.gmra.mrb[96].mxu1 %vm1421_vm3, %v3255_v18  ;;  %v3242_v45 = vpop.xlane.xlu1 %3241 }
 0xac3   : > { %5673 = vmatprep.mubr.msk.bf16.mxu1 %vm6476_vm2, %v6475_v57  ;;  %6055 = vrcp.f32 %v3242_v45 }
 0xac6   : > { %v3310_v8 = vpop.permute.xlu1 %3309 }
 0xac7   : > { %v3315_v15 = vsel %vm1773_vm4, %v3310_v8, 0 }
 0xac8   : > { %5666 = vmatpush3.bf16.msra.mxu0 %v3315_v15 }
 0xac9   : > { %5677 = vmatprep.subr.bf16.mxu0 %v6475_v57  ;;  %v6054_v14 = vpop.eup %6053 }
 0xaca   : > { %v3358_v23 = vpop.permute.xlu1 %3357  ;;  %v3252_v20 = vmul.f32 %v6054_v14, %v7587_v46 }
 0xacb   : > { %v3363_v1 = vsel %vm1773_vm4, %v3358_v23, 0  ;;  %5668 = vmatmul.mubr.msk.bf16.vlgmr.msra.gmra.mrb[84].mxu0 %vm1421_vm3, %v3256_v27 }
 0xacc   : > { %5672 = vmatpush3.bf16.msra.mxu1 %v3363_v1  ;;  %5679 = vmatprep.mubr.msk.bf16.mxu0 %vm6476_vm2, %v6475_v57  ;;  %v3258_v10 = vpack.c.bf16 %v3252_v20, %v3252_v20 }
 0xacd   : > { %5683 = vmatprep.subr.bf16.mxu1 %v6475_v57  ;;  %v6056_v48 = vpop.eup %6055 }
 0xace   : > { %v3406_v49 = vpop.permute.xlu1 %3405  ;;  %v3254_v33 = vmul.f32 %v6056_v48, %v7591_v26 }
 0xacf   : > { %v3411_v5 = vsel %vm1773_vm4, %v3406_v49, 0 }
 0xad0   : > { %5678 = vmatpush3.bf16.msra.mxu0 %v3411_v5  ;;  %v3260_v2 = vpack.c.bf16 %v3254_v33, %v3254_v33 }
 0xad1   : > { %5689 = vmatprep.subr.bf16.mxu0 %v6475_v57 }
 0xad2   : > { %v3502_v58 = vpop.permute.xlu1 %3501 }
 0xad3   : > { %v3507_v19 = vsel %vm1773_vm4, %v3502_v58, 0  ;;  %5680 = vmatmul.mubr.msk.bf16.vlgmr.msra.gmra.mrb[88].mxu0 %vm1421_vm3, %v3258_v10 }
 0xad4   : > { %5690 = vmatpush3.bf16.msra.mxu0 %v3507_v19  ;;  %5691 = vmatprep.mubr.msk.bf16.mxu0 %vm6476_vm2, %v6475_v57 }
 0xad5   : > { %5711 = vmatprep.subr.bf16.mxu0 %v6475_v57 }
 0xad6   : > { %v3637_v34 = vpop.permute.xlu1 %3636 }
 0xad7   : > { %v3642_v43 = vsel %vm1421_vm3, %v3637_v34, 0 }
 0xada   : > { %v3635_v31 = vpop.permute.xlu1 %3634 }
 0xadb   : > { %5692 = vmatmul.mubr.msk.bf16.vlgmr.msra.gmra.mrb[92].mxu0 %vm1421_vm3, %v3260_v2 }
 0xadc   : > { %5713 = vmatprep.mubr.msk.bf16.mxu0 %vm6476_vm2, %v6475_v57 }
 0xadd   : > { %5712 = vmatpush3.bf16.xpose.msra.mxu0 %v3642_v43 }
 0xade   : > { %5717 = vmatprep.subr.bf16.mxu0 %v6475_v57  ;;  %v3685_v59 = vpop.permute.xlu1 %3684 }
 0xae2   : > { %v3735_v0 = vpop.permute.xlu1 %3734 }
 0xae4   : > { %5714 = vmatmul.mubr.msk.bf16.vlgmr.msra.gmra.mrb[96].mxu0 %vm1421_vm3, %v3635_v31 }
 0xae5   : > { %5719 = vmatprep.mubr.msk.bf16.mxu0 %vm6476_vm2, %v6475_v57 }
 0xae6   : > { %v3785_v62 = vpop.permute.xlu1 %3784 }
 0xae7   : > { %v3233_v17 = vpop.xlane.xlu0 %3232 }
 0xae8   : > { %6057 = vrcp.f32 %v3233_v17 }
 0xaea   : > { %v3887_v32 = vpop.permute.xlu1 %3886 }
 0xaeb   : > { %v3239_v21 = vpop.xlane.xlu0 %3238  ;;  %v3892_v39 = vsel %vm1421_vm3, %v3887_v32, 0 }
 0xaec   : > { %6059 = vrcp.f32 %v3239_v21 }
 0xaee   : > { %v3885_v6 = vpop.permute.xlu1 %3884 }
 0xaef   : > { %v3454_v35 = vpop.permute.xlu0 %3453 }
 0xaf0   : > { %v3459_v46 = vsel %vm1773_vm4, %v3454_v35, 0 }
 0xaf2   : > { %v6058_v36 = vpop.eup %6057 }
 0xaf3   : > { %v3251_v37 = vmul.f32 %v6058_v36, %v7605_v54  ;;  %v3553_v40 = vpop.permute.xlu0 %3552 }
 0xaf4   : > { %v3566_v44 = vsel %vm1421_vm3, %v3553_v40, 0 }
 0xaf5   : > { %v3257_v38 = vpack.c.bf16 %v3251_v37, %v3251_v37 }
 0xaf6   : > { %v6060_v42 = vpop.eup %6059 }
 0xaf7   : > { %v3555_v51 = vpop.permute.xlu0 %3554  ;;  %5674 = vmatmul.mubr.msk.bf16.vlgmr.msra.gmra.mrb[100].mxu1 %vm1421_vm3, %v3257_v38  ;;  %v3253_v26 = vmul.f32 %v6060_v42, %v7611_v28 }
 0xaf8   : > { %5684 = vmatpush3.bf16.msra.mxu1 %v3459_v46  ;;  %5685 = vmatprep.mubr.msk.bf16.mxu1 %vm6476_vm2, %v6475_v57  ;;  %v3569_v28 = vsel %vm1421_vm3, %v3555_v51, 0 }
 0xaf9   : > { %5695 = vmatprep.subr.bf16.mxu1 %v6475_v57  ;;  %v3259_v41 = vpack.c.bf16 %v3253_v26, %v3253_v26 }
 0xafb   : > { %v3687_v56 = vpop.permute.xlu0 %3686 }
 0xafc   : > { %v3692_v25 = vsel %vm1421_vm3, %v3687_v56, 0 }
 0xafd   : > { %5718 = vmatpush3.bf16.xpose.msra.mxu0 %v3692_v25 }
 0xafe   : > { %5723 = vmatprep.subr.bf16.mxu0 %v6475_v57 }
 0xaff   : > { %5686 = vmatmul.mubr.msk.bf16.vlgmr.msra.gmra.mrb[104].mxu1 %vm1421_vm3, %v3259_v41  ;;  %v3737_v55 = vpop.permute.xlu0 %3736 }
 0xb00   : > { %5699 = vmatprep.mubr.msk.bf16.mxu1 %vm6476_vm2, %v6475_v57  ;;  %v3742_v54 = vsel %vm1421_vm3, %v3737_v55, 0 }
 0xb01   : > { %5696 = vmatpush3.bf16.xpose.msra.mxu1 %v3566_v44 }
 0xb02   : > { %5697 = vmatprep.subr.bf16.mxu1 %v6475_v57 }
 0xb03   : > { %v3787_v7 = vpop.permute.xlu0 %3786 }
 0xb04   : > { %5720 = vmatmul.mubr.msk.bf16.vlgmr.msra.gmra.mrb[100].mxu0 %vm1421_vm3, %v3685_v59  ;;  %v3792_v11 = vsel %vm1421_vm3, %v3787_v7, 0 }
 0xb05   : > { %5724 = vmatpush3.bf16.xpose.msra.mxu0 %v3742_v54  ;;  %5725 = vmatprep.mubr.msk.bf16.mxu0 %vm6476_vm2, %v6475_v57 }
 0xb06   : > { %5729 = vmatprep.subr.bf16.mxu0 %v6475_v57 }
 0xb07   : > { %v3837_v45 = vpop.permute.xlu0 %3836 }
 0xb08   : > { %v3842_v14 = vsel %vm1421_vm3, %v3837_v45, 0 }
 0xb09   : > { %5698 = vmatpush3.bf16.xpose.msra.mxu1 %v3569_v28 }
 0xb0a   : > { %5735 = vmatprep.subr.bf16.mxu1 %v6475_v57 }
 0xb0b   : > { %v3835_v54 = vpop.permute.xlu0 %3834 }
 0xb0c   : > { %5726 = vmatmul.mubr.msk.bf16.vlgmr.msra.gmra.mrb[104].mxu0 %vm1421_vm3, %v3735_v0 }
 0xb0d   : > { %5730 = vmatpush3.bf16.xpose.msra.mxu0 %v3792_v11  ;;  %5731 = vmatprep.mubr.msk.bf16.mxu0 %vm6476_vm2, %v6475_v57 }
 0xb0e   : > { %5741 = vmatprep.subr.bf16.mxu0 %v6475_v57 }
 0xb14   : > { %5732 = vmatmul.mubr.msk.bf16.vlgmr.msra.gmra.mrb[108].mxu0 %vm1421_vm3, %v3785_v62 }
 0xb15   : > { %5742 = vmatpush3.bf16.xpose.msra.mxu0 %v3892_v39  ;;  %5743 = vmatprep.mubr.msk.bf16.mxu0 %vm6476_vm2, %v6475_v57 }
 0xb16   : > { %5753 = vmatprep.subr.bf16.mxu0 %v6475_v57 }
 0xb1c   : > { %5744 = vmatmul.mubr.msk.bf16.vlgmr.msra.gmra.mrb[112].mxu0 %vm1421_vm3, %v3885_v6 }
 0xb1d   : > { %5755 = vmatprep.mubr.msk.bf16.mxu0 %vm6476_vm2, %v6475_v57 }
 0xb95   : > { %v3303_v22 = vpop.f32.mrb[96].mxu1 }
 0xb96   : > { %v5663_v30 = vpop.f32.mrb[97].mxu1 }
 0xb97   : > { %v3306_v18 = vpop.f32.mrb[98].mxu1 }
 0xb98   : > { %v5664_v53 = vpop.f32.mrb[99].mxu1 }
 0xb9e   : > { %v3351_v60 = vpop.f32.mrb[84].mxu0 }
 0xb9f   : > { %v3549_v8 = vpack.c.bf16 %v3351_v60, %v3303_v22  ;;  %v5669_v15 = vpop.f32.mrb[85].mxu0 }
 0xba0   : > { %v3354_v27 = vpop.f32.mrb[86].mxu0 }
 0xba1   : > { %v5670_v23 = vpop.f32.mrb[87].mxu0  ;;  %5700 = vmatmul.mubr.msk.bf16.vlgmr.msra.gmra.mrb[108].mxu1 %vm1421_vm3, %v3549_v8 }
 0xba2   : > { %5736 = vmatpush3.bf16.xpose.msra.mxu1 %v3842_v14  ;;  %5703 = vmatprep.mubr.msk.bf16.mxu1 %vm6476_vm2, %v6475_v57 }
 0xba3   : > { %5747 = vmatprep.subr.bf16.mxu1 %v6475_v57 }
 0xba6   : > { %v3447_v1 = vpop.f32.mrb[88].mxu0 }
 0xba7   : > { %v5681_v20 = vpop.f32.mrb[89].mxu0 }
 0xba8   : > { %v3450_v49 = vpop.f32.mrb[90].mxu0 }
 0xba9   : > { %v5682_v5 = vpop.f32.mrb[91].mxu0 }
 0xbae   : > { %v3543_v10 = vpop.f32.mrb[92].mxu0 }
 0xbaf   : > { %v5693_v48 = vpop.f32.mrb[93].mxu0 }
 0xbb0   : > { %v3546_v58 = vpop.f32.mrb[94].mxu0 }
 0xbb1   : > { %v5694_v19 = vpop.f32.mrb[95].mxu0 }
 0xbb7   : > { %v3678_v33 = vpop.f32.mrb[96].mxu0 }
 0xbb8   : > { %v7713_v34 = vadd.f32 %v3678_v33, %v7201_v16  ;;  %v5715_v2 = vpop.f32.mrb[97].mxu0 }
 0xbb9   : > { %v3681_v43 = vpop.f32.mrb[98].mxu0 }
 0xbba   : > { %v5716_v31 = vpop.f32.mrb[99].mxu0  ;;  %v3934_v17 = vsel %vm1421_vm3, %v7713_v34, -inf }
 0xbbb   : > { %3935 = vmax.xlane.f32.xlu0 %v3934_v17 }
 0xbca   : > { %v3399_v21 = vpop.f32.mrb[100].mxu1 }
 0xbcb   : > { %v3550_v35 = vpack.c.bf16 %v3447_v1, %v3399_v21  ;;  %v5675_v36 = vpop.f32.mrb[101].mxu1 }
 0xbcc   : > { %v3402_v37 = vpop.f32.mrb[102].mxu1 }
 0xbcd   : > { %v5676_v40 = vpop.f32.mrb[103].mxu1  ;;  %5704 = vmatmul.mubr.msk.bf16.gmra.mrb[112].mxu1 %vm1421_vm3, %v3550_v35 }
 0xbce   : > { %5707 = vmatprep.mubr.msk.bf16.mxu1 %vm6476_vm2, %v6475_v57 }
 0xbd2   : > { %v3495_v38 = vpop.f32.mrb[104].mxu1 }
 0xbd3   : > { %v3551_v42 = vpack.c.bf16 %v3543_v10, %v3495_v38  ;;  %v5687_v46 = vpop.f32.mrb[105].mxu1 }
 0xbd4   : > { %v3498_v51 = vpop.f32.mrb[106].mxu1 }
 0xbd5   : > { %v5688_v26 = vpop.f32.mrb[107].mxu1  ;;  %5708 = vmatmul.mubr.msk.bf16.gmra.mrb[116].mxu1 %vm1421_vm3, %v3551_v42 }
 0xbd6   : > { %5737 = vmatprep.mubr.msk.bf16.mxu1 %vm6476_vm2, %v6475_v57 }
 0xbd7   : > { %v3728_v56 = vpop.f32.mrb[100].mxu0 }
 0xbd8   : > { %v3729_v25 = vadd.f32 %v3728_v56, %v7201_v16  ;;  %v5721_v41 = vpop.f32.mrb[101].mxu0 }
 0xbd9   : > { %v3731_v44 = vpop.f32.mrb[102].mxu0 }
 0xbda   : > { %v5722_v59 = vpop.f32.mrb[103].mxu0  ;;  %v3937_v55 = vsel %vm1421_vm3, %v3729_v25, -inf }
 0xbdb   : > { %3938 = vmax.xlane.f32.xlu1 %v3937_v55 }
 0xbdd   : > { %5738 = vmatmul.mubr.msk.bf16.vlgmr.msra.gmra.mrb[120].mxu1 %vm1421_vm3, %v3835_v54 }
 0xbde   : > { %5749 = vmatprep.mubr.msk.bf16.mxu1 %vm6476_vm2, %v6475_v57 }
 0xbdf   : > { %v3778_v0 = vpop.f32.mrb[104].mxu0 }
 0xbe0   : > { %v7729_v28 = vadd.f32 %v3778_v0, %v7201_v16  ;;  %v5727_v7 = vpop.f32.mrb[105].mxu0 }
 0xbe1   : > { %v3781_v62 = vpop.f32.mrb[106].mxu0 }
 0xbe2   : > { %v5728_v11 = vpop.f32.mrb[107].mxu0  ;;  %v3940_v32 = vsel %vm1421_vm3, %v7729_v28, -inf }
 0xbe3   : > { %3941 = vmax.xlane.f32.xlu0 %v3940_v32  ;;  %v6121_v11 = vld [vmem:[%s6956_s9 + $0x8] sm:$0xff]  }
 0xbe7   : > { %v3828_v39 = vpop.f32.mrb[108].mxu0 }
 0xbe8   : > { %v3829_v6 = vadd.f32 %v3828_v39, %v7201_v16  ;;  %v5733_v22 = vpop.f32.mrb[109].mxu0 }
 0xbe9   : > { %v3831_v30 = vpop.f32.mrb[110].mxu0 }
 0xbea   : > { %v5734_v18 = vpop.f32.mrb[111].mxu0  ;;  %v3943_v53 = vsel %vm1421_vm3, %v3829_v6, -inf }
 0xbeb   : > { %3944 = vmax.xlane.f32.xlu0 %v3943_v53 }
 0xbef   : > { %v3928_v45 = vpop.f32.mrb[112].mxu0 }
 0xbf0   : > { %v3929_v60 = vadd.f32 %v3928_v45, %v7201_v16  ;;  %v5745_v8 = vpop.f32.mrb[113].mxu0 }
 0xbf1   : > { %v3931_v15 = vpop.f32.mrb[114].mxu0 }
 0xbf2   : > { %v5746_v27 = vpop.f32.mrb[115].mxu0  ;;  %v3949_v14 = vsel %vm1421_vm3, %v3929_v60, -inf }
 0xbf3   : > { %3950 = vmax.xlane.f32.xlu1 %v3949_v14 }
 0xc48   : > { %v3936_v49 = vpop.xlane.xlu0 %3935 }
 0xc49   : > { %v3952_v56 = vsub.f32 %v7713_v34, %v3936_v49 }
 0xc4b   : > { %v3958_v59 = vmul.f32 1.442695, %v3952_v56  ;;  %v6122_v56 = vld [vmem:[%s6956_s9] sm:$0xff]   ;;  %s8108_s9 = scalar_lea.vmem [#allocation10], %s6897_s19 }
 0xc68   : > { %v3939_v23 = vpop.xlane.xlu1 %3938 }
 0xc69   : > { %v3953_v1 = vsub.f32 %v3729_v25, %v3939_v23 }
 0xc6b   : > { %v3960_v20 = vmul.f32 1.442695, %v3953_v1 }
 0xc6d   : > { %6061 = vpow2.f32 %v3960_v20 }
 0xc70   : > { %v3942_v5 = vpop.xlane.xlu0 %3941 }
 0xc71   : > { %v3954_v55 = vsub.f32 %v7729_v28, %v3942_v5 }
 0xc73   : > { %v3962_v0 = vmul.f32 1.442695, %v3954_v55 }
 0xc74   : > { %v3605_v10 = vpop.f32.mrb[108].mxu1 }
 0xc75   : > { %v7738_v48 = vadd.f32 %v3605_v10, %v7556_v52  ;;  %v5701_v58 = vpop.f32.mrb[109].mxu1 }
 0xc76   : > { %v3608_v19 = vpop.f32.mrb[110].mxu1 }
 0xc77   : > { %v7740_v33 = vpop.eup %6061  ;;  %v7743_v2 = vadd.f32 %v3608_v19, %v7559_v29  ;;  %v5702_v43 = vpop.f32.mrb[111].mxu1 }
 0xc78   : > { %v3945_v31 = vpop.xlane.xlu0 %3944  ;;  %v3973_v17 = vsel %vm1421_vm3, %v7740_v33, 0.0 }
 0xc79   : > { %v3955_v21 = vsub.f32 %v3829_v6, %v3945_v31  ;;  %3974 = vadd.xlane.f32.xlu1 %v3973_v17 }
 0xc7b   : > { %v3964_v35 = vmul.f32 1.442695, %v3955_v21 }
 0xc7d   : > { %6063 = vpow2.f32 %v3964_v35 }
 0xc80   : > { %v3951_v36 = vpop.xlane.xlu1 %3950 }
 0xc81   : > { %v3957_v37 = vsub.f32 %v3929_v60, %v3951_v36 }
 0xc83   : > { %v3968_v52 = vmul.f32 1.442695, %v3957_v37 }
 0xc85   : > { %6065 = vpow2.f32 %v3968_v52 }
 0xc86   : > { %6067 = vpow2.f32 %v3958_v59 }
 0xc87   : > { %v6064_v40 = vpop.eup %6063  ;;  %6069 = vpow2.f32 %v3962_v0 }
 0xc88   : > { %v3979_v38 = vsel %vm1421_vm3, %v6064_v40, 0.0 }
 0xc89   : > { %3980 = vadd.xlane.f32.xlu1 %v3979_v38 }
 0xc8f   : > { %v7748_v42 = vpop.eup %6065 }
 0xc90   : > { %v3985_v29 = vsel %vm1421_vm3, %v7748_v42, 0.0 }
 0xc91   : > { %3986 = vadd.xlane.f32.xlu1 %v3985_v29 }
 0xca0   : > { %v3613_v46 = vpop.f32.mrb[112].mxu1 }
 0xca1   : > { %v7753_v51 = vadd.f32 %v3613_v46, %v7566_v24  ;;  %v5705_v26 = vpop.f32.mrb[113].mxu1 }
 0xca2   : > { %v3616_v25 = vpop.f32.mrb[114].mxu1  ;;  %4054 = vrot.lane.b32.xlu1 %v7169_v63, %s6479_s5 }
 0xca3   : > { %v7759_v41 = vadd.f32 %v3616_v25, %v7569_v4  ;;  %v5706_v44 = vpop.f32.mrb[115].mxu1 }
 0xca6   : > { %4102 = vrot.lane.b32.xlu1 %v7253_v47, %s6479_s5 }
 0xca8   : > { %v3621_v24 = vpop.f32.mrb[116].mxu1 }
 0xca9   : > { %v7765_v54 = vadd.f32 %v3621_v24, %v7572_v9  ;;  %v5709_v34 = vpop.f32.mrb[117].mxu1 }
 0xcaa   : > { %v3624_v7 = vpop.f32.mrb[118].mxu1  ;;  %4150 = vrot.lane.b32.xlu1 %v7263_v61, %s6479_s5  ;;  %v6068_v61 = vpop.eup %6067 }
 0xcab   : > { %v7770_v63 = vadd.f32 %v3624_v7, %v7575_v50  ;;  %v5710_v4 = vpop.f32.mrb[119].mxu1  ;;  %v3970_v50 = vsel %vm1421_vm3, %v6068_v61, 0.0  ;;  %v6070_v6 = vpop.eup %6069 }
 0xcac   : > { %v3976_v22 = vsel %vm1421_vm3, %v6070_v6, 0.0 }
 0xcae   : > { %4246 = vrot.lane.b32.xlu1 %v7277_v13, %s6479_s5 }
 0xcb0   : > { %v3878_v47 = vpop.f32.mrb[120].mxu1 }
 0xcb1   : > { %v3879_v28 = vadd.f32 %v3878_v47, %v7201_v16  ;;  %v5739_v9 = vpop.f32.mrb[121].mxu1 }
 0xcb2   : > { %v3881_v62 = vpop.f32.mrb[122].mxu1  ;;  %4299 = vrot.lane.b32.xlu1 %v6121_v11, %s6479_s5 }
 0xcb3   : > { %v5740_v32 = vpop.f32.mrb[123].mxu1  ;;  %v3946_v39 = vsel %vm1421_vm3, %v3879_v28, -inf }
 0xcb4   : > { %3947 = vmax.xlane.f32.xlu0 %v3946_v39 }
 0xcb8   : > { %3971 = vadd.xlane.f32.xlu0 %v3970_v50 }
 0xcbc   : > { %3977 = vadd.xlane.f32.xlu0 %v3976_v22 }
 0xcd2   : > { %4006 = vrot.lane.b32.xlu0 %v7184_v3, %s6479_s5 }
 0xd06   : > { %v3975_v16 = vpop.xlane.xlu1 %3974 }
 0xd07   : > { %6071 = vrcp.f32 %v3975_v16 }
 0xd11   : > { %v6072_v30 = vpop.eup %6071 }
 0xd12   : > { %v3995_v53 = vmul.f32 %v6072_v30, %v7740_v33 }
 0xd14   : > { %v4001_v8 = vpack.c.bf16 %v3995_v53, %v3995_v53 }
 0xd16   : > { %v3981_v13 = vpop.xlane.xlu1 %3980 }
 0xd17   : > { %6073 = vrcp.f32 %v3981_v13 }
 0xd1e   : > { %v3987_v18 = vpop.xlane.xlu1 %3986 }
 0xd1f   : > { %6075 = vrcp.f32 %v3987_v18 }
 0xd21   : > { %v6074_v15 = vpop.eup %6073 }
 0xd22   : > { %v4055_v45 = vpop.permute.xlu1 %4054  ;;  %v3997_v3 = vmul.f32 %v6074_v15, %v6064_v40 }
 0xd23   : > { %v4060_v60 = vsel %vm1773_vm4, %v4055_v45, 0 }
 0xd24   : > { %5754 = vmatpush3.bf16.msra.mxu0 %v4060_v60  ;;  %v4003_v1 = vpack.c.bf16 %v3997_v3, %v3997_v3 }
 0xd25   : > { %5765 = vmatprep.subr.bf16.mxu0 %v6475_v57 }
 0xd26   : > { %v4103_v27 = vpop.permute.xlu1 %4102 }
 0xd27   : > { %5756 = vmatmul.mubr.msk.bf16.vlgmr.msra.gmra.mrb[116].mxu0 %vm1421_vm3, %v4001_v8  ;;  %v4108_v29 = vsel %vm1773_vm4, %v4103_v27, 0 }
 0xd28   : > { %5767 = vmatprep.mubr.msk.bf16.mxu0 %vm6476_vm2, %v6475_v57 }
 0xd29   : > { %v6076_v20 = vpop.eup %6075 }
 0xd2a   : > { %v4151_v14 = vpop.permute.xlu1 %4150  ;;  %v3999_v10 = vmul.f32 %v6076_v20, %v7748_v42 }
 0xd2b   : > { %v4156_v23 = vsel %vm1773_vm4, %v4151_v14, 0 }
 0xd2c   : > { %5766 = vmatpush3.bf16.msra.mxu0 %v4156_v23  ;;  %v4005_v58 = vpack.c.bf16 %v3999_v10, %v3999_v10  ;;  %v7834_v10 = vld [vmem:[%s8108_s9] ss:$0 sm:$0xff] }
 0xd2d   : > { %5777 = vmatprep.subr.bf16.mxu0 %v6475_v57 }
 0xd2e   : > { %v4247_v49 = vpop.permute.xlu1 %4246 }
 0xd2f   : > { %v4252_v5 = vsel %vm1773_vm4, %v4247_v49, 0  ;;  %5768 = vmatmul.mubr.msk.bf16.vlgmr.msra.gmra.mrb[120].mxu0 %vm1421_vm3, %v4003_v1 }
 0xd30   : > { %5778 = vmatpush3.bf16.msra.mxu0 %v4252_v5  ;;  %5779 = vmatprep.mubr.msk.bf16.mxu0 %vm6476_vm2, %v6475_v57 }
 0xd31   : > { %5799 = vmatprep.subr.bf16.mxu0 %v6475_v57 }
 0xd37   : > { %5780 = vmatmul.mubr.msk.bf16.vlgmr.msra.gmra.mrb[124].mxu0 %vm1421_vm3, %v4005_v58 }
 0xd38   : > { %5815 = vmatprep.mubr.msk.bf16.mxu0 %vm6476_vm2, %v6475_v57 }
 0xd41   : > { %v3948_v19 = vpop.xlane.xlu0 %3947 }
 0xd42   : > { %v3956_v33 = vsub.f32 %v3879_v28, %v3948_v19 }
 0xd44   : > { %v3966_v43 = vmul.f32 1.442695, %v3956_v33 }
 0xd45   : > { %v3972_v31 = vpop.xlane.xlu0 %3971 }
 0xd46   : > { %6077 = vpow2.f32 %v3966_v43 }
 0xd47   : > { %6079 = vrcp.f32 %v3972_v31 }
 0xd49   : > { %v3978_v17 = vpop.xlane.xlu0 %3977 }
 0xd4a   : > { %6081 = vrcp.f32 %v3978_v17 }
 0xd4d   : > { %v4007_v21 = vpop.permute.xlu0 %4006 }
 0xd4e   : > { %v4012_v35 = vsel %vm1773_vm4, %v4007_v21, 0  ;;  %v6123_v21 = vld [vmem:[#allocation16] sm:$0xff] }
 0xd4f   : > { %5748 = vmatpush3.bf16.msra.mxu1 %v4012_v35 }
 0xd50   : > { %v6078_v36 = vpop.eup %6077  ;;  %5759 = vmatprep.subr.bf16.mxu1 %v6475_v57 }
 0xd51   : > { %v6080_v37 = vpop.eup %6079  ;;  %v3982_v52 = vsel %vm1421_vm3, %v6078_v36, 0.0 }
 0xd52   : > { %v3994_v40 = vmul.f32 %v6080_v37, %v6068_v61  ;;  %3983 = vadd.xlane.f32.xlu0 %v3982_v52  ;;  %v6124_v37 = vld [vmem:[#allocation16 + $0x8] sm:$0xff] }
 0xd54   : > { %v4000_v38 = vpack.c.bf16 %v3994_v40, %v3994_v40  ;;  %v6082_v42 = vpop.eup %6081 }
 0xd55   : > { %v3996_v46 = vmul.f32 %v6082_v42, %v6070_v6 }
 0xd56   : > { %5750 = vmatmul.mubr.msk.bf16.vlgmr.msra.gmra.mrb[124].mxu1 %vm1421_vm3, %v4000_v38 }
 0xd57   : > { %5760 = vmatpush3.bf16.msra.mxu1 %v4108_v29  ;;  %5761 = vmatprep.mubr.msk.bf16.mxu1 %vm6476_vm2, %v6475_v57  ;;  %v4002_v26 = vpack.c.bf16 %v3996_v46, %v3996_v46 }
 0xd58   : > { %5771 = vmatprep.subr.bf16.mxu1 %v6475_v57 }
 0xd5e   : > { %5762 = vmatmul.mubr.msk.bf16.vlgmr.msra.gmra.mrb[128].mxu1 %vm1421_vm3, %v4002_v26 }
 0xd5f   : > { %5773 = vmatprep.mubr.msk.bf16.mxu1 %vm6476_vm2, %v6475_v57 }
 0xd68   : > { %4198 = vrot.lane.b32.xlu0 %v7273_v12, %s6479_s5  ;;  %v4300_v12 = vpop.permute.xlu1 %4299 }
 0xd69   : > { %v4314_v4 = vsel %vm1421_vm3, %v4300_v12, 0 }
 0xd6c   : > { %4297 = vrot.lane.b32.xlu0 %v6122_v56, %s6479_s5 }
 0xddf   : > { %v3984_v25 = vpop.xlane.xlu0 %3983 }
 0xde0   : > { %6083 = vrcp.f32 %v3984_v25  ;;  %v6125_v25 = vld [vmem:[#allocation16 + $0x10] sm:$0xff] }
 0xde3   : > { %v4199_v44 = vpop.permute.xlu0 %4198 }
 0xde4   : > { %v4204_v59 = vsel %vm1773_vm4, %v4199_v44, 0 }
 0xde5   : > { %5772 = vmatpush3.bf16.msra.mxu1 %v4204_v59 }
 0xde6   : > { %5783 = vmatprep.subr.bf16.mxu1 %v6475_v57 }
 0xde7   : > { %v4298_v24 = vpop.permute.xlu0 %4297 }
 0xde8   : > { %v4311_v7 = vsel %vm1421_vm3, %v4298_v24, 0 }
 0xdea   : > { %v6084_v55 = vpop.eup %6083 }
 0xdeb   : > { %v3998_v34 = vmul.f32 %v6084_v55, %v6078_v36 }
 0xded   : > { %v4004_v0 = vpack.c.bf16 %v3998_v34, %v3998_v34 }
 0xdef   : > { %5774 = vmatmul.mubr.msk.bf16.vlgmr.msra.gmra.mrb[132].mxu1 %vm1421_vm3, %v4004_v0 }
 0xdf0   : > { %5784 = vmatpush3.bf16.xpose.msra.mxu1 %v4311_v7  ;;  %5787 = vmatprep.mubr.msk.bf16.mxu1 %vm6476_vm2, %v6475_v57  ;;  %v5968_v7 = vld [vmem:[%s6962_s26 + $0x8] sm:$0xff]  }
 0xdf1   : > { %5785 = vmatprep.subr.bf16.mxu1 %v6475_v57  ;;  %v4581_v12 = vsel %vm1019_vm1, %v5968_v7, 0 }
 0xdf8   : > { %5786 = vmatpush3.bf16.xpose.msra.mxu1 %v4314_v4  ;;  %v5969_v4 = vld [vmem:[%s6962_s26 + $0x10] sm:$0xff]  }
 0xdf9   : > { %5827 = vmatprep.subr.bf16.mxu1 %v6475_v57 }
 0xdfa   : > { %v4096_v47 = vpop.f32.mrb[116].mxu0 }
 0xdfb   : > { %v5757_v28 = vpop.f32.mrb[117].mxu0 }
 0xdfc   : > { %v4099_v9 = vpop.f32.mrb[118].mxu0  ;;  %v5970_v28 = vld [vmem:[%s6962_s26 + $0x18] sm:$0xff]  }
 0xdfd   : > { %v5758_v62 = vpop.f32.mrb[119].mxu0  ;;  %v4587_v9 = vsel %vm1019_vm1, %v5970_v28, 0 }
 0xdfe   : > { %v5971_v62 = vld [vmem:[%s6962_s26 + $0x20] sm:$0xff]  }
 0xe02   : > { %v4192_v11 = vpop.f32.mrb[120].mxu0 }
 0xe03   : > { %v5769_v32 = vpop.f32.mrb[121].mxu0 }
 0xe04   : > { %v4195_v39 = vpop.f32.mrb[122].mxu0 }
 0xe05   : > { %v5770_v61 = vpop.f32.mrb[123].mxu0 }
 0xe0a   : > { %v4288_v50 = vpop.f32.mrb[124].mxu0 }
 0xe0b   : > { %v5781_v6 = vpop.f32.mrb[125].mxu0 }
 0xe0c   : > { %v4291_v22 = vpop.f32.mrb[126].mxu0 }
 0xe0d   : > { %v5782_v16 = vpop.f32.mrb[127].mxu0 }
 0xe29   : > { %v4048_v13 = vpop.f32.mrb[124].mxu1 }
 0xe2a   : > { %v4294_v30 = vpack.c.bf16 %v4096_v47, %v4048_v13  ;;  %v5751_v18 = vpop.f32.mrb[125].mxu1  ;;  %v4584_v47 = vsel %vm1019_vm1, %v5969_v4, 0 }
 0xe2b   : > { %v4051_v53 = vpop.f32.mrb[126].mxu1 }
 0xe2c   : > { %v5752_v45 = vpop.f32.mrb[127].mxu1  ;;  %5788 = vmatmul.mubr.msk.bf16.vlgmr.msra.gmra.mrb[136].mxu1 %vm1421_vm3, %v4294_v30 }
 0xe2d   : > { %5791 = vmatprep.mubr.msk.bf16.mxu1 %vm6476_vm2, %v6475_v57 }
 0xe31   : > { %v4144_v60 = vpop.f32.mrb[128].mxu1 }
 0xe32   : > { %v4295_v8 = vpack.c.bf16 %v4192_v11, %v4144_v60  ;;  %v5763_v15 = vpop.f32.mrb[129].mxu1  ;;  %v4590_v11 = vsel %vm1019_vm1, %v5971_v62, 0 }
 0xe33   : > { %v4147_v27 = vpop.f32.mrb[130].mxu1  ;;  %v6127_v15 = vld [vmem:[#allocation16 + $0x20] sm:$0xff] }
 0xe34   : > { %v5764_v3 = vpop.f32.mrb[131].mxu1  ;;  %5792 = vmatmul.mubr.msk.bf16.gmra.mrb[140].mxu1 %vm1421_vm3, %v4295_v8 }
 0xe35   : > { %5795 = vmatprep.mubr.msk.bf16.mxu1 %vm6476_vm2, %v6475_v57 }
 0xec2   : > { %v4240_v14 = vpop.f32.mrb[132].mxu1 }
 0xec3   : > { %v4296_v23 = vpack.c.bf16 %v4288_v50, %v4240_v14  ;;  %v5775_v1 = vpop.f32.mrb[133].mxu1  ;;  %v6128_v14 = vld [vmem:[#allocation16 + $0x28] sm:$0xff] }
 0xec4   : > { %v4243_v20 = vpop.f32.mrb[134].mxu1 }
 0xec5   : > { %v5776_v49 = vpop.f32.mrb[135].mxu1  ;;  %5796 = vmatmul.mubr.msk.bf16.gmra.mrb[144].mxu1 %vm1421_vm3, %v4296_v23 }
 0xec6   : > { %5831 = vmatprep.mubr.msk.bf16.mxu1 %vm6476_vm2, %v6475_v57 }
 0xeff   : > { %v4350_v5 = vpop.f32.mrb[136].mxu1 }
 0xf00   : > { %v4373_v58 = vadd.f32 %v4350_v5, %v7738_v48  ;;  %v5789_v19 = vpop.f32.mrb[137].mxu1 }
 0xf01   : > { %v4353_v33 = vpop.f32.mrb[138].mxu1 }
 0xf02   : > { %v4386_v43 = vadd.f32 %v7834_v10, %v4373_v58  ;;  %v4374_v31 = vadd.f32 %v4353_v33, %v7743_v2  ;;  %v5790_v17 = vpop.f32.mrb[139].mxu1 }
 0xf04   : > { %v7839_v35 = vadd.f32 %v6123_v21, %v4386_v43  ;;  %v4387_v36 = vadd.f32 %v7834_v10, %v4374_v31 }
 0xf06   : > { %v7842_v52 = vadd.f32 %v6124_v37, %v4387_v36  ;;  %v4400_v40 = vsel %vm1019_vm1, %v7839_v35, 0.0  ;;  %v5972_v37 = vld [vmem:[%s6962_s26 + $0x28] sm:$0xff]  }
 0xf07   : > { %4401 = vadd.xlane.f32.xlu0 %v4400_v40  ;;  %v4358_v48 = vpop.f32.mrb[140].mxu1  ;;  %v4593_v40 = vsel %vm1019_vm1, %v5972_v37, 0 }
 0xf08   : > { %v4375_v38 = vadd.f32 %v4358_v48, %v7753_v51  ;;  %v5793_v42 = vpop.f32.mrb[141].mxu1  ;;  %v4403_v2 = vsel %vm1019_vm1, %v7842_v52, 0.0  ;;  %v6126_v51 = vld [vmem:[#allocation16 + $0x18] sm:$0xff] }
 0xf09   : > { %4404 = vadd.xlane.f32.xlu1 %v4403_v2  ;;  %v4361_v29 = vpop.f32.mrb[142].mxu1  ;;  %v5973_v48 = vld [vmem:[%s6962_s26 + $0x30] sm:$0xff]   ;;  %v5974_v42 = vld [vmem:[%s6962_s26 + $0x38] sm:$0xff]  }
 0xf0a   : > { %v4388_v46 = vadd.f32 %v7834_v10, %v4375_v38  ;;  %v4376_v26 = vadd.f32 %v4361_v29, %v7759_v41  ;;  %v5794_v56 = vpop.f32.mrb[143].mxu1  ;;  %v5967_v41 = vld [vmem:[%s6962_s26] sm:$0xff]   ;;  %v4596_v38 = vsel %vm1019_vm1, %v5973_v48, 0  ;;  %v4599_v2 = vsel %vm1019_vm1, %v5974_v42, 0  ;;  %s8109_s26 = scalar_lea.vmem [#allocation11], %s6897_s19 }
 0xf0b   : > { %v4578_v0 = vsel %vm1019_vm1, %v5967_v41, 0 }
 0xf0c   : > { %v7851_v44 = vadd.f32 %v6125_v25, %v4388_v46  ;;  %v4389_v59 = vadd.f32 %v7834_v10, %v4376_v26  ;;  %5800 = vmatpush3.bf16.xpose.msra.mxu0 %v4578_v0 }
 0xf0d   : > { %5801 = vmatprep.subr.bf16.mxu0 %v6475_v57 }
 0xf0e   : > { %v7854_v55 = vadd.f32 %v6126_v51, %v4389_v59  ;;  %v4406_v24 = vsel %vm1019_vm1, %v7851_v44, 0.0 }
 0xf0f   : > { %4407 = vadd.xlane.f32.xlu0 %v4406_v24 }
 0xf10   : > { %v4409_v34 = vsel %vm1019_vm1, %v7854_v55, 0.0 }
 0xf13   : > { %4410 = vadd.xlane.f32.xlu0 %v4409_v34 }
 0xf14   : > { %5802 = vmatpush3.bf16.xpose.msra.mxu0 %v4581_v12 }
 0xf15   : > { %5803 = vmatprep.subr.bf16.mxu0 %v6475_v57 }
 0xf1c   : > { %5804 = vmatpush3.bf16.xpose.msra.mxu0 %v4584_v47 }
 0xf1d   : > { %5805 = vmatprep.subr.bf16.mxu0 %v6475_v57 }
 0xf24   : > { %5806 = vmatpush3.bf16.xpose.msra.mxu0 %v4587_v9 }
 0xf25   : > { %5807 = vmatprep.subr.bf16.mxu0 %v6475_v57 }
 0xf2c   : > { %5808 = vmatpush3.bf16.xpose.msra.mxu0 %v4590_v11 }
 0xf2d   : > { %5809 = vmatprep.subr.bf16.mxu0 %v6475_v57 }
 0xf34   : > { %5810 = vmatpush3.bf16.xpose.msra.mxu0 %v4593_v40 }
 0xf35   : > { %5811 = vmatprep.subr.bf16.mxu0 %v6475_v57 }
 0xf3c   : > { %5812 = vmatpush3.bf16.xpose.msra.mxu0 %v4596_v38 }
 0xf3d   : > { %5813 = vmatprep.subr.bf16.mxu0 %v6475_v57 }
 0xf44   : > { %5814 = vmatpush3.bf16.xpose.msra.mxu0 %v4599_v2 }
 0xf94   : > { %v4402_v32 = vpop.xlane.xlu0 %4401 }
 0xf95   : > { %v4418_v61 = vmul.f32 0.03125, %v4402_v32 }
 0xf96   : > { %v4405_v39 = vpop.xlane.xlu1 %4404 }
 0xf97   : > { %v4419_v6 = vmul.f32 0.03125, %v4405_v39  ;;  %v7877_v30 = vsub.f32 %v7839_v35, %v4418_v61 }
 0xf98   : > { %v4366_v50 = vpop.f32.mrb[144].mxu1 }
 0xf99   : > { %v4377_v22 = vadd.f32 %v4366_v50, %v7765_v54  ;;  %v5797_v16 = vpop.f32.mrb[145].mxu1  ;;  %v7882_v8 = vsub.f32 %v7842_v52, %v4419_v6  ;;  %v4430_v20 = vmul.f32 %v7877_v30, %v7877_v30  ;;  %v5219_v6 = vld [vmem:[%s8109_s26] ss:$0 sm:$0xff] }
 0xf9a   : > { %v4369_v13 = vpop.f32.mrb[146].mxu1 }
 0xf9b   : > { %v4390_v18 = vadd.f32 %v7834_v10, %v4377_v22  ;;  %v4378_v53 = vadd.f32 %v4369_v13, %v7770_v63  ;;  %v5798_v45 = vpop.f32.mrb[147].mxu1  ;;  %v4431_v58 = vmul.f32 %v7882_v8, %v7882_v8  ;;  %v4436_v33 = vsel %vm1019_vm1, %v4430_v20, 0.0 }
 0xf9c   : > { %v4408_v60 = vpop.xlane.xlu0 %4407  ;;  %v5220_v45 = vld [vmem:[%s8110_s30] ss:$0 sm:$0xff] }
 0xf9d   : > { %v7884_v27 = vadd.f32 %v6127_v15, %v4390_v18  ;;  %v4391_v3 = vadd.f32 %v7834_v10, %v4378_v53  ;;  %v4420_v54 = vmul.f32 0.03125, %v4408_v60  ;;  %v4439_v31 = vsel %vm1019_vm1, %v4431_v58, 0.0  ;;  %v5976_v58 = vld [vmem:[%s6919_s27 + $0x8] sm:$0xff]  }
 0xf9f   : > { %v7887_v23 = vadd.f32 %v6128_v14, %v4391_v3  ;;  %v7890_v1 = vsub.f32 %v7851_v44, %v4420_v54  ;;  %v4412_v63 = vsel %vm1019_vm1, %v7884_v27, 0.0 }
 0xfa0   : > { %v4411_v49 = vpop.xlane.xlu0 %4410  ;;  %4413 = vadd.xlane.f32.xlu0 %v4412_v63 }
 0xfa1   : > { %v4421_v5 = vmul.f32 0.03125, %v4411_v49  ;;  %v4415_v10 = vsel %vm1019_vm1, %v7887_v23, 0.0  ;;  %v4432_v43 = vmul.f32 %v7890_v1, %v7890_v1 }
 0xfa2   : > { %4416 = vadd.xlane.f32.xlu1 %v4415_v10 }
 0xfa3   : > { %v4427_v19 = vsub.f32 %v7854_v55, %v4421_v5  ;;  %v4442_v21 = vsel %vm1019_vm1, %v4432_v43, 0.0 }
 0xfa4   : > { %4437 = vadd.xlane.f32.xlu0 %v4436_v33 }
 0xfa5   : > { %v4433_v17 = vmul.f32 %v4427_v19, %v4427_v19 }
 0xfa6   : > { %4440 = vadd.xlane.f32.xlu1 %v4439_v31 }
 0xfa7   : > { %v4445_v36 = vsel %vm1019_vm1, %v4433_v17, 0.0 }
 0xfa8   : > { %4443 = vadd.xlane.f32.xlu0 %v4442_v21 }
 0xfaa   : > { %4446 = vadd.xlane.f32.xlu1 %v4445_v36 }
0x102d   : > { %v4414_v29 = vpop.xlane.xlu0 %4413 }
0x102e   : > { %v4422_v46 = vmul.f32 0.03125, %v4414_v29 }
0x102f   : > { %v4417_v26 = vpop.xlane.xlu1 %4416 }
0x1030   : > { %v7916_v56 = vsub.f32 %v7884_v27, %v4422_v46  ;;  %v4423_v25 = vmul.f32 0.03125, %v4417_v26  ;;  %v5221_v26 = vld [vmem:[%s981_s23] ss:$0 sm:$0xff] }
0x1031   : > { %v4438_v59 = vpop.xlane.xlu0 %4437 }
0x1032   : > { %v4429_v51 = vsub.f32 %v7887_v23, %v4423_v25  ;;  %v4454_v24 = vmul.f32 0.03125, %v4438_v59  ;;  %v4434_v34 = vmul.f32 %v7916_v56, %v7916_v56 }
0x1033   : > { %v4441_v41 = vpop.xlane.xlu1 %4440 }
0x1034   : > { %v4460_v0 = vadd.f32 1e-05, %v4454_v24  ;;  %v4455_v7 = vmul.f32 0.03125, %v4441_v41  ;;  %v4448_v12 = vsel %vm1019_vm1, %v4434_v34, 0.0  ;;  %v4435_v4 = vmul.f32 %v4429_v51, %v4429_v51 }
0x1035   : > { %4449 = vadd.xlane.f32.xlu0 %v4448_v12  ;;  %v4444_v47 = vpop.xlane.xlu0 %4443 }
0x1036   : > { %6085 = vrsqrt.f32 %v4460_v0  ;;  %v4461_v28 = vadd.f32 1e-05, %v4455_v7  ;;  %v4456_v9 = vmul.f32 0.03125, %v4444_v47  ;;  %v4451_v62 = vsel %vm1019_vm1, %v4435_v4, 0.0 }
0x1037   : > { %4452 = vadd.xlane.f32.xlu1 %v4451_v62  ;;  %v4447_v11 = vpop.xlane.xlu1 %4446 }
0x1038   : > { %6087 = vrsqrt.f32 %v4461_v28  ;;  %v4462_v32 = vadd.f32 1e-05, %v4456_v9  ;;  %v4457_v39 = vmul.f32 0.03125, %v4447_v11 }
0x103a   : > { %6089 = vrsqrt.f32 %v4462_v32  ;;  %v4463_v61 = vadd.f32 1e-05, %v4457_v39 }
0x103c   : > { %6091 = vrsqrt.f32 %v4463_v61 }
0x1040   : > { %v6086_v50 = vpop.eup %6085 }
0x1041   : > { %v4472_v22 = vmul.f32 %v6086_v50, %v7877_v30 }
0x1042   : > { %v6088_v16 = vpop.eup %6087 }
0x1043   : > { %v4484_v13 = vmul.f32 %v5219_v6, %v4472_v22  ;;  %v4473_v18 = vmul.f32 %v6088_v16, %v7882_v8 }
0x1044   : > { %v6090_v53 = vpop.eup %6089 }
0x1045   : > { %v4485_v60 = vmul.f32 %v5219_v6, %v4473_v18  ;;  %v4474_v3 = vmul.f32 %v6090_v53, %v7890_v1  ;;  %v4496_v14 = vadd.f32 %v5220_v45, %v4484_v13  ;;  %v5975_v1 = vld [vmem:[%s6919_s27] sm:$0xff]  }
0x1046   : > { %v6092_v15 = vpop.eup %6091  ;;  %5828 = vmatpush3.bf16.xpose.msra.mxu1 %v5975_v1 }
0x1047   : > { %v4475_v54 = vmul.f32 %v6092_v15, %v4427_v19  ;;  %v4497_v63 = vadd.f32 %v5220_v45, %v4485_v60  ;;  %v4486_v30 = vmul.f32 %v5219_v6, %v4474_v3  ;;  %5829 = vmatprep.subr.bf16.mxu1 %v6475_v57 }
0x1049   : > { %v4502_v20 = vpack.c.bf16 %v4497_v63, %v4496_v14  ;;  %v4487_v49 = vmul.f32 %v5219_v6, %v4475_v54  ;;  %v4498_v5 = vadd.f32 %v5220_v45, %v4486_v30 }
0x104b   : > { %5816 = vmatmul.mubr.msk.bf16.vlgmr.msra.gmra.mrb[128].mxu0 %vm1019_vm1, %v4502_v20  ;;  %v4499_v8 = vadd.f32 %v5220_v45, %v4487_v49 }
0x104c   : > { %5819 = vmatprep.mubr.msk.bf16.mxu0 %vm6476_vm2, %v6475_v57 }
0x104d   : > { %v4503_v10 = vpack.c.bf16 %v4499_v8, %v4498_v5 }
0x104e   : > { %5830 = vmatpush3.bf16.xpose.msra.mxu1 %v5976_v58 }
0x1053   : > { %5820 = vmatmul.mubr.msk.bf16.gmra.mrb[132].mxu0 %vm1019_vm1, %v4503_v10 }
0x1054   : > { %5823 = vmatprep.mubr.msk.bf16.mxu0 %vm6476_vm2, %v6475_v57 }
0x10c2   : > { %v4450_v19 = vpop.xlane.xlu0 %4449 }
0x10c3   : > { %v4458_v33 = vmul.f32 0.03125, %v4450_v19 }
0x10c4   : > { %v4453_v43 = vpop.xlane.xlu1 %4452 }
0x10c5   : > { %v4464_v31 = vadd.f32 1e-05, %v4458_v33  ;;  %v4459_v17 = vmul.f32 0.03125, %v4453_v43 }
0x10c7   : > { %6093 = vrsqrt.f32 %v4464_v31  ;;  %v4465_v21 = vadd.f32 1e-05, %v4459_v17 }
0x10c9   : > { %6095 = vrsqrt.f32 %v4465_v21 }
0x10d1   : > { %v6094_v36 = vpop.eup %6093 }
0x10d2   : > { %v4476_v37 = vmul.f32 %v6094_v36, %v7916_v56 }
0x10d3   : > { %v6096_v40 = vpop.eup %6095 }
0x10d4   : > { %v4477_v48 = vmul.f32 %v6096_v40, %v4429_v51  ;;  %v4488_v38 = vmul.f32 %v5219_v6, %v4476_v37 }
0x10d6   : > { %v4489_v42 = vmul.f32 %v5219_v6, %v4477_v48  ;;  %v4500_v2 = vadd.f32 %v5220_v45, %v4488_v38 }
0x10d8   : > { %v4501_v29 = vadd.f32 %v5220_v45, %v4489_v42 }
0x10da   : > { %v4504_v46 = vpack.c.bf16 %v4501_v29, %v4500_v2 }
0x10dc   : > { %5824 = vmatmul.mubr.msk.bf16.gmra.mrb[136].mxu0 %vm1019_vm1, %v4504_v46 }
0x111e   : > { %v4635_v25 = vpop.f32.mrb[128].mxu0 }
0x111f   : > { %v4636_v59 = vadd.f32 %v5221_v26, %v4635_v25  ;;  %v5817_v24 = vpop.f32.mrb[129].mxu0 }
0x1120   : > { %v4638_v34 = vpop.f32.mrb[130].mxu0 }
0x1121   : > { %v5233_v41 = vmul.f32 -1.702, %v4636_v59  ;;  %v4639_v56 = vadd.f32 %v5221_v26, %v4638_v34  ;;  %v5818_v0 = vpop.f32.mrb[131].mxu0 }
0x1123   : > { %v4670_v51 = vmul.f32 1.442695, %v5233_v41  ;;  %v5234_v7 = vmul.f32 -1.702, %v4639_v56 }
0x1125   : > { %6097 = vpow2.f32 %v4670_v51  ;;  %v4672_v12 = vmul.f32 1.442695, %v5234_v7 }
0x1126   : > { %v4643_v4 = vpop.f32.mrb[132].mxu0 }
0x1127   : > { %6099 = vpow2.f32 %v4672_v12  ;;  %v4644_v47 = vadd.f32 %v5221_v26, %v4643_v4  ;;  %v5821_v28 = vpop.f32.mrb[133].mxu0 }
0x1128   : > { %v4646_v9 = vpop.f32.mrb[134].mxu0 }
0x1129   : > { %v5235_v62 = vmul.f32 -1.702, %v4644_v47  ;;  %v4647_v11 = vadd.f32 %v5221_v26, %v4646_v9  ;;  %v5822_v32 = vpop.f32.mrb[135].mxu0 }
0x112b   : > { %v4674_v39 = vmul.f32 1.442695, %v5235_v62  ;;  %v5236_v61 = vmul.f32 -1.702, %v4647_v11 }
0x112d   : > { %6101 = vpow2.f32 %v4674_v39  ;;  %v4676_v50 = vmul.f32 1.442695, %v5236_v61 }
0x112f   : > { %v6098_v6 = vpop.eup %6097  ;;  %6103 = vpow2.f32 %v4676_v50 }
0x1130   : > { %v4682_v22 = vadd.f32 1.0, %v6098_v6 }
0x1131   : > { %v6100_v16 = vpop.eup %6099 }
0x1132   : > { %6105 = vrcp.f32 %v4682_v22  ;;  %v4683_v13 = vadd.f32 1.0, %v6100_v16 }
0x1134   : > { %6107 = vrcp.f32 %v4683_v13 }
0x1137   : > { %v6102_v18 = vpop.eup %6101 }
0x1138   : > { %v4684_v53 = vadd.f32 1.0, %v6102_v18 }
0x1139   : > { %v6104_v45 = vpop.eup %6103 }
0x113a   : > { %6109 = vrcp.f32 %v4684_v53  ;;  %v4685_v60 = vadd.f32 1.0, %v6104_v45 }
0x113c   : > { %v6106_v15 = vpop.eup %6105  ;;  %6111 = vrcp.f32 %v4685_v60 }
0x113d   : > { %v4700_v54 = vmul.f32 %v6106_v15, %v4636_v59 }
0x113e   : > { %v6108_v3 = vpop.eup %6107 }
0x113f   : > { %v4701_v14 = vmul.f32 %v6108_v3, %v4639_v56 }
0x1141   : > { %v4706_v63 = vpack.c.bf16 %v4701_v14, %v4700_v54 }
0x1143   : > { %5832 = vmatmul.mubr.bf16.vlgmr.msra.gmra.mrb[148].mxu1 %v4706_v63 }
0x1144   : > { %v6110_v20 = vpop.eup %6109  ;;  %5835 = vmatprep.mubr.msk.bf16.mxu1 %vm6476_vm2, %v6475_v57 }
0x1145   : > { %v4702_v30 = vmul.f32 %v6110_v20, %v4644_v47 }
0x1146   : > { %v6112_v49 = vpop.eup %6111 }
0x1147   : > { %v4703_v8 = vmul.f32 %v6112_v49, %v4647_v11 }
0x1149   : > { %v4707_v5 = vpack.c.bf16 %v4703_v8, %v4702_v30 }
0x114b   : > { %5836 = vmatmul.mubr.bf16.gmra.mrb[152].mxu1 %v4707_v5 }
0x114c   : > { %5839 = vmatprep.mubr.msk.bf16.mxu1 %vm6476_vm2, %v6475_v57 }
0x11af   : > { %v4651_v10 = vpop.f32.mrb[136].mxu0 }
0x11b0   : > { %v4652_v1 = vadd.f32 %v5221_v26, %v4651_v10  ;;  %v5825_v58 = vpop.f32.mrb[137].mxu0 }
0x11b1   : > { %v4654_v19 = vpop.f32.mrb[138].mxu0 }
0x11b2   : > { %v5237_v33 = vmul.f32 -1.702, %v4652_v1  ;;  %v4655_v43 = vadd.f32 %v5221_v26, %v4654_v19  ;;  %v5826_v31 = vpop.f32.mrb[139].mxu0  ;;  %v5239_v26 = vld [vmem:[%s984_s3] ss:$0 sm:$0xff]  ;;  %s4810_s3 = sshll.u32 %s6480_s14, 4  ;;  %s4811_s3 = int_to_ptr.vmem [resolvable:$true] %s4810_s3 }
0x11b3   : > { %s6367_s24 = scalar_lea.vmem %s4811_s3, 768  ;;  %p6374_p12 = scmp.lt.s32.totalorder %s4811_s3, %s4811_s3 }
0x11b4   : > { %v4678_v17 = vmul.f32 1.442695, %v5237_v33  ;;  %v5238_v21 = vmul.f32 -1.702, %v4655_v43  ;;  %p6368_p11 = scmp.ne.s32.totalorder %s4811_s3, %s6367_s24  ;;  %p6375_p0 = scmp.lt.s32.totalorder %s6367_s24, %s6367_s24 }
0x11b6   : > { %6113 = vpow2.f32 %v4678_v17  ;;  %v4680_v36 = vmul.f32 1.442695, %v5238_v21  ;;  %p6369_p13 = pnand %p6368_p11, %p5898_p3  ;;  %p6376_p1 = por %p6375_p0, %p6374_p12 }
0x11b8   : > { %6115 = vpow2.f32 %v4680_v36  ;;  %p6370_p7 = pneg %p6369_p13 }
0x11ba   : > { %p6377_p6 = pnand %p6376_p1, %p6370_p7 }
0x11c0   : > { %v6114_v37 = vpop.eup %6113 }
0x11c1   : > { %v4686_v40 = vadd.f32 1.0, %v6114_v37 }
0x11c2   : > { %v6116_v48 = vpop.eup %6115 }
0x11c3   : > { %6117 = vrcp.f32 %v4686_v40  ;;  %v4687_v38 = vadd.f32 1.0, %v6116_v48 }
0x11c5   : > { %6119 = vrcp.f32 %v4687_v38 }
0x11cd   : > { %v6118_v57 = vpop.eup %6117 }
0x11ce   : > { %v4704_v2 = vmul.f32 %v6118_v57, %v4652_v1 }
0x11cf   : > { %v6120_v42 = vpop.eup %6119 }
0x11d0   : > { %v4705_v29 = vmul.f32 %v6120_v42, %v4655_v43 }
0x11d2   : > { %v4708_v46 = vpack.c.bf16 %v4705_v29, %v4704_v2 }
0x11d4   : > { %5840 = vmatmul.mubr.bf16.gmra.mrb[156].mxu1 %v4708_v46 }
0x1216   : > { %v4766_v25 = vpop.f32.mrb[148].mxu1 }
0x1217   : > { %v4767_v59 = vadd.f32 %v5239_v26, %v4766_v25  ;;  %v5833_v24 = vpop.f32.mrb[149].mxu1 }
0x1218   : > { %v4769_v34 = vpop.f32.mrb[150].mxu1 }
0x1219   : > { %v4789_v41 = vadd.f32 %v4767_v59, %v7839_v35  ;;  %v4770_v56 = vadd.f32 %v5239_v26, %v4769_v34  ;;  %v5834_v0 = vpop.f32.mrb[151].mxu1 }
0x121b   : > { %4795 = vst.msk [vmem:[#allocation16] sm:$0xff] %vm1019_vm1, %v4789_v41  ;;  %v4790_v51 = vadd.f32 %v4770_v56, %v7842_v52 }
0x121d   : > { %4796 = vst.msk [vmem:[#allocation16 + $0x8] sm:$0xff] %vm1019_vm1, %v4790_v51 }
0x121e   : > { %v4774_v7 = vpop.f32.mrb[152].mxu1 }
0x121f   : > { %v4775_v12 = vadd.f32 %v5239_v26, %v4774_v7  ;;  %v5837_v4 = vpop.f32.mrb[153].mxu1 }
0x1220   : > { %v4777_v47 = vpop.f32.mrb[154].mxu1 }
0x1221   : > { %v4791_v28 = vadd.f32 %v4775_v12, %v7851_v44  ;;  %v4778_v9 = vadd.f32 %v5239_v26, %v4777_v47  ;;  %v5838_v62 = vpop.f32.mrb[155].mxu1 }
0x1223   : > { %4797 = vst.msk [vmem:[#allocation16 + $0x10] sm:$0xff] %vm1019_vm1, %v4791_v28  ;;  %v4792_v35 = vadd.f32 %v4778_v9, %v7854_v55 }
0x1225   : > { %4798 = vst.msk [vmem:[#allocation16 + $0x18] sm:$0xff] %vm1019_vm1, %v4792_v35 }
0x12a7   : > { %v4782_v11 = vpop.f32.mrb[156].mxu1 }
0x12a8   : > { %v4783_v52 = vadd.f32 %v5239_v26, %v4782_v11  ;;  %v5841_v32 = vpop.f32.mrb[157].mxu1 }
0x12a9   : > { %v4785_v39 = vpop.f32.mrb[158].mxu1 }
0x12aa   : > { %v4793_v61 = vadd.f32 %v4783_v52, %v7884_v27  ;;  %v4786_v50 = vadd.f32 %v5239_v26, %v4785_v39  ;;  %v5842_v6 = vpop.f32.mrb[159].mxu1 }
0x12ac   : > { %4799 = vst.msk [vmem:[#allocation16 + $0x20] sm:$0xff] %vm1019_vm1, %v4793_v61  ;;  %v4794_v44 = vadd.f32 %v4786_v50, %v7887_v23 }
0x12ae   : > { %4800 = vst.msk [vmem:[#allocation16 + $0x28] sm:$0xff] %vm1019_vm1, %v4794_v44 }
0x12af   : > { %6380 = shalt.err (!%p6377_p6)
}
0x12b0   : > { %s8113_s10 = sld [smem:[#allocation43_spill]] }
0x12b6   : > { %s6381_s15 = scalar_lea.hbm %s8113_s10, 768 }
0x12b7   : > { %p6382_p4 = scmp.ne.s32.totalorder %s8113_s10, %s6381_s15  ;;  %p6387_p8 = scmp.lt.u32.totalorder %s6381_s15, %s8113_s10 }
0x12b9   : > { %p6383_p10 = pnand %p6382_p4, %p5898_p3 }
0x12bb   : > { %p6384_p2 = pneg %p6383_p10 }
0x12bd   : > { %p6389_p9 = pnand %p6387_p8, %p6384_p2 }
0x12bf   : > { %6392 = shalt.err (!%p6389_p9)
}
0x12c0   : > { %s6481_s8 = smov 128   ;;  %s6482_s11 = smov 8  }
0x12c1   : > { %5866 = dma.vmem_to_hbm [thread:$0]  (%p5898_p3), %s4811_s3, 768, %s8113_s10, [#allocation4], %s6481_s8, %s6481_s8, %s6482_s11  }
0x12c2   : > { %6438 = dma.done.wait (%p5898_p3), [#allocation4], 768  }
0x12c3   : > { %6440 = vsyncadd (%p5898_p3), [#allocation4], 4294966528 }
0x12c4 PF: > { %s8114_s5 = sld [smem:[#allocation24_spill]]  ;;  %s8115_s9 = sld [smem:[#allocation23_spill]] }
0x12c5   : > { %s8116_s29 = sld [smem:[#allocation26_spill]]  ;;  %s8117_s26 = sld [smem:[#allocation25_spill]] }
0x12c6   : > { %s8118_s27 = smov %s6447_s28  ;;  %s8120_s30 = smov %s6459_s0 }
0x12ca   : > { %s42_s19 = sadd.s32 1, %s8114_s5   ;;  %s8119_s28 = smov %s8115_s9 }
0x12cb   : > { %p39_p5 = scmp.ge.s32.totalorder %s42_s19, 4   ;;  %s8121_s0 = smov %s8117_s26 }
0x12cd   :  { %41 = sbr.rel (!%p39_p5) target bundleno = 30 (0x1e), region = 241 }
0x12d4   :  { %4826 = vsyncpa [#allocation3], 1 }
0x12d5   :  { %4828 = vsyncpa [#allocation3 + $0x1], 1 }
0x12d6   :  { %4829 = vsyncpa [#allocation6], 1 }
0x12d7   :  { %4831 = vsyncpa [#allocation6 + $0x1], 1 }
0x12d8   :  { %4832 = vsyncpa [#allocation9], 1 }
0x12d9   :  { %4834 = vsyncpa [#allocation9 + $0x1], 1 }
0x12da   :  { %4835 = vsyncpa [#allocation12], 1 }
0x12db   :  { %4837 = vsyncpa [#allocation12 + $0x1], 1 }
0x12dc   :  { %4838 = vsyncpa [#allocation15], 1 }
0x12dd   :  { %4840 = vsyncpa [#allocation15 + $0x1], 1 }
0x12de   :  { %4841 = vsyncpa [#allocation4], 1 }
0x12df   :  { %4843 = vsyncpa [#allocation4 + $0x1], 1 }

</bundles_post_ra>
